<compile_context>
chip_gen: v7x
topology: tpu7x:2x2x1
jax: 0.10.0
libtpu: 0.0.40
codegen_flags: <defaults>
</compile_context>

<pallas_src>
import functools
import math

import numpy as np

import jax
import jax.numpy as jnp
from jax.experimental import pallas as pl
from jax.experimental.pallas import tpu as pltpu

HIDDEN = 64


# --------------------------------------------------------------------------- in-kernel helpers
def _dotf(a, b):
    return jnp.dot(a, b, preferred_element_type=jnp.float32)


def _sigmoid(x):
    # tanh form: a single EUP transcendental per gate (no exp + divide chain).
    return 0.5 * jnp.tanh(0.5 * x) + 0.5


def _cell(gates, c_prev, chunk):
    """LSTM state update; gate chunks of width `chunk` in order (i, f, o, g)."""
    i = _sigmoid(gates[:, 0 * chunk:1 * chunk])
    f = _sigmoid(gates[:, 1 * chunk:2 * chunk])
    o = _sigmoid(gates[:, 2 * chunk:3 * chunk])
    g = jnp.tanh(gates[:, 3 * chunk:4 * chunk])
    c = f * c_prev + i * g
    h = o * jnp.tanh(c)
    return h, c


def _cell_zero(gates, chunk):
    """First step with h_prev = c_prev = 0 (f*c_prev == 0 and h_prev@W_hh == 0 exactly)."""
    i = _sigmoid(gates[:, 0 * chunk:1 * chunk])
    o = _sigmoid(gates[:, 2 * chunk:3 * chunk])
    g = jnp.tanh(gates[:, 3 * chunk:4 * chunk])
    c = i * g
    h = o * jnp.tanh(c)
    return h, c


# --------------------------------------------------------------------------- the fused kernel
def vae_fwd_kernel(x_ref, eps_ref, slab_ref, y_ref, hps_ref, *,
                   layout, seq_len, batch, hidden):
    T, B, H = seq_len, batch, hidden
    C = 2 * H          # packed (fwd|bwd) gate-chunk width for layer 1
    FH = 4 * H         # single-direction gate width (layer 2)

    def ld(name):      # static slab slice -> free
        r0, r, c = layout[name]
        return slab_ref[r0:r0 + r, 0:c]

    def blk(a, t):     # row block t of a time-major flat (T*B, .) array
        return a[t * B:(t + 1) * B, :]

    x = x_ref[...]                                             # (T*B, D), time-major

    # ---------------- encoder layer 1: both directions, lane-packed --------
    # Hoisted input projections (zero-padded per direction so packed gates at
    # step s are just gxf[s] + gxb[T-1-s]; bias for both directions folded in).
    gxf = _dotf(x, ld("wih1f_enc")) + ld("b1_enc")             # (T*B, 4C)
    gxb = _dotf(x, ld("wih1b_enc"))                            # (T*B, 4C)
    whh1 = ld("whh1_enc")                                      # (C, 4C) block-diagonal

    # NOTE: fully unrolled (T=8, H=64 -> live state fits in vregs).  If H grew
    # past ~128, convert to lax.fori_loop(..., unroll=True) over VMEM scratch.
    h, c = _cell_zero(blk(gxf, 0) + blk(gxb, T - 1), C)
    hps_ref[0:B, :] = h                                        # stream, don't concat
    for s in range(1, T):
        gates = blk(gxf, s) + blk(gxb, T - 1 - s) + _dotf(h, whh1)
        h, c = _cell(gates, c, C)
        hps_ref[s * B:(s + 1) * B, :] = h

    # ---------------- encoder layer 2: backward direction only -------------
    # hps row-block s holds [h_f(time s) | h_b(time T-1-s)].  Zero-padded
    # weight halves give time-separable projections G_f / G_b (exact).
    hps = hps_ref[...]                                         # (T*B, C)
    g2 = _dotf(hps, ld("wih2_enc"))                            # (T*B, 8H): [G_f | G_b]
    b2 = ld("b2_enc")
    whh2 = ld("whh2_enc")

    def gx2(t):        # layer-2 input gates at time t: [h_f(t), h_b(t)] @ W2 + b2
        return blk(g2, t)[:, 0:FH] + blk(g2, T - 1 - t)[:, FH:2 * FH] + b2

    h2, c2 = _cell_zero(gx2(T - 1), H)
    for t in range(T - 2, -1, -1):
        h2, c2 = _cell(gx2(t) + _dotf(h2, whh2), c2, H)
    # h2 == h_n[-1]  (B, H): final hidden of last layer's backward direction.

    # ---------------- VAE heads + reparameterize ---------------------------
    head = _dotf(h2, ld("w_head")) + ld("b_head")              # (B, 2Z) = [mu | log_var]
    Z = head.shape[1] // 2
    mu = head[:, 0:Z]
    lv = head[:, Z:2 * Z]
    z = mu + eps_ref[...] * jnp.exp(0.5 * lv)                  # eps ~ U[0,1) (torch.rand_like)

    # ---------------- decoder: seq len 1, zero-state shortcuts exact -------
    g1d = _dotf(z, ld("wih1_dec")) + ld("b1_dec")              # (B, 4C) packed both dirs
    h1d, _ = _cell_zero(g1d, C)                                # (B, C) = [h_f | h_b]
    g2d = _dotf(h1d, ld("wih2_dec")) + ld("b2_dec")            # (B, 4H) bwd dir only
    h2d, _ = _cell_zero(g2d, H)                                # h_n1[-1]  (B, H)
    out = _dotf(h2d, ld("w_out")) + ld("b_out")                # (B, Dout)

    # single packed output: [out | mu | log_var]
    y_ref[...] = jnp.concatenate([out, head], axis=1)


# --------------------------------------------------------------------------- wrapper
def rnn_forward(params, x, eps, *, layout):
    B, T, D = x.shape
    H = HIDDEN
    zdim = eps.shape[-1]
    dout = layout["w_out"][2]

    x_flat = jnp.transpose(x, (1, 0, 2)).reshape(T * B, D)     # time-major flat

    kernel = functools.partial(vae_fwd_kernel, layout=layout,
                               seq_len=T, batch=B, hidden=H)
    y = pl.pallas_call(
        kernel,
        out_shape=jax.ShapeDtypeStruct((B, dout + 2 * zdim), jnp.float32),
        scratch_shapes=[pltpu.VMEM((T * B, 2 * H), jnp.float32)],
    )(x_flat, eps, params["slab"])

    out = y[:, 0:dout]
    mu = y[:, dout:dout + zdim]
    log_var = y[:, dout + zdim:dout + 2 * zdim]
    return out, mu, log_var


# --------------------------------------------------------------------------- parameter packing (init-time, numpy)
def _perm_ifog(w, H):
    """Canonical PyTorch gate order (i,f,g,o) -> kernel order (i,f,o,g)."""
    i, f, g, o = (w[:, k * H:(k + 1) * H] for k in range(4))
    return np.concatenate([i, f, o, g], axis=1)


def _pack_bidir(wf, wb, H):
    """(rows,4H) fwd + (rows,4H) bwd (canonical i,f,g,o) -> (rows, 8H) packed
    as [i_f,i_b | f_f,f_b | o_f,o_b | g_f,g_b] (128-lane aligned chunks)."""
    order = (0, 1, 3, 2)   # i, f, o, g
    cols = []
    for k in order:
        cols.append(wf[:, k * H:(k + 1) * H])
        cols.append(wb[:, k * H:(k + 1) * H])
    return np.concatenate(cols, axis=1)


def _build_slab(entries, width):
    layout = {}
    row = 0
    for name, a in entries:
        r, c = a.shape
        assert c <= width, name
        layout[name] = (row, r, c)
        row += ((r + 7) // 8) * 8          # keep every param 8-sublane aligned
    slab = np.zeros((row, width), np.float32)
    for name, a in entries:
        r0, r, c = layout[name]
        slab[r0:r0 + r, :c] = a
    return jnp.asarray(slab), layout


def init_params(key, hidden=HIDDEN, in_enc=4, zdim=3, out_dim=4):
    H = hidden

    def uniform(k, shape, bound):
        return np.asarray(jax.random.uniform(k, shape, jnp.float32, -bound, bound))

    def lstm_dir(key, d_in):
        bound = 1.0 / math.sqrt(H)
        key, k1, k2, k3, k4 = jax.random.split(key, 5)
        w_ih = uniform(k1, (d_in, 4 * H), bound)     # pre-transposed (in, 4H), torch gate order
        w_hh = uniform(k2, (H, 4 * H), bound)
        b = uniform(k3, (1, 4 * H), bound) + uniform(k4, (1, 4 * H), bound)   # b_ih + b_hh
        return key, (w_ih, w_hh, b)

    def linear(key, d_in, d_out):
        bound = 1.0 / math.sqrt(d_in)
        key, kw, kb = jax.random.split(key, 3)
        return key, (uniform(kw, (d_in, d_out), bound), uniform(kb, (1, d_out), bound))

    # encoder BiLSTM (layer-2 fwd direction is dead work: generated only for structure)
    key, (e1f_wi, e1f_wh, e1f_b) = lstm_dir(key, in_enc)
    key, (e1b_wi, e1b_wh, e1b_b) = lstm_dir(key, in_enc)
    key, (_e2f_wi, _e2f_wh, _e2f_b) = lstm_dir(key, 2 * H)
    key, (e2b_wi, e2b_wh, e2b_b) = lstm_dir(key, 2 * H)
    # heads
    key, (w_mu, b_mu) = linear(key, H, zdim)
    key, (w_lv, b_lv) = linear(key, H, zdim)
    # decoder BiLSTM
    key, (d1f_wi, _d1f_wh, d1f_b) = lstm_dir(key, zdim)        # T=1 -> W_hh unused
    key, (d1b_wi, _d1b_wh, d1b_b) = lstm_dir(key, zdim)
    key, (_d2f_wi, _d2f_wh, _d2f_b) = lstm_dir(key, 2 * H)
    key, (d2b_wi, _d2b_wh, d2b_b) = lstm_dir(key, 2 * H)
    # output head
    key, (w_out, b_out) = linear(key, H, out_dim)

    zi = np.zeros_like(e1f_wi)
    zh = np.zeros_like(e1f_wh)

    # encoder layer-2 bwd W_ih, split by input half (fwd rows / bwd rows) and
    # zero-padded so a single matmul on the packed layer-1 scratch is exact.
    wih2_perm = _perm_ifog(e2b_wi, H)                          # (2H, 4H)
    wih2_enc = np.concatenate([
        np.concatenate([wih2_perm[:H], np.zeros((H, 4 * H), np.float32)], axis=0),
        np.concatenate([np.zeros((H, 4 * H), np.float32), wih2_perm[H:]], axis=0),
    ], axis=1)                                                 # (2H, 8H)

    entries = [
        ("wih1f_enc", _pack_bidir(e1f_wi, zi, H)),
        ("wih1b_enc", _pack_bidir(zi, e1b_wi, H)),
        ("b1_enc",    _pack_bidir(e1f_b, e1b_b, H)),
        ("whh1_enc",  np.concatenate([_pack_bidir(e1f_wh, zh, H),
                                      _pack_bidir(zh, e1b_wh, H)], axis=0)),
        ("wih2_enc",  wih2_enc),
        ("b2_enc",    _perm_ifog(e2b_b, H)),
        ("whh2_enc",  _perm_ifog(e2b_wh, H)),
        ("w_head",    np.concatenate([w_mu, w_lv], axis=1)),
        ("b_head",    np.concatenate([b_mu, b_lv], axis=1)),
        ("wih1_dec",  _pack_bidir(d1f_wi, d1b_wi, H)),
        ("b1_dec",    _pack_bidir(d1f_b, d1b_b, H)),
        ("wih2_dec",  _perm_ifog(d2b_wi, H)),
        ("b2_dec",    _perm_ifog(d2b_b, H)),
        ("w_out",     w_out),
        ("b_out",     b_out),
    ]
    slab, layout = _build_slab(entries, width=8 * H)
    return {"slab": slab}, layout


# --------------------------------------------------------------------------- main
if __name__ == "__main__":
    key = jax.random.PRNGKey(0)
    key, kx, keps, kp = jax.random.split(key, 4)

    B, T, F = 2, 8, 4
    x = jax.random.normal(kx, (B, T, F), dtype=jnp.float32)
    params, layout = init_params(kp, hidden=HIDDEN)
    eps = jax.random.uniform(keps, (B, 3), dtype=jnp.float32)   # torch.rand_like

    fwd = jax.jit(functools.partial(rnn_forward, layout=layout))
    out, mu, log_var = fwd(params, x, eps)
    jax.block_until_ready((out, mu, log_var))

    assert out.shape == (B, 4) and mu.shape == (B, 3) and log_var.shape == (B, 3)
    assert bool(jnp.all(jnp.isfinite(out)))
    assert bool(jnp.all(jnp.isfinite(mu)))
    assert bool(jnp.all(jnp.isfinite(log_var)))
    print("KERNEL_OK")
</pallas_src>

<mosaic_0001>
module attributes {stable_mosaic.version = 11 : i64} {
  func.func @vae_fwd_kernel(%arg0: memref<16x4xf32, #tpu.memory_space<vmem>>, %arg1: memref<2x3xf32, #tpu.memory_space<vmem>>, %arg2: memref<648x512xf32, #tpu.memory_space<vmem>>, %arg3: memref<2x10xf32, #tpu.memory_space<vmem>>, %arg4: memref<16x128xf32, #tpu.memory_space<vmem>>) attributes {dimension_semantics = [], scalar_prefetch = 0 : i64, scratch_operands = 1 : i64, tpu.core_type = #tpu.core_type<tc>} {
    %c0 = arith.constant 0 : index
    %c0_0 = arith.constant 0 : index
    %0 = vector.load %arg0[%c0, %c0_0] : memref<16x4xf32, #tpu.memory_space<vmem>>, vector<16x4xf32>
    %c0_1 = arith.constant 0 : index
    %c0_2 = arith.constant 0 : index
    %1 = vector.load %arg2[%c0_1, %c0_2] : memref<648x512xf32, #tpu.memory_space<vmem>>, vector<4x512xf32>
    %cst = arith.constant dense<0.000000e+00> : vector<16x512xf32>
    %2 = tpu.matmul %0, %1, %cst {dimension_numbers = #tpu.dot_dimension_numbers<[1], [0], [0], [1], [0, 0, 1, 1], [], []>} : vector<16x4xf32>, vector<4x512xf32>, vector<16x512xf32> -> vector<16x512xf32>
    %c16 = arith.constant 16 : index
    %c0_3 = arith.constant 0 : index
    %3 = vector.load %arg2[%c16, %c0_3] : memref<648x512xf32, #tpu.memory_space<vmem>>, vector<1x512xf32>
    %4 = vector.broadcast %3 : vector<1x512xf32> to vector<16x512xf32>
    %5 = arith.addf %2, %4 : vector<16x512xf32>
    %c8 = arith.constant 8 : index
    %c0_4 = arith.constant 0 : index
    %6 = vector.load %arg2[%c8, %c0_4] : memref<648x512xf32, #tpu.memory_space<vmem>>, vector<4x512xf32>
    %cst_5 = arith.constant dense<0.000000e+00> : vector<16x512xf32>
    %7 = tpu.matmul %0, %6, %cst_5 {dimension_numbers = #tpu.dot_dimension_numbers<[1], [0], [0], [1], [0, 0, 1, 1], [], []>} : vector<16x4xf32>, vector<4x512xf32>, vector<16x512xf32> -> vector<16x512xf32>
    %c24 = arith.constant 24 : index
    %c0_6 = arith.constant 0 : index
    %8 = vector.load %arg2[%c24, %c0_6] : memref<648x512xf32, #tpu.memory_space<vmem>>, vector<128x512xf32>
    %9 = vector.extract_strided_slice %5 {offsets = [0, 0], sizes = [2, 512], strides = [1, 1]} : vector<16x512xf32> to vector<2x512xf32>
    %10 = vector.extract_strided_slice %7 {offsets = [14, 0], sizes = [2, 512], strides = [1, 1]} : vector<16x512xf32> to vector<2x512xf32>
    %11 = arith.addf %9, %10 : vector<2x512xf32>
    %12 = vector.extract_strided_slice %11 {offsets = [0, 0], sizes = [2, 128], strides = [1, 1]} : vector<2x512xf32> to vector<2x128xf32>
    %cst_7 = arith.constant 5.000000e-01 : f32
    %13 = vector.broadcast %cst_7 : f32 to vector<2x128xf32>
    %14 = arith.mulf %13, %12 : vector<2x128xf32>
    %15 = math.tanh %14 : vector<2x128xf32>
    %cst_8 = arith.constant 5.000000e-01 : f32
    %16 = vector.broadcast %cst_8 : f32 to vector<2x128xf32>
    %17 = arith.mulf %16, %15 : vector<2x128xf32>
    %cst_9 = arith.constant 5.000000e-01 : f32
    %18 = vector.broadcast %cst_9 : f32 to vector<2x128xf32>
    %19 = arith.addf %17, %18 : vector<2x128xf32>
    %20 = vector.extract_strided_slice %11 {offsets = [0, 256], sizes = [2, 128], strides = [1, 1]} : vector<2x512xf32> to vector<2x128xf32>
    %cst_10 = arith.constant 5.000000e-01 : f32
    %21 = vector.broadcast %cst_10 : f32 to vector<2x128xf32>
    %22 = arith.mulf %21, %20 : vector<2x128xf32>
    %23 = math.tanh %22 : vector<2x128xf32>
    %cst_11 = arith.constant 5.000000e-01 : f32
    %24 = vector.broadcast %cst_11 : f32 to vector<2x128xf32>
    %25 = arith.mulf %24, %23 : vector<2x128xf32>
    %cst_12 = arith.constant 5.000000e-01 : f32
    %26 = vector.broadcast %cst_12 : f32 to vector<2x128xf32>
    %27 = arith.addf %25, %26 : vector<2x128xf32>
    %28 = vector.extract_strided_slice %11 {offsets = [0, 384], sizes = [2, 128], strides = [1, 1]} : vector<2x512xf32> to vector<2x128xf32>
    %29 = math.tanh %28 : vector<2x128xf32>
    %30 = arith.mulf %19, %29 : vector<2x128xf32>
    %31 = math.tanh %30 : vector<2x128xf32>
    %32 = arith.mulf %27, %31 : vector<2x128xf32>
    %c0_13 = arith.constant 0 : index
    %c0_14 = arith.constant 0 : index
    %33 = vector.load %arg4[%c0_13, %c0_14] : memref<16x128xf32, #tpu.memory_space<vmem>>, vector<2x128xf32>
    tpu.vector_store %arg4[%c0_13, %c0_14], %32 {strides = array<i32>} : memref<16x128xf32, #tpu.memory_space<vmem>>, vector<2x128xf32>,
    %34 = vector.extract_strided_slice %5 {offsets = [2, 0], sizes = [2, 512], strides = [1, 1]} : vector<16x512xf32> to vector<2x512xf32>
    %35 = vector.extract_strided_slice %7 {offsets = [12, 0], sizes = [2, 512], strides = [1, 1]} : vector<16x512xf32> to vector<2x512xf32>
    %36 = arith.addf %34, %35 : vector<2x512xf32>
    %cst_15 = arith.constant dense<0.000000e+00> : vector<2x512xf32>
    %37 = tpu.matmul %32, %8, %cst_15 {dimension_numbers = #tpu.dot_dimension_numbers<[1], [0], [0], [1], [0, 0, 1, 1], [], []>} : vector<2x128xf32>, vector<128x512xf32>, vector<2x512xf32> -> vector<2x512xf32>
    %38 = arith.addf %36, %37 : vector<2x512xf32>
    %39 = vector.extract_strided_slice %38 {offsets = [0, 0], sizes = [2, 128], strides = [1, 1]} : vector<2x512xf32> to vector<2x128xf32>
    %cst_16 = arith.constant 5.000000e-01 : f32
    %40 = vector.broadcast %cst_16 : f32 to vector<2x128xf32>
    %41 = arith.mulf %40, %39 : vector<2x128xf32>
    %42 = math.tanh %41 : vector<2x128xf32>
    %cst_17 = arith.constant 5.000000e-01 : f32
    %43 = vector.broadcast %cst_17 : f32 to vector<2x128xf32>
    %44 = arith.mulf %43, %42 : vector<2x128xf32>
    %cst_18 = arith.constant 5.000000e-01 : f32
    %45 = vector.broadcast %cst_18 : f32 to vector<2x128xf32>
    %46 = arith.addf %44, %45 : vector<2x128xf32>
    %47 = vector.extract_strided_slice %38 {offsets = [0, 128], sizes = [2, 128], strides = [1, 1]} : vector<2x512xf32> to vector<2x128xf32>
    %cst_19 = arith.constant 5.000000e-01 : f32
    %48 = vector.broadcast %cst_19 : f32 to vector<2x128xf32>
    %49 = arith.mulf %48, %47 : vector<2x128xf32>
    %50 = math.tanh %49 : vector<2x128xf32>
    %cst_20 = arith.constant 5.000000e-01 : f32
    %51 = vector.broadcast %cst_20 : f32 to vector<2x128xf32>
    %52 = arith.mulf %51, %50 : vector<2x128xf32>
    %cst_21 = arith.constant 5.000000e-01 : f32
    %53 = vector.broadcast %cst_21 : f32 to vector<2x128xf32>
    %54 = arith.addf %52, %53 : vector<2x128xf32>
    %55 = vector.extract_strided_slice %38 {offsets = [0, 256], sizes = [2, 128], strides = [1, 1]} : vector<2x512xf32> to vector<2x128xf32>
    %cst_22 = arith.constant 5.000000e-01 : f32
    %56 = vector.broadcast %cst_22 : f32 to vector<2x128xf32>
    %57 = arith.mulf %56, %55 : vector<2x128xf32>
    %58 = math.tanh %57 : vector<2x128xf32>
    %cst_23 = arith.constant 5.000000e-01 : f32
    %59 = vector.broadcast %cst_23 : f32 to vector<2x128xf32>
    %60 = arith.mulf %59, %58 : vector<2x128xf32>
    %cst_24 = arith.constant 5.000000e-01 : f32
    %61 = vector.broadcast %cst_24 : f32 to vector<2x128xf32>
    %62 = arith.addf %60, %61 : vector<2x128xf32>
    %63 = vector.extract_strided_slice %38 {offsets = [0, 384], sizes = [2, 128], strides = [1, 1]} : vector<2x512xf32> to vector<2x128xf32>
    %64 = math.tanh %63 : vector<2x128xf32>
    %65 = arith.mulf %54, %30 : vector<2x128xf32>
    %66 = arith.mulf %46, %64 : vector<2x128xf32>
    %67 = arith.addf %65, %66 : vector<2x128xf32>
    %68 = math.tanh %67 : vector<2x128xf32>
    %69 = arith.mulf %62, %68 : vector<2x128xf32>
    %c2 = arith.constant 2 : index
    %c0_25 = arith.constant 0 : index
    %70 = vector.load %arg4[%c2, %c0_25] : memref<16x128xf32, #tpu.memory_space<vmem>>, vector<2x128xf32>
    tpu.vector_store %arg4[%c2, %c0_25], %69 {strides = array<i32>} : memref<16x128xf32, #tpu.memory_space<vmem>>, vector<2x128xf32>,
    %71 = vector.extract_strided_slice %5 {offsets = [4, 0], sizes = [2, 512], strides = [1, 1]} : vector<16x512xf32> to vector<2x512xf32>
    %72 = vector.extract_strided_slice %7 {offsets = [10, 0], sizes = [2, 512], strides = [1, 1]} : vector<16x512xf32> to vector<2x512xf32>
    %73 = arith.addf %71, %72 : vector<2x512xf32>
    %cst_26 = arith.constant dense<0.000000e+00> : vector<2x512xf32>
    %74 = tpu.matmul %69, %8, %cst_26 {dimension_numbers = #tpu.dot_dimension_numbers<[1], [0], [0], [1], [0, 0, 1, 1], [], []>} : vector<2x128xf32>, vector<128x512xf32>, vector<2x512xf32> -> vector<2x512xf32>
    %75 = arith.addf %73, %74 : vector<2x512xf32>
    %76 = vector.extract_strided_slice %75 {offsets = [0, 0], sizes = [2, 128], strides = [1, 1]} : vector<2x512xf32> to vector<2x128xf32>
    %cst_27 = arith.constant 5.000000e-01 : f32
    %77 = vector.broadcast %cst_27 : f32 to vector<2x128xf32>
    %78 = arith.mulf %77, %76 : vector<2x128xf32>
    %79 = math.tanh %78 : vector<2x128xf32>
    %cst_28 = arith.constant 5.000000e-01 : f32
    %80 = vector.broadcast %cst_28 : f32 to vector<2x128xf32>
    %81 = arith.mulf %80, %79 : vector<2x128xf32>
    %cst_29 = arith.constant 5.000000e-01 : f32
    %82 = vector.broadcast %cst_29 : f32 to vector<2x128xf32>
    %83 = arith.addf %81, %82 : vector<2x128xf32>
    %84 = vector.extract_strided_slice %75 {offsets = [0, 128], sizes = [2, 128], strides = [1, 1]} : vector<2x512xf32> to vector<2x128xf32>
    %cst_30 = arith.constant 5.000000e-01 : f32
    %85 = vector.broadcast %cst_30 : f32 to vector<2x128xf32>
    %86 = arith.mulf %85, %84 : vector<2x128xf32>
    %87 = math.tanh %86 : vector<2x128xf32>
    %cst_31 = arith.constant 5.000000e-01 : f32
    %88 = vector.broadcast %cst_31 : f32 to vector<2x128xf32>
    %89 = arith.mulf %88, %87 : vector<2x128xf32>
    %cst_32 = arith.constant 5.000000e-01 : f32
    %90 = vector.broadcast %cst_32 : f32 to vector<2x128xf32>
    %91 = arith.addf %89, %90 : vector<2x128xf32>
    %92 = vector.extract_strided_slice %75 {offsets = [0, 256], sizes = [2, 128], strides = [1, 1]} : vector<2x512xf32> to vector<2x128xf32>
    %cst_33 = arith.constant 5.000000e-01 : f32
    %93 = vector.broadcast %cst_33 : f32 to vector<2x128xf32>
    %94 = arith.mulf %93, %92 : vector<2x128xf32>
    %95 = math.tanh %94 : vector<2x128xf32>
    %cst_34 = arith.constant 5.000000e-01 : f32
    %96 = vector.broadcast %cst_34 : f32 to vector<2x128xf32>
    %97 = arith.mulf %96, %95 : vector<2x128xf32>
    %cst_35 = arith.constant 5.000000e-01 : f32
    %98 = vector.broadcast %cst_35 : f32 to vector<2x128xf32>
    %99 = arith.addf %97, %98 : vector<2x128xf32>
    %100 = vector.extract_strided_slice %75 {offsets = [0, 384], sizes = [2, 128], strides = [1, 1]} : vector<2x512xf32> to vector<2x128xf32>
    %101 = math.tanh %100 : vector<2x128xf32>
    %102 = arith.mulf %91, %67 : vector<2x128xf32>
    %103 = arith.mulf %83, %101 : vector<2x128xf32>
    %104 = arith.addf %102, %103 : vector<2x128xf32>
    %105 = math.tanh %104 : vector<2x128xf32>
    %106 = arith.mulf %99, %105 : vector<2x128xf32>
    %c4 = arith.constant 4 : index
    %c0_36 = arith.constant 0 : index
    %107 = vector.load %arg4[%c4, %c0_36] : memref<16x128xf32, #tpu.memory_space<vmem>>, vector<2x128xf32>
    tpu.vector_store %arg4[%c4, %c0_36], %106 {strides = array<i32>} : memref<16x128xf32, #tpu.memory_space<vmem>>, vector<2x128xf32>,
    %108 = vector.extract_strided_slice %5 {offsets = [6, 0], sizes = [2, 512], strides = [1, 1]} : vector<16x512xf32> to vector<2x512xf32>
    %109 = vector.extract_strided_slice %7 {offsets = [8, 0], sizes = [2, 512], strides = [1, 1]} : vector<16x512xf32> to vector<2x512xf32>
    %110 = arith.addf %108, %109 : vector<2x512xf32>
    %cst_37 = arith.constant dense<0.000000e+00> : vector<2x512xf32>
    %111 = tpu.matmul %106, %8, %cst_37 {dimension_numbers = #tpu.dot_dimension_numbers<[1], [0], [0], [1], [0, 0, 1, 1], [], []>} : vector<2x128xf32>, vector<128x512xf32>, vector<2x512xf32> -> vector<2x512xf32>
    %112 = arith.addf %110, %111 : vector<2x512xf32>
    %113 = vector.extract_strided_slice %112 {offsets = [0, 0], sizes = [2, 128], strides = [1, 1]} : vector<2x512xf32> to vector<2x128xf32>
    %cst_38 = arith.constant 5.000000e-01 : f32
    %114 = vector.broadcast %cst_38 : f32 to vector<2x128xf32>
    %115 = arith.mulf %114, %113 : vector<2x128xf32>
    %116 = math.tanh %115 : vector<2x128xf32>
    %cst_39 = arith.constant 5.000000e-01 : f32
    %117 = vector.broadcast %cst_39 : f32 to vector<2x128xf32>
    %118 = arith.mulf %117, %116 : vector<2x128xf32>
    %cst_40 = arith.constant 5.000000e-01 : f32
    %119 = vector.broadcast %cst_40 : f32 to vector<2x128xf32>
    %120 = arith.addf %118, %119 : vector<2x128xf32>
    %121 = vector.extract_strided_slice %112 {offsets = [0, 128], sizes = [2, 128], strides = [1, 1]} : vector<2x512xf32> to vector<2x128xf32>
    %cst_41 = arith.constant 5.000000e-01 : f32
    %122 = vector.broadcast %cst_41 : f32 to vector<2x128xf32>
    %123 = arith.mulf %122, %121 : vector<2x128xf32>
    %124 = math.tanh %123 : vector<2x128xf32>
    %cst_42 = arith.constant 5.000000e-01 : f32
    %125 = vector.broadcast %cst_42 : f32 to vector<2x128xf32>
    %126 = arith.mulf %125, %124 : vector<2x128xf32>
    %cst_43 = arith.constant 5.000000e-01 : f32
    %127 = vector.broadcast %cst_43 : f32 to vector<2x128xf32>
    %128 = arith.addf %126, %127 : vector<2x128xf32>
    %129 = vector.extract_strided_slice %112 {offsets = [0, 256], sizes = [2, 128], strides = [1, 1]} : vector<2x512xf32> to vector<2x128xf32>
    %cst_44 = arith.constant 5.000000e-01 : f32
    %130 = vector.broadcast %cst_44 : f32 to vector<2x128xf32>
    %131 = arith.mulf %130, %129 : vector<2x128xf32>
    %132 = math.tanh %131 : vector<2x128xf32>
    %cst_45 = arith.constant 5.000000e-01 : f32
    %133 = vector.broadcast %cst_45 : f32 to vector<2x128xf32>
    %134 = arith.mulf %133, %132 : vector<2x128xf32>
    %cst_46 = arith.constant 5.000000e-01 : f32
    %135 = vector.broadcast %cst_46 : f32 to vector<2x128xf32>
    %136 = arith.addf %134, %135 : vector<2x128xf32>
    %137 = vector.extract_strided_slice %112 {offsets = [0, 384], sizes = [2, 128], strides = [1, 1]} : vector<2x512xf32> to vector<2x128xf32>
    %138 = math.tanh %137 : vector<2x128xf32>
    %139 = arith.mulf %128, %104 : vector<2x128xf32>
    %140 = arith.mulf %120, %138 : vector<2x128xf32>
    %141 = arith.addf %139, %140 : vector<2x128xf32>
    %142 = math.tanh %141 : vector<2x128xf32>
    %143 = arith.mulf %136, %142 : vector<2x128xf32>
    %c6 = arith.constant 6 : index
    %c0_47 = arith.constant 0 : index
    %144 = vector.load %arg4[%c6, %c0_47] : memref<16x128xf32, #tpu.memory_space<vmem>>, vector<2x128xf32>
    tpu.vector_store %arg4[%c6, %c0_47], %143 {strides = array<i32>} : memref<16x128xf32, #tpu.memory_space<vmem>>, vector<2x128xf32>,
    %145 = vector.extract_strided_slice %5 {offsets = [8, 0], sizes = [2, 512], strides = [1, 1]} : vector<16x512xf32> to vector<2x512xf32>
    %146 = vector.extract_strided_slice %7 {offsets = [6, 0], sizes = [2, 512], strides = [1, 1]} : vector<16x512xf32> to vector<2x512xf32>
    %147 = arith.addf %145, %146 : vector<2x512xf32>
    %cst_48 = arith.constant dense<0.000000e+00> : vector<2x512xf32>
    %148 = tpu.matmul %143, %8, %cst_48 {dimension_numbers = #tpu.dot_dimension_numbers<[1], [0], [0], [1], [0, 0, 1, 1], [], []>} : vector<2x128xf32>, vector<128x512xf32>, vector<2x512xf32> -> vector<2x512xf32>
    %149 = arith.addf %147, %148 : vector<2x512xf32>
    %150 = vector.extract_strided_slice %149 {offsets = [0, 0], sizes = [2, 128], strides = [1, 1]} : vector<2x512xf32> to vector<2x128xf32>
    %cst_49 = arith.constant 5.000000e-01 : f32
    %151 = vector.broadcast %cst_49 : f32 to vector<2x128xf32>
    %152 = arith.mulf %151, %150 : vector<2x128xf32>
    %153 = math.tanh %152 : vector<2x128xf32>
    %cst_50 = arith.constant 5.000000e-01 : f32
    %154 = vector.broadcast %cst_50 : f32 to vector<2x128xf32>
    %155 = arith.mulf %154, %153 : vector<2x128xf32>
    %cst_51 = arith.constant 5.000000e-01 : f32
    %156 = vector.broadcast %cst_51 : f32 to vector<2x128xf32>
    %157 = arith.addf %155, %156 : vector<2x128xf32>
    %158 = vector.extract_strided_slice %149 {offsets = [0, 128], sizes = [2, 128], strides = [1, 1]} : vector<2x512xf32> to vector<2x128xf32>
    %cst_52 = arith.constant 5.000000e-01 : f32
    %159 = vector.broadcast %cst_52 : f32 to vector<2x128xf32>
    %160 = arith.mulf %159, %158 : vector<2x128xf32>
    %161 = math.tanh %160 : vector<2x128xf32>
    %cst_53 = arith.constant 5.000000e-01 : f32
    %162 = vector.broadcast %cst_53 : f32 to vector<2x128xf32>
    %163 = arith.mulf %162, %161 : vector<2x128xf32>
    %cst_54 = arith.constant 5.000000e-01 : f32
    %164 = vector.broadcast %cst_54 : f32 to vector<2x128xf32>
    %165 = arith.addf %163, %164 : vector<2x128xf32>
    %166 = vector.extract_strided_slice %149 {offsets = [0, 256], sizes = [2, 128], strides = [1, 1]} : vector<2x512xf32> to vector<2x128xf32>
    %cst_55 = arith.constant 5.000000e-01 : f32
    %167 = vector.broadcast %cst_55 : f32 to vector<2x128xf32>
    %168 = arith.mulf %167, %166 : vector<2x128xf32>
    %169 = math.tanh %168 : vector<2x128xf32>
    %cst_56 = arith.constant 5.000000e-01 : f32
    %170 = vector.broadcast %cst_56 : f32 to vector<2x128xf32>
    %171 = arith.mulf %170, %169 : vector<2x128xf32>
    %cst_57 = arith.constant 5.000000e-01 : f32
    %172 = vector.broadcast %cst_57 : f32 to vector<2x128xf32>
    %173 = arith.addf %171, %172 : vector<2x128xf32>
    %174 = vector.extract_strided_slice %149 {offsets = [0, 384], sizes = [2, 128], strides = [1, 1]} : vector<2x512xf32> to vector<2x128xf32>
    %175 = math.tanh %174 : vector<2x128xf32>
    %176 = arith.mulf %165, %141 : vector<2x128xf32>
    %177 = arith.mulf %157, %175 : vector<2x128xf32>
    %178 = arith.addf %176, %177 : vector<2x128xf32>
    %179 = math.tanh %178 : vector<2x128xf32>
    %180 = arith.mulf %173, %179 : vector<2x128xf32>
    %c8_58 = arith.constant 8 : index
    %c0_59 = arith.constant 0 : index
    %181 = vector.load %arg4[%c8_58, %c0_59] : memref<16x128xf32, #tpu.memory_space<vmem>>, vector<2x128xf32>
    tpu.vector_store %arg4[%c8_58, %c0_59], %180 {strides = array<i32>} : memref<16x128xf32, #tpu.memory_space<vmem>>, vector<2x128xf32>,
    %182 = vector.extract_strided_slice %5 {offsets = [10, 0], sizes = [2, 512], strides = [1, 1]} : vector<16x512xf32> to vector<2x512xf32>
    %183 = vector.extract_strided_slice %7 {offsets = [4, 0], sizes = [2, 512], strides = [1, 1]} : vector<16x512xf32> to vector<2x512xf32>
    %184 = arith.addf %182, %183 : vector<2x512xf32>
    %cst_60 = arith.constant dense<0.000000e+00> : vector<2x512xf32>
    %185 = tpu.matmul %180, %8, %cst_60 {dimension_numbers = #tpu.dot_dimension_numbers<[1], [0], [0], [1], [0, 0, 1, 1], [], []>} : vector<2x128xf32>, vector<128x512xf32>, vector<2x512xf32> -> vector<2x512xf32>
    %186 = arith.addf %184, %185 : vector<2x512xf32>
    %187 = vector.extract_strided_slice %186 {offsets = [0, 0], sizes = [2, 128], strides = [1, 1]} : vector<2x512xf32> to vector<2x128xf32>
    %cst_61 = arith.constant 5.000000e-01 : f32
    %188 = vector.broadcast %cst_61 : f32 to vector<2x128xf32>
    %189 = arith.mulf %188, %187 : vector<2x128xf32>
    %190 = math.tanh %189 : vector<2x128xf32>
    %cst_62 = arith.constant 5.000000e-01 : f32
    %191 = vector.broadcast %cst_62 : f32 to vector<2x128xf32>
    %192 = arith.mulf %191, %190 : vector<2x128xf32>
    %cst_63 = arith.constant 5.000000e-01 : f32
    %193 = vector.broadcast %cst_63 : f32 to vector<2x128xf32>
    %194 = arith.addf %192, %193 : vector<2x128xf32>
    %195 = vector.extract_strided_slice %186 {offsets = [0, 128], sizes = [2, 128], strides = [1, 1]} : vector<2x512xf32> to vector<2x128xf32>
    %cst_64 = arith.constant 5.000000e-01 : f32
    %196 = vector.broadcast %cst_64 : f32 to vector<2x128xf32>
    %197 = arith.mulf %196, %195 : vector<2x128xf32>
    %198 = math.tanh %197 : vector<2x128xf32>
    %cst_65 = arith.constant 5.000000e-01 : f32
    %199 = vector.broadcast %cst_65 : f32 to vector<2x128xf32>
    %200 = arith.mulf %199, %198 : vector<2x128xf32>
    %cst_66 = arith.constant 5.000000e-01 : f32
    %201 = vector.broadcast %cst_66 : f32 to vector<2x128xf32>
    %202 = arith.addf %200, %201 : vector<2x128xf32>
    %203 = vector.extract_strided_slice %186 {offsets = [0, 256], sizes = [2, 128], strides = [1, 1]} : vector<2x512xf32> to vector<2x128xf32>
    %cst_67 = arith.constant 5.000000e-01 : f32
    %204 = vector.broadcast %cst_67 : f32 to vector<2x128xf32>
    %205 = arith.mulf %204, %203 : vector<2x128xf32>
    %206 = math.tanh %205 : vector<2x128xf32>
    %cst_68 = arith.constant 5.000000e-01 : f32
    %207 = vector.broadcast %cst_68 : f32 to vector<2x128xf32>
    %208 = arith.mulf %207, %206 : vector<2x128xf32>
    %cst_69 = arith.constant 5.000000e-01 : f32
    %209 = vector.broadcast %cst_69 : f32 to vector<2x128xf32>
    %210 = arith.addf %208, %209 : vector<2x128xf32>
    %211 = vector.extract_strided_slice %186 {offsets = [0, 384], sizes = [2, 128], strides = [1, 1]} : vector<2x512xf32> to vector<2x128xf32>
    %212 = math.tanh %211 : vector<2x128xf32>
    %213 = arith.mulf %202, %178 : vector<2x128xf32>
    %214 = arith.mulf %194, %212 : vector<2x128xf32>
    %215 = arith.addf %213, %214 : vector<2x128xf32>
    %216 = math.tanh %215 : vector<2x128xf32>
    %217 = arith.mulf %210, %216 : vector<2x128xf32>
    %c10 = arith.constant 10 : index
    %c0_70 = arith.constant 0 : index
    %218 = vector.load %arg4[%c10, %c0_70] : memref<16x128xf32, #tpu.memory_space<vmem>>, vector<2x128xf32>
    tpu.vector_store %arg4[%c10, %c0_70], %217 {strides = array<i32>} : memref<16x128xf32, #tpu.memory_space<vmem>>, vector<2x128xf32>,
    %219 = vector.extract_strided_slice %5 {offsets = [12, 0], sizes = [2, 512], strides = [1, 1]} : vector<16x512xf32> to vector<2x512xf32>
    %220 = vector.extract_strided_slice %7 {offsets = [2, 0], sizes = [2, 512], strides = [1, 1]} : vector<16x512xf32> to vector<2x512xf32>
    %221 = arith.addf %219, %220 : vector<2x512xf32>
    %cst_71 = arith.constant dense<0.000000e+00> : vector<2x512xf32>
    %222 = tpu.matmul %217, %8, %cst_71 {dimension_numbers = #tpu.dot_dimension_numbers<[1], [0], [0], [1], [0, 0, 1, 1], [], []>} : vector<2x128xf32>, vector<128x512xf32>, vector<2x512xf32> -> vector<2x512xf32>
    %223 = arith.addf %221, %222 : vector<2x512xf32>
    %224 = vector.extract_strided_slice %223 {offsets = [0, 0], sizes = [2, 128], strides = [1, 1]} : vector<2x512xf32> to vector<2x128xf32>
    %cst_72 = arith.constant 5.000000e-01 : f32
    %225 = vector.broadcast %cst_72 : f32 to vector<2x128xf32>
    %226 = arith.mulf %225, %224 : vector<2x128xf32>
    %227 = math.tanh %226 : vector<2x128xf32>
    %cst_73 = arith.constant 5.000000e-01 : f32
    %228 = vector.broadcast %cst_73 : f32 to vector<2x128xf32>
    %229 = arith.mulf %228, %227 : vector<2x128xf32>
    %cst_74 = arith.constant 5.000000e-01 : f32
    %230 = vector.broadcast %cst_74 : f32 to vector<2x128xf32>
    %231 = arith.addf %229, %230 : vector<2x128xf32>
    %232 = vector.extract_strided_slice %223 {offsets = [0, 128], sizes = [2, 128], strides = [1, 1]} : vector<2x512xf32> to vector<2x128xf32>
    %cst_75 = arith.constant 5.000000e-01 : f32
    %233 = vector.broadcast %cst_75 : f32 to vector<2x128xf32>
    %234 = arith.mulf %233, %232 : vector<2x128xf32>
    %235 = math.tanh %234 : vector<2x128xf32>
    %cst_76 = arith.constant 5.000000e-01 : f32
    %236 = vector.broadcast %cst_76 : f32 to vector<2x128xf32>
    %237 = arith.mulf %236, %235 : vector<2x128xf32>
    %cst_77 = arith.constant 5.000000e-01 : f32
    %238 = vector.broadcast %cst_77 : f32 to vector<2x128xf32>
    %239 = arith.addf %237, %238 : vector<2x128xf32>
    %240 = vector.extract_strided_slice %223 {offsets = [0, 256], sizes = [2, 128], strides = [1, 1]} : vector<2x512xf32> to vector<2x128xf32>
    %cst_78 = arith.constant 5.000000e-01 : f32
    %241 = vector.broadcast %cst_78 : f32 to vector<2x128xf32>
    %242 = arith.mulf %241, %240 : vector<2x128xf32>
    %243 = math.tanh %242 : vector<2x128xf32>
    %cst_79 = arith.constant 5.000000e-01 : f32
    %244 = vector.broadcast %cst_79 : f32 to vector<2x128xf32>
    %245 = arith.mulf %244, %243 : vector<2x128xf32>
    %cst_80 = arith.constant 5.000000e-01 : f32
    %246 = vector.broadcast %cst_80 : f32 to vector<2x128xf32>
    %247 = arith.addf %245, %246 : vector<2x128xf32>
    %248 = vector.extract_strided_slice %223 {offsets = [0, 384], sizes = [2, 128], strides = [1, 1]} : vector<2x512xf32> to vector<2x128xf32>
    %249 = math.tanh %248 : vector<2x128xf32>
    %250 = arith.mulf %239, %215 : vector<2x128xf32>
    %251 = arith.mulf %231, %249 : vector<2x128xf32>
    %252 = arith.addf %250, %251 : vector<2x128xf32>
    %253 = math.tanh %252 : vector<2x128xf32>
    %254 = arith.mulf %247, %253 : vector<2x128xf32>
    %c12 = arith.constant 12 : index
    %c0_81 = arith.constant 0 : index
    %255 = vector.load %arg4[%c12, %c0_81] : memref<16x128xf32, #tpu.memory_space<vmem>>, vector<2x128xf32>
    tpu.vector_store %arg4[%c12, %c0_81], %254 {strides = array<i32>} : memref<16x128xf32, #tpu.memory_space<vmem>>, vector<2x128xf32>,
    %256 = vector.extract_strided_slice %5 {offsets = [14, 0], sizes = [2, 512], strides = [1, 1]} : vector<16x512xf32> to vector<2x512xf32>
    %257 = vector.extract_strided_slice %7 {offsets = [0, 0], sizes = [2, 512], strides = [1, 1]} : vector<16x512xf32> to vector<2x512xf32>
    %258 = arith.addf %256, %257 : vector<2x512xf32>
    %cst_82 = arith.constant dense<0.000000e+00> : vector<2x512xf32>
    %259 = tpu.matmul %254, %8, %cst_82 {dimension_numbers = #tpu.dot_dimension_numbers<[1], [0], [0], [1], [0, 0, 1, 1], [], []>} : vector<2x128xf32>, vector<128x512xf32>, vector<2x512xf32> -> vector<2x512xf32>
    %260 = arith.addf %258, %259 : vector<2x512xf32>
    %261 = vector.extract_strided_slice %260 {offsets = [0, 0], sizes = [2, 128], strides = [1, 1]} : vector<2x512xf32> to vector<2x128xf32>
    %cst_83 = arith.constant 5.000000e-01 : f32
    %262 = vector.broadcast %cst_83 : f32 to vector<2x128xf32>
    %263 = arith.mulf %262, %261 : vector<2x128xf32>
    %264 = math.tanh %263 : vector<2x128xf32>
    %cst_84 = arith.constant 5.000000e-01 : f32
    %265 = vector.broadcast %cst_84 : f32 to vector<2x128xf32>
    %266 = arith.mulf %265, %264 : vector<2x128xf32>
    %cst_85 = arith.constant 5.000000e-01 : f32
    %267 = vector.broadcast %cst_85 : f32 to vector<2x128xf32>
    %268 = arith.addf %266, %267 : vector<2x128xf32>
    %269 = vector.extract_strided_slice %260 {offsets = [0, 128], sizes = [2, 128], strides = [1, 1]} : vector<2x512xf32> to vector<2x128xf32>
    %cst_86 = arith.constant 5.000000e-01 : f32
    %270 = vector.broadcast %cst_86 : f32 to vector<2x128xf32>
    %271 = arith.mulf %270, %269 : vector<2x128xf32>
    %272 = math.tanh %271 : vector<2x128xf32>
    %cst_87 = arith.constant 5.000000e-01 : f32
    %273 = vector.broadcast %cst_87 : f32 to vector<2x128xf32>
    %274 = arith.mulf %273, %272 : vector<2x128xf32>
    %cst_88 = arith.constant 5.000000e-01 : f32
    %275 = vector.broadcast %cst_88 : f32 to vector<2x128xf32>
    %276 = arith.addf %274, %275 : vector<2x128xf32>
    %277 = vector.extract_strided_slice %260 {offsets = [0, 256], sizes = [2, 128], strides = [1, 1]} : vector<2x512xf32> to vector<2x128xf32>
    %cst_89 = arith.constant 5.000000e-01 : f32
    %278 = vector.broadcast %cst_89 : f32 to vector<2x128xf32>
    %279 = arith.mulf %278, %277 : vector<2x128xf32>
    %280 = math.tanh %279 : vector<2x128xf32>
    %cst_90 = arith.constant 5.000000e-01 : f32
    %281 = vector.broadcast %cst_90 : f32 to vector<2x128xf32>
    %282 = arith.mulf %281, %280 : vector<2x128xf32>
    %cst_91 = arith.constant 5.000000e-01 : f32
    %283 = vector.broadcast %cst_91 : f32 to vector<2x128xf32>
    %284 = arith.addf %282, %283 : vector<2x128xf32>
    %285 = vector.extract_strided_slice %260 {offsets = [0, 384], sizes = [2, 128], strides = [1, 1]} : vector<2x512xf32> to vector<2x128xf32>
    %286 = math.tanh %285 : vector<2x128xf32>
    %287 = arith.mulf %276, %252 : vector<2x128xf32>
    %288 = arith.mulf %268, %286 : vector<2x128xf32>
    %289 = arith.addf %287, %288 : vector<2x128xf32>
    %290 = math.tanh %289 : vector<2x128xf32>
    %291 = arith.mulf %284, %290 : vector<2x128xf32>
    %c14 = arith.constant 14 : index
    %c0_92 = arith.constant 0 : index
    %292 = vector.load %arg4[%c14, %c0_92] : memref<16x128xf32, #tpu.memory_space<vmem>>, vector<2x128xf32>
    tpu.vector_store %arg4[%c14, %c0_92], %291 {strides = array<i32>} : memref<16x128xf32, #tpu.memory_space<vmem>>, vector<2x128xf32>,
    %c0_93 = arith.constant 0 : index
    %c0_94 = arith.constant 0 : index
    %293 = vector.load %arg4[%c0_93, %c0_94] : memref<16x128xf32, #tpu.memory_space<vmem>>, vector<16x128xf32>
    %c152 = arith.constant 152 : index
    %c0_95 = arith.constant 0 : index
    %294 = vector.load %arg2[%c152, %c0_95] : memref<648x512xf32, #tpu.memory_space<vmem>>, vector<128x512xf32>
    %cst_96 = arith.constant dense<0.000000e+00> : vector<16x512xf32>
    %295 = tpu.matmul %293, %294, %cst_96 {dimension_numbers = #tpu.dot_dimension_numbers<[1], [0], [0], [1], [0, 0, 1, 1], [], []>} : vector<16x128xf32>, vector<128x512xf32>, vector<16x512xf32> -> vector<16x512xf32>
    %c280 = arith.constant 280 : index
    %c0_97 = arith.constant 0 : index
    %296 = vector.load %arg2[%c280, %c0_97] : memref<648x512xf32, #tpu.memory_space<vmem>>, vector<1x256xf32>
    %c288 = arith.constant 288 : index
    %c0_98 = arith.constant 0 : index
    %297 = vector.load %arg2[%c288, %c0_98] : memref<648x512xf32, #tpu.memory_space<vmem>>, vector<64x256xf32>
    %298 = vector.extract_strided_slice %295 {offsets = [14, 0], sizes = [2, 512], strides = [1, 1]} : vector<16x512xf32> to vector<2x512xf32>
    %299 = vector.extract_strided_slice %298 {offsets = [0, 0], sizes = [2, 256], strides = [1, 1]} : vector<2x512xf32> to vector<2x256xf32>
    %300 = vector.extract_strided_slice %295 {offsets = [0, 0], sizes = [2, 512], strides = [1, 1]} : vector<16x512xf32> to vector<2x512xf32>
    %301 = vector.extract_strided_slice %300 {offsets = [0, 256], sizes = [2, 256], strides = [1, 1]} : vector<2x512xf32> to vector<2x256xf32>
    %302 = arith.addf %299, %301 : vector<2x256xf32>
    %303 = vector.broadcast %296 : vector<1x256xf32> to vector<2x256xf32>
    %304 = arith.addf %302, %303 : vector<2x256xf32>
    %305 = vector.extract_strided_slice %304 {offsets = [0, 0], sizes = [2, 64], strides = [1, 1]} : vector<2x256xf32> to vector<2x64xf32>
    %cst_99 = arith.constant 5.000000e-01 : f32
    %306 = vector.broadcast %cst_99 : f32 to vector<2x64xf32>
    %307 = arith.mulf %306, %305 : vector<2x64xf32>
    %308 = math.tanh %307 : vector<2x64xf32>
    %cst_100 = arith.constant 5.000000e-01 : f32
    %309 = vector.broadcast %cst_100 : f32 to vector<2x64xf32>
    %310 = arith.mulf %309, %308 : vector<2x64xf32>
    %cst_101 = arith.constant 5.000000e-01 : f32
    %311 = vector.broadcast %cst_101 : f32 to vector<2x64xf32>
    %312 = arith.addf %310, %311 : vector<2x64xf32>
    %313 = vector.extract_strided_slice %304 {offsets = [0, 128], sizes = [2, 64], strides = [1, 1]} : vector<2x256xf32> to vector<2x64xf32>
    %cst_102 = arith.constant 5.000000e-01 : f32
    %314 = vector.broadcast %cst_102 : f32 to vector<2x64xf32>
    %315 = arith.mulf %314, %313 : vector<2x64xf32>
    %316 = math.tanh %315 : vector<2x64xf32>
    %cst_103 = arith.constant 5.000000e-01 : f32
    %317 = vector.broadcast %cst_103 : f32 to vector<2x64xf32>
    %318 = arith.mulf %317, %316 : vector<2x64xf32>
    %cst_104 = arith.constant 5.000000e-01 : f32
    %319 = vector.broadcast %cst_104 : f32 to vector<2x64xf32>
    %320 = arith.addf %318, %319 : vector<2x64xf32>
    %321 = vector.extract_strided_slice %304 {offsets = [0, 192], sizes = [2, 64], strides = [1, 1]} : vector<2x256xf32> to vector<2x64xf32>
    %322 = math.tanh %321 : vector<2x64xf32>
    %323 = arith.mulf %312, %322 : vector<2x64xf32>
    %324 = math.tanh %323 : vector<2x64xf32>
    %325 = arith.mulf %320, %324 : vector<2x64xf32>
    %326 = vector.extract_strided_slice %295 {offsets = [12, 0], sizes = [2, 512], strides = [1, 1]} : vector<16x512xf32> to vector<2x512xf32>
    %327 = vector.extract_strided_slice %326 {offsets = [0, 0], sizes = [2, 256], strides = [1, 1]} : vector<2x512xf32> to vector<2x256xf32>
    %328 = vector.extract_strided_slice %295 {offsets = [2, 0], sizes = [2, 512], strides = [1, 1]} : vector<16x512xf32> to vector<2x512xf32>
    %329 = vector.extract_strided_slice %328 {offsets = [0, 256], sizes = [2, 256], strides = [1, 1]} : vector<2x512xf32> to vector<2x256xf32>
    %330 = arith.addf %327, %329 : vector<2x256xf32>
    %331 = vector.broadcast %296 : vector<1x256xf32> to vector<2x256xf32>
    %332 = arith.addf %330, %331 : vector<2x256xf32>
    %cst_105 = arith.constant dense<0.000000e+00> : vector<2x256xf32>
    %333 = tpu.matmul %325, %297, %cst_105 {dimension_numbers = #tpu.dot_dimension_numbers<[1], [0], [0], [1], [0, 0, 1, 1], [], []>} : vector<2x64xf32>, vector<64x256xf32>, vector<2x256xf32> -> vector<2x256xf32>
    %334 = arith.addf %332, %333 : vector<2x256xf32>
    %335 = vector.extract_strided_slice %334 {offsets = [0, 0], sizes = [2, 64], strides = [1, 1]} : vector<2x256xf32> to vector<2x64xf32>
    %cst_106 = arith.constant 5.000000e-01 : f32
    %336 = vector.broadcast %cst_106 : f32 to vector<2x64xf32>
    %337 = arith.mulf %336, %335 : vector<2x64xf32>
    %338 = math.tanh %337 : vector<2x64xf32>
    %cst_107 = arith.constant 5.000000e-01 : f32
    %339 = vector.broadcast %cst_107 : f32 to vector<2x64xf32>
    %340 = arith.mulf %339, %338 : vector<2x64xf32>
    %cst_108 = arith.constant 5.000000e-01 : f32
    %341 = vector.broadcast %cst_108 : f32 to vector<2x64xf32>
    %342 = arith.addf %340, %341 : vector<2x64xf32>
    %343 = vector.extract_strided_slice %334 {offsets = [0, 64], sizes = [2, 64], strides = [1, 1]} : vector<2x256xf32> to vector<2x64xf32>
    %cst_109 = arith.constant 5.000000e-01 : f32
    %344 = vector.broadcast %cst_109 : f32 to vector<2x64xf32>
    %345 = arith.mulf %344, %343 : vector<2x64xf32>
    %346 = math.tanh %345 : vector<2x64xf32>
    %cst_110 = arith.constant 5.000000e-01 : f32
    %347 = vector.broadcast %cst_110 : f32 to vector<2x64xf32>
    %348 = arith.mulf %347, %346 : vector<2x64xf32>
    %cst_111 = arith.constant 5.000000e-01 : f32
    %349 = vector.broadcast %cst_111 : f32 to vector<2x64xf32>
    %350 = arith.addf %348, %349 : vector<2x64xf32>
    %351 = vector.extract_strided_slice %334 {offsets = [0, 128], sizes = [2, 64], strides = [1, 1]} : vector<2x256xf32> to vector<2x64xf32>
    %cst_112 = arith.constant 5.000000e-01 : f32
    %352 = vector.broadcast %cst_112 : f32 to vector<2x64xf32>
    %353 = arith.mulf %352, %351 : vector<2x64xf32>
    %354 = math.tanh %353 : vector<2x64xf32>
    %cst_113 = arith.constant 5.000000e-01 : f32
    %355 = vector.broadcast %cst_113 : f32 to vector<2x64xf32>
    %356 = arith.mulf %355, %354 : vector<2x64xf32>
    %cst_114 = arith.constant 5.000000e-01 : f32
    %357 = vector.broadcast %cst_114 : f32 to vector<2x64xf32>
    %358 = arith.addf %356, %357 : vector<2x64xf32>
    %359 = vector.extract_strided_slice %334 {offsets = [0, 192], sizes = [2, 64], strides = [1, 1]} : vector<2x256xf32> to vector<2x64xf32>
    %360 = math.tanh %359 : vector<2x64xf32>
    %361 = arith.mulf %350, %323 : vector<2x64xf32>
    %362 = arith.mulf %342, %360 : vector<2x64xf32>
    %363 = arith.addf %361, %362 : vector<2x64xf32>
    %364 = math.tanh %363 : vector<2x64xf32>
    %365 = arith.mulf %358, %364 : vector<2x64xf32>
    %366 = vector.extract_strided_slice %295 {offsets = [10, 0], sizes = [2, 512], strides = [1, 1]} : vector<16x512xf32> to vector<2x512xf32>
    %367 = vector.extract_strided_slice %366 {offsets = [0, 0], sizes = [2, 256], strides = [1, 1]} : vector<2x512xf32> to vector<2x256xf32>
    %368 = vector.extract_strided_slice %295 {offsets = [4, 0], sizes = [2, 512], strides = [1, 1]} : vector<16x512xf32> to vector<2x512xf32>
    %369 = vector.extract_strided_slice %368 {offsets = [0, 256], sizes = [2, 256], strides = [1, 1]} : vector<2x512xf32> to vector<2x256xf32>
    %370 = arith.addf %367, %369 : vector<2x256xf32>
    %371 = vector.broadcast %296 : vector<1x256xf32> to vector<2x256xf32>
    %372 = arith.addf %370, %371 : vector<2x256xf32>
    %cst_115 = arith.constant dense<0.000000e+00> : vector<2x256xf32>
    %373 = tpu.matmul %365, %297, %cst_115 {dimension_numbers = #tpu.dot_dimension_numbers<[1], [0], [0], [1], [0, 0, 1, 1], [], []>} : vector<2x64xf32>, vector<64x256xf32>, vector<2x256xf32> -> vector<2x256xf32>
    %374 = arith.addf %372, %373 : vector<2x256xf32>
    %375 = vector.extract_strided_slice %374 {offsets = [0, 0], sizes = [2, 64], strides = [1, 1]} : vector<2x256xf32> to vector<2x64xf32>
    %cst_116 = arith.constant 5.000000e-01 : f32
    %376 = vector.broadcast %cst_116 : f32 to vector<2x64xf32>
    %377 = arith.mulf %376, %375 : vector<2x64xf32>
    %378 = math.tanh %377 : vector<2x64xf32>
    %cst_117 = arith.constant 5.000000e-01 : f32
    %379 = vector.broadcast %cst_117 : f32 to vector<2x64xf32>
    %380 = arith.mulf %379, %378 : vector<2x64xf32>
    %cst_118 = arith.constant 5.000000e-01 : f32
    %381 = vector.broadcast %cst_118 : f32 to vector<2x64xf32>
    %382 = arith.addf %380, %381 : vector<2x64xf32>
    %383 = vector.extract_strided_slice %374 {offsets = [0, 64], sizes = [2, 64], strides = [1, 1]} : vector<2x256xf32> to vector<2x64xf32>
    %cst_119 = arith.constant 5.000000e-01 : f32
    %384 = vector.broadcast %cst_119 : f32 to vector<2x64xf32>
    %385 = arith.mulf %384, %383 : vector<2x64xf32>
    %386 = math.tanh %385 : vector<2x64xf32>
    %cst_120 = arith.constant 5.000000e-01 : f32
    %387 = vector.broadcast %cst_120 : f32 to vector<2x64xf32>
    %388 = arith.mulf %387, %386 : vector<2x64xf32>
    %cst_121 = arith.constant 5.000000e-01 : f32
    %389 = vector.broadcast %cst_121 : f32 to vector<2x64xf32>
    %390 = arith.addf %388, %389 : vector<2x64xf32>
    %391 = vector.extract_strided_slice %374 {offsets = [0, 128], sizes = [2, 64], strides = [1, 1]} : vector<2x256xf32> to vector<2x64xf32>
    %cst_122 = arith.constant 5.000000e-01 : f32
    %392 = vector.broadcast %cst_122 : f32 to vector<2x64xf32>
    %393 = arith.mulf %392, %391 : vector<2x64xf32>
    %394 = math.tanh %393 : vector<2x64xf32>
    %cst_123 = arith.constant 5.000000e-01 : f32
    %395 = vector.broadcast %cst_123 : f32 to vector<2x64xf32>
    %396 = arith.mulf %395, %394 : vector<2x64xf32>
    %cst_124 = arith.constant 5.000000e-01 : f32
    %397 = vector.broadcast %cst_124 : f32 to vector<2x64xf32>
    %398 = arith.addf %396, %397 : vector<2x64xf32>
    %399 = vector.extract_strided_slice %374 {offsets = [0, 192], sizes = [2, 64], strides = [1, 1]} : vector<2x256xf32> to vector<2x64xf32>
    %400 = math.tanh %399 : vector<2x64xf32>
    %401 = arith.mulf %390, %363 : vector<2x64xf32>
    %402 = arith.mulf %382, %400 : vector<2x64xf32>
    %403 = arith.addf %401, %402 : vector<2x64xf32>
    %404 = math.tanh %403 : vector<2x64xf32>
    %405 = arith.mulf %398, %404 : vector<2x64xf32>
    %406 = vector.extract_strided_slice %295 {offsets = [8, 0], sizes = [2, 512], strides = [1, 1]} : vector<16x512xf32> to vector<2x512xf32>
    %407 = vector.extract_strided_slice %406 {offsets = [0, 0], sizes = [2, 256], strides = [1, 1]} : vector<2x512xf32> to vector<2x256xf32>
    %408 = vector.extract_strided_slice %295 {offsets = [6, 0], sizes = [2, 512], strides = [1, 1]} : vector<16x512xf32> to vector<2x512xf32>
    %409 = vector.extract_strided_slice %408 {offsets = [0, 256], sizes = [2, 256], strides = [1, 1]} : vector<2x512xf32> to vector<2x256xf32>
    %410 = arith.addf %407, %409 : vector<2x256xf32>
    %411 = vector.broadcast %296 : vector<1x256xf32> to vector<2x256xf32>
    %412 = arith.addf %410, %411 : vector<2x256xf32>
    %cst_125 = arith.constant dense<0.000000e+00> : vector<2x256xf32>
    %413 = tpu.matmul %405, %297, %cst_125 {dimension_numbers = #tpu.dot_dimension_numbers<[1], [0], [0], [1], [0, 0, 1, 1], [], []>} : vector<2x64xf32>, vector<64x256xf32>, vector<2x256xf32> -> vector<2x256xf32>
    %414 = arith.addf %412, %413 : vector<2x256xf32>
    %415 = vector.extract_strided_slice %414 {offsets = [0, 0], sizes = [2, 64], strides = [1, 1]} : vector<2x256xf32> to vector<2x64xf32>
    %cst_126 = arith.constant 5.000000e-01 : f32
    %416 = vector.broadcast %cst_126 : f32 to vector<2x64xf32>
    %417 = arith.mulf %416, %415 : vector<2x64xf32>
    %418 = math.tanh %417 : vector<2x64xf32>
    %cst_127 = arith.constant 5.000000e-01 : f32
    %419 = vector.broadcast %cst_127 : f32 to vector<2x64xf32>
    %420 = arith.mulf %419, %418 : vector<2x64xf32>
    %cst_128 = arith.constant 5.000000e-01 : f32
    %421 = vector.broadcast %cst_128 : f32 to vector<2x64xf32>
    %422 = arith.addf %420, %421 : vector<2x64xf32>
    %423 = vector.extract_strided_slice %414 {offsets = [0, 64], sizes = [2, 64], strides = [1, 1]} : vector<2x256xf32> to vector<2x64xf32>
    %cst_129 = arith.constant 5.000000e-01 : f32
    %424 = vector.broadcast %cst_129 : f32 to vector<2x64xf32>
    %425 = arith.mulf %424, %423 : vector<2x64xf32>
    %426 = math.tanh %425 : vector<2x64xf32>
    %cst_130 = arith.constant 5.000000e-01 : f32
    %427 = vector.broadcast %cst_130 : f32 to vector<2x64xf32>
    %428 = arith.mulf %427, %426 : vector<2x64xf32>
    %cst_131 = arith.constant 5.000000e-01 : f32
    %429 = vector.broadcast %cst_131 : f32 to vector<2x64xf32>
    %430 = arith.addf %428, %429 : vector<2x64xf32>
    %431 = vector.extract_strided_slice %414 {offsets = [0, 128], sizes = [2, 64], strides = [1, 1]} : vector<2x256xf32> to vector<2x64xf32>
    %cst_132 = arith.constant 5.000000e-01 : f32
    %432 = vector.broadcast %cst_132 : f32 to vector<2x64xf32>
    %433 = arith.mulf %432, %431 : vector<2x64xf32>
    %434 = math.tanh %433 : vector<2x64xf32>
    %cst_133 = arith.constant 5.000000e-01 : f32
    %435 = vector.broadcast %cst_133 : f32 to vector<2x64xf32>
    %436 = arith.mulf %435, %434 : vector<2x64xf32>
    %cst_134 = arith.constant 5.000000e-01 : f32
    %437 = vector.broadcast %cst_134 : f32 to vector<2x64xf32>
    %438 = arith.addf %436, %437 : vector<2x64xf32>
    %439 = vector.extract_strided_slice %414 {offsets = [0, 192], sizes = [2, 64], strides = [1, 1]} : vector<2x256xf32> to vector<2x64xf32>
    %440 = math.tanh %439 : vector<2x64xf32>
    %441 = arith.mulf %430, %403 : vector<2x64xf32>
    %442 = arith.mulf %422, %440 : vector<2x64xf32>
    %443 = arith.addf %441, %442 : vector<2x64xf32>
    %444 = math.tanh %443 : vector<2x64xf32>
    %445 = arith.mulf %438, %444 : vector<2x64xf32>
    %446 = vector.extract_strided_slice %295 {offsets = [6, 0], sizes = [2, 512], strides = [1, 1]} : vector<16x512xf32> to vector<2x512xf32>
    %447 = vector.extract_strided_slice %446 {offsets = [0, 0], sizes = [2, 256], strides = [1, 1]} : vector<2x512xf32> to vector<2x256xf32>
    %448 = vector.extract_strided_slice %295 {offsets = [8, 0], sizes = [2, 512], strides = [1, 1]} : vector<16x512xf32> to vector<2x512xf32>
    %449 = vector.extract_strided_slice %448 {offsets = [0, 256], sizes = [2, 256], strides = [1, 1]} : vector<2x512xf32> to vector<2x256xf32>
    %450 = arith.addf %447, %449 : vector<2x256xf32>
    %451 = vector.broadcast %296 : vector<1x256xf32> to vector<2x256xf32>
    %452 = arith.addf %450, %451 : vector<2x256xf32>
    %cst_135 = arith.constant dense<0.000000e+00> : vector<2x256xf32>
    %453 = tpu.matmul %445, %297, %cst_135 {dimension_numbers = #tpu.dot_dimension_numbers<[1], [0], [0], [1], [0, 0, 1, 1], [], []>} : vector<2x64xf32>, vector<64x256xf32>, vector<2x256xf32> -> vector<2x256xf32>
    %454 = arith.addf %452, %453 : vector<2x256xf32>
    %455 = vector.extract_strided_slice %454 {offsets = [0, 0], sizes = [2, 64], strides = [1, 1]} : vector<2x256xf32> to vector<2x64xf32>
    %cst_136 = arith.constant 5.000000e-01 : f32
    %456 = vector.broadcast %cst_136 : f32 to vector<2x64xf32>
    %457 = arith.mulf %456, %455 : vector<2x64xf32>
    %458 = math.tanh %457 : vector<2x64xf32>
    %cst_137 = arith.constant 5.000000e-01 : f32
    %459 = vector.broadcast %cst_137 : f32 to vector<2x64xf32>
    %460 = arith.mulf %459, %458 : vector<2x64xf32>
    %cst_138 = arith.constant 5.000000e-01 : f32
    %461 = vector.broadcast %cst_138 : f32 to vector<2x64xf32>
    %462 = arith.addf %460, %461 : vector<2x64xf32>
    %463 = vector.extract_strided_slice %454 {offsets = [0, 64], sizes = [2, 64], strides = [1, 1]} : vector<2x256xf32> to vector<2x64xf32>
    %cst_139 = arith.constant 5.000000e-01 : f32
    %464 = vector.broadcast %cst_139 : f32 to vector<2x64xf32>
    %465 = arith.mulf %464, %463 : vector<2x64xf32>
    %466 = math.tanh %465 : vector<2x64xf32>
    %cst_140 = arith.constant 5.000000e-01 : f32
    %467 = vector.broadcast %cst_140 : f32 to vector<2x64xf32>
    %468 = arith.mulf %467, %466 : vector<2x64xf32>
    %cst_141 = arith.constant 5.000000e-01 : f32
    %469 = vector.broadcast %cst_141 : f32 to vector<2x64xf32>
    %470 = arith.addf %468, %469 : vector<2x64xf32>
    %471 = vector.extract_strided_slice %454 {offsets = [0, 128], sizes = [2, 64], strides = [1, 1]} : vector<2x256xf32> to vector<2x64xf32>
    %cst_142 = arith.constant 5.000000e-01 : f32
    %472 = vector.broadcast %cst_142 : f32 to vector<2x64xf32>
    %473 = arith.mulf %472, %471 : vector<2x64xf32>
    %474 = math.tanh %473 : vector<2x64xf32>
    %cst_143 = arith.constant 5.000000e-01 : f32
    %475 = vector.broadcast %cst_143 : f32 to vector<2x64xf32>
    %476 = arith.mulf %475, %474 : vector<2x64xf32>
    %cst_144 = arith.constant 5.000000e-01 : f32
    %477 = vector.broadcast %cst_144 : f32 to vector<2x64xf32>
    %478 = arith.addf %476, %477 : vector<2x64xf32>
    %479 = vector.extract_strided_slice %454 {offsets = [0, 192], sizes = [2, 64], strides = [1, 1]} : vector<2x256xf32> to vector<2x64xf32>
    %480 = math.tanh %479 : vector<2x64xf32>
    %481 = arith.mulf %470, %443 : vector<2x64xf32>
    %482 = arith.mulf %462, %480 : vector<2x64xf32>
    %483 = arith.addf %481, %482 : vector<2x64xf32>
    %484 = math.tanh %483 : vector<2x64xf32>
    %485 = arith.mulf %478, %484 : vector<2x64xf32>
    %486 = vector.extract_strided_slice %295 {offsets = [4, 0], sizes = [2, 512], strides = [1, 1]} : vector<16x512xf32> to vector<2x512xf32>
    %487 = vector.extract_strided_slice %486 {offsets = [0, 0], sizes = [2, 256], strides = [1, 1]} : vector<2x512xf32> to vector<2x256xf32>
    %488 = vector.extract_strided_slice %295 {offsets = [10, 0], sizes = [2, 512], strides = [1, 1]} : vector<16x512xf32> to vector<2x512xf32>
    %489 = vector.extract_strided_slice %488 {offsets = [0, 256], sizes = [2, 256], strides = [1, 1]} : vector<2x512xf32> to vector<2x256xf32>
    %490 = arith.addf %487, %489 : vector<2x256xf32>
    %491 = vector.broadcast %296 : vector<1x256xf32> to vector<2x256xf32>
    %492 = arith.addf %490, %491 : vector<2x256xf32>
    %cst_145 = arith.constant dense<0.000000e+00> : vector<2x256xf32>
    %493 = tpu.matmul %485, %297, %cst_145 {dimension_numbers = #tpu.dot_dimension_numbers<[1], [0], [0], [1], [0, 0, 1, 1], [], []>} : vector<2x64xf32>, vector<64x256xf32>, vector<2x256xf32> -> vector<2x256xf32>
    %494 = arith.addf %492, %493 : vector<2x256xf32>
    %495 = vector.extract_strided_slice %494 {offsets = [0, 0], sizes = [2, 64], strides = [1, 1]} : vector<2x256xf32> to vector<2x64xf32>
    %cst_146 = arith.constant 5.000000e-01 : f32
    %496 = vector.broadcast %cst_146 : f32 to vector<2x64xf32>
    %497 = arith.mulf %496, %495 : vector<2x64xf32>
    %498 = math.tanh %497 : vector<2x64xf32>
    %cst_147 = arith.constant 5.000000e-01 : f32
    %499 = vector.broadcast %cst_147 : f32 to vector<2x64xf32>
    %500 = arith.mulf %499, %498 : vector<2x64xf32>
    %cst_148 = arith.constant 5.000000e-01 : f32
    %501 = vector.broadcast %cst_148 : f32 to vector<2x64xf32>
    %502 = arith.addf %500, %501 : vector<2x64xf32>
    %503 = vector.extract_strided_slice %494 {offsets = [0, 64], sizes = [2, 64], strides = [1, 1]} : vector<2x256xf32> to vector<2x64xf32>
    %cst_149 = arith.constant 5.000000e-01 : f32
    %504 = vector.broadcast %cst_149 : f32 to vector<2x64xf32>
    %505 = arith.mulf %504, %503 : vector<2x64xf32>
    %506 = math.tanh %505 : vector<2x64xf32>
    %cst_150 = arith.constant 5.000000e-01 : f32
    %507 = vector.broadcast %cst_150 : f32 to vector<2x64xf32>
    %508 = arith.mulf %507, %506 : vector<2x64xf32>
    %cst_151 = arith.constant 5.000000e-01 : f32
    %509 = vector.broadcast %cst_151 : f32 to vector<2x64xf32>
    %510 = arith.addf %508, %509 : vector<2x64xf32>
    %511 = vector.extract_strided_slice %494 {offsets = [0, 128], sizes = [2, 64], strides = [1, 1]} : vector<2x256xf32> to vector<2x64xf32>
    %cst_152 = arith.constant 5.000000e-01 : f32
    %512 = vector.broadcast %cst_152 : f32 to vector<2x64xf32>
    %513 = arith.mulf %512, %511 : vector<2x64xf32>
    %514 = math.tanh %513 : vector<2x64xf32>
    %cst_153 = arith.constant 5.000000e-01 : f32
    %515 = vector.broadcast %cst_153 : f32 to vector<2x64xf32>
    %516 = arith.mulf %515, %514 : vector<2x64xf32>
    %cst_154 = arith.constant 5.000000e-01 : f32
    %517 = vector.broadcast %cst_154 : f32 to vector<2x64xf32>
    %518 = arith.addf %516, %517 : vector<2x64xf32>
    %519 = vector.extract_strided_slice %494 {offsets = [0, 192], sizes = [2, 64], strides = [1, 1]} : vector<2x256xf32> to vector<2x64xf32>
    %520 = math.tanh %519 : vector<2x64xf32>
    %521 = arith.mulf %510, %483 : vector<2x64xf32>
    %522 = arith.mulf %502, %520 : vector<2x64xf32>
    %523 = arith.addf %521, %522 : vector<2x64xf32>
    %524 = math.tanh %523 : vector<2x64xf32>
    %525 = arith.mulf %518, %524 : vector<2x64xf32>
    %526 = vector.extract_strided_slice %295 {offsets = [2, 0], sizes = [2, 512], strides = [1, 1]} : vector<16x512xf32> to vector<2x512xf32>
    %527 = vector.extract_strided_slice %526 {offsets = [0, 0], sizes = [2, 256], strides = [1, 1]} : vector<2x512xf32> to vector<2x256xf32>
    %528 = vector.extract_strided_slice %295 {offsets = [12, 0], sizes = [2, 512], strides = [1, 1]} : vector<16x512xf32> to vector<2x512xf32>
    %529 = vector.extract_strided_slice %528 {offsets = [0, 256], sizes = [2, 256], strides = [1, 1]} : vector<2x512xf32> to vector<2x256xf32>
    %530 = arith.addf %527, %529 : vector<2x256xf32>
    %531 = vector.broadcast %296 : vector<1x256xf32> to vector<2x256xf32>
    %532 = arith.addf %530, %531 : vector<2x256xf32>
    %cst_155 = arith.constant dense<0.000000e+00> : vector<2x256xf32>
    %533 = tpu.matmul %525, %297, %cst_155 {dimension_numbers = #tpu.dot_dimension_numbers<[1], [0], [0], [1], [0, 0, 1, 1], [], []>} : vector<2x64xf32>, vector<64x256xf32>, vector<2x256xf32> -> vector<2x256xf32>
    %534 = arith.addf %532, %533 : vector<2x256xf32>
    %535 = vector.extract_strided_slice %534 {offsets = [0, 0], sizes = [2, 64], strides = [1, 1]} : vector<2x256xf32> to vector<2x64xf32>
    %cst_156 = arith.constant 5.000000e-01 : f32
    %536 = vector.broadcast %cst_156 : f32 to vector<2x64xf32>
    %537 = arith.mulf %536, %535 : vector<2x64xf32>
    %538 = math.tanh %537 : vector<2x64xf32>
    %cst_157 = arith.constant 5.000000e-01 : f32
    %539 = vector.broadcast %cst_157 : f32 to vector<2x64xf32>
    %540 = arith.mulf %539, %538 : vector<2x64xf32>
    %cst_158 = arith.constant 5.000000e-01 : f32
    %541 = vector.broadcast %cst_158 : f32 to vector<2x64xf32>
    %542 = arith.addf %540, %541 : vector<2x64xf32>
    %543 = vector.extract_strided_slice %534 {offsets = [0, 64], sizes = [2, 64], strides = [1, 1]} : vector<2x256xf32> to vector<2x64xf32>
    %cst_159 = arith.constant 5.000000e-01 : f32
    %544 = vector.broadcast %cst_159 : f32 to vector<2x64xf32>
    %545 = arith.mulf %544, %543 : vector<2x64xf32>
    %546 = math.tanh %545 : vector<2x64xf32>
    %cst_160 = arith.constant 5.000000e-01 : f32
    %547 = vector.broadcast %cst_160 : f32 to vector<2x64xf32>
    %548 = arith.mulf %547, %546 : vector<2x64xf32>
    %cst_161 = arith.constant 5.000000e-01 : f32
    %549 = vector.broadcast %cst_161 : f32 to vector<2x64xf32>
    %550 = arith.addf %548, %549 : vector<2x64xf32>
    %551 = vector.extract_strided_slice %534 {offsets = [0, 128], sizes = [2, 64], strides = [1, 1]} : vector<2x256xf32> to vector<2x64xf32>
    %cst_162 = arith.constant 5.000000e-01 : f32
    %552 = vector.broadcast %cst_162 : f32 to vector<2x64xf32>
    %553 = arith.mulf %552, %551 : vector<2x64xf32>
    %554 = math.tanh %553 : vector<2x64xf32>
    %cst_163 = arith.constant 5.000000e-01 : f32
    %555 = vector.broadcast %cst_163 : f32 to vector<2x64xf32>
    %556 = arith.mulf %555, %554 : vector<2x64xf32>
    %cst_164 = arith.constant 5.000000e-01 : f32
    %557 = vector.broadcast %cst_164 : f32 to vector<2x64xf32>
    %558 = arith.addf %556, %557 : vector<2x64xf32>
    %559 = vector.extract_strided_slice %534 {offsets = [0, 192], sizes = [2, 64], strides = [1, 1]} : vector<2x256xf32> to vector<2x64xf32>
    %560 = math.tanh %559 : vector<2x64xf32>
    %561 = arith.mulf %550, %523 : vector<2x64xf32>
    %562 = arith.mulf %542, %560 : vector<2x64xf32>
    %563 = arith.addf %561, %562 : vector<2x64xf32>
    %564 = math.tanh %563 : vector<2x64xf32>
    %565 = arith.mulf %558, %564 : vector<2x64xf32>
    %566 = vector.extract_strided_slice %295 {offsets = [0, 0], sizes = [2, 512], strides = [1, 1]} : vector<16x512xf32> to vector<2x512xf32>
    %567 = vector.extract_strided_slice %566 {offsets = [0, 0], sizes = [2, 256], strides = [1, 1]} : vector<2x512xf32> to vector<2x256xf32>
    %568 = vector.extract_strided_slice %295 {offsets = [14, 0], sizes = [2, 512], strides = [1, 1]} : vector<16x512xf32> to vector<2x512xf32>
    %569 = vector.extract_strided_slice %568 {offsets = [0, 256], sizes = [2, 256], strides = [1, 1]} : vector<2x512xf32> to vector<2x256xf32>
    %570 = arith.addf %567, %569 : vector<2x256xf32>
    %571 = vector.broadcast %296 : vector<1x256xf32> to vector<2x256xf32>
    %572 = arith.addf %570, %571 : vector<2x256xf32>
    %cst_165 = arith.constant dense<0.000000e+00> : vector<2x256xf32>
    %573 = tpu.matmul %565, %297, %cst_165 {dimension_numbers = #tpu.dot_dimension_numbers<[1], [0], [0], [1], [0, 0, 1, 1], [], []>} : vector<2x64xf32>, vector<64x256xf32>, vector<2x256xf32> -> vector<2x256xf32>
    %574 = arith.addf %572, %573 : vector<2x256xf32>
    %575 = vector.extract_strided_slice %574 {offsets = [0, 0], sizes = [2, 64], strides = [1, 1]} : vector<2x256xf32> to vector<2x64xf32>
    %cst_166 = arith.constant 5.000000e-01 : f32
    %576 = vector.broadcast %cst_166 : f32 to vector<2x64xf32>
    %577 = arith.mulf %576, %575 : vector<2x64xf32>
    %578 = math.tanh %577 : vector<2x64xf32>
    %cst_167 = arith.constant 5.000000e-01 : f32
    %579 = vector.broadcast %cst_167 : f32 to vector<2x64xf32>
    %580 = arith.mulf %579, %578 : vector<2x64xf32>
    %cst_168 = arith.constant 5.000000e-01 : f32
    %581 = vector.broadcast %cst_168 : f32 to vector<2x64xf32>
    %582 = arith.addf %580, %581 : vector<2x64xf32>
    %583 = vector.extract_strided_slice %574 {offsets = [0, 64], sizes = [2, 64], strides = [1, 1]} : vector<2x256xf32> to vector<2x64xf32>
    %cst_169 = arith.constant 5.000000e-01 : f32
    %584 = vector.broadcast %cst_169 : f32 to vector<2x64xf32>
    %585 = arith.mulf %584, %583 : vector<2x64xf32>
    %586 = math.tanh %585 : vector<2x64xf32>
    %cst_170 = arith.constant 5.000000e-01 : f32
    %587 = vector.broadcast %cst_170 : f32 to vector<2x64xf32>
    %588 = arith.mulf %587, %586 : vector<2x64xf32>
    %cst_171 = arith.constant 5.000000e-01 : f32
    %589 = vector.broadcast %cst_171 : f32 to vector<2x64xf32>
    %590 = arith.addf %588, %589 : vector<2x64xf32>
    %591 = vector.extract_strided_slice %574 {offsets = [0, 128], sizes = [2, 64], strides = [1, 1]} : vector<2x256xf32> to vector<2x64xf32>
    %cst_172 = arith.constant 5.000000e-01 : f32
    %592 = vector.broadcast %cst_172 : f32 to vector<2x64xf32>
    %593 = arith.mulf %592, %591 : vector<2x64xf32>
    %594 = math.tanh %593 : vector<2x64xf32>
    %cst_173 = arith.constant 5.000000e-01 : f32
    %595 = vector.broadcast %cst_173 : f32 to vector<2x64xf32>
    %596 = arith.mulf %595, %594 : vector<2x64xf32>
    %cst_174 = arith.constant 5.000000e-01 : f32
    %597 = vector.broadcast %cst_174 : f32 to vector<2x64xf32>
    %598 = arith.addf %596, %597 : vector<2x64xf32>
    %599 = vector.extract_strided_slice %574 {offsets = [0, 192], sizes = [2, 64], strides = [1, 1]} : vector<2x256xf32> to vector<2x64xf32>
    %600 = math.tanh %599 : vector<2x64xf32>
    %601 = arith.mulf %590, %563 : vector<2x64xf32>
    %602 = arith.mulf %582, %600 : vector<2x64xf32>
    %603 = arith.addf %601, %602 : vector<2x64xf32>
    %604 = math.tanh %603 : vector<2x64xf32>
    %605 = arith.mulf %598, %604 : vector<2x64xf32>
    %c352 = arith.constant 352 : index
    %c0_175 = arith.constant 0 : index
    %606 = vector.load %arg2[%c352, %c0_175] : memref<648x512xf32, #tpu.memory_space<vmem>>, vector<64x6xf32>
    %cst_176 = arith.constant dense<0.000000e+00> : vector<2x6xf32>
    %607 = tpu.matmul %605, %606, %cst_176 {dimension_numbers = #tpu.dot_dimension_numbers<[1], [0], [0], [1], [0, 0, 1, 1], [], []>} : vector<2x64xf32>, vector<64x6xf32>, vector<2x6xf32> -> vector<2x6xf32>
    %c416 = arith.constant 416 : index
    %c0_177 = arith.constant 0 : index
    %608 = vector.load %arg2[%c416, %c0_177] : memref<648x512xf32, #tpu.memory_space<vmem>>, vector<1x6xf32>
    %609 = vector.broadcast %608 : vector<1x6xf32> to vector<2x6xf32>
    %610 = arith.addf %607, %609 : vector<2x6xf32>
    %611 = vector.extract_strided_slice %610 {offsets = [0, 0], sizes = [2, 3], strides = [1, 1]} : vector<2x6xf32> to vector<2x3xf32>
    %612 = vector.extract_strided_slice %610 {offsets = [0, 3], sizes = [2, 3], strides = [1, 1]} : vector<2x6xf32> to vector<2x3xf32>
    %c0_178 = arith.constant 0 : index
    %c0_179 = arith.constant 0 : index
    %613 = vector.load %arg1[%c0_178, %c0_179] : memref<2x3xf32, #tpu.memory_space<vmem>>, vector<2x3xf32>
    %cst_180 = arith.constant 5.000000e-01 : f32
    %614 = vector.broadcast %cst_180 : f32 to vector<2x3xf32>
    %615 = arith.mulf %614, %612 : vector<2x3xf32>
    %616 = math.exp %615 : vector<2x3xf32>
    %617 = arith.mulf %613, %616 : vector<2x3xf32>
    %618 = arith.addf %611, %617 : vector<2x3xf32>
    %c424 = arith.constant 424 : index
    %c0_181 = arith.constant 0 : index
    %619 = vector.load %arg2[%c424, %c0_181] : memref<648x512xf32, #tpu.memory_space<vmem>>, vector<3x512xf32>
    %cst_182 = arith.constant dense<0.000000e+00> : vector<2x512xf32>
    %620 = tpu.matmul %618, %619, %cst_182 {dimension_numbers = #tpu.dot_dimension_numbers<[1], [0], [0], [1], [0, 0, 1, 1], [], []>} : vector<2x3xf32>, vector<3x512xf32>, vector<2x512xf32> -> vector<2x512xf32>
    %c432 = arith.constant 432 : index
    %c0_183 = arith.constant 0 : index
    %621 = vector.load %arg2[%c432, %c0_183] : memref<648x512xf32, #tpu.memory_space<vmem>>, vector<1x512xf32>
    %622 = vector.broadcast %621 : vector<1x512xf32> to vector<2x512xf32>
    %623 = arith.addf %620, %622 : vector<2x512xf32>
    %624 = vector.extract_strided_slice %623 {offsets = [0, 0], sizes = [2, 128], strides = [1, 1]} : vector<2x512xf32> to vector<2x128xf32>
    %cst_184 = arith.constant 5.000000e-01 : f32
    %625 = vector.broadcast %cst_184 : f32 to vector<2x128xf32>
    %626 = arith.mulf %625, %624 : vector<2x128xf32>
    %627 = math.tanh %626 : vector<2x128xf32>
    %cst_185 = arith.constant 5.000000e-01 : f32
    %628 = vector.broadcast %cst_185 : f32 to vector<2x128xf32>
    %629 = arith.mulf %628, %627 : vector<2x128xf32>
    %cst_186 = arith.constant 5.000000e-01 : f32
    %630 = vector.broadcast %cst_186 : f32 to vector<2x128xf32>
    %631 = arith.addf %629, %630 : vector<2x128xf32>
    %632 = vector.extract_strided_slice %623 {offsets = [0, 256], sizes = [2, 128], strides = [1, 1]} : vector<2x512xf32> to vector<2x128xf32>
    %cst_187 = arith.constant 5.000000e-01 : f32
    %633 = vector.broadcast %cst_187 : f32 to vector<2x128xf32>
    %634 = arith.mulf %633, %632 : vector<2x128xf32>
    %635 = math.tanh %634 : vector<2x128xf32>
    %cst_188 = arith.constant 5.000000e-01 : f32
    %636 = vector.broadcast %cst_188 : f32 to vector<2x128xf32>
    %637 = arith.mulf %636, %635 : vector<2x128xf32>
    %cst_189 = arith.constant 5.000000e-01 : f32
    %638 = vector.broadcast %cst_189 : f32 to vector<2x128xf32>
    %639 = arith.addf %637, %638 : vector<2x128xf32>
    %640 = vector.extract_strided_slice %623 {offsets = [0, 384], sizes = [2, 128], strides = [1, 1]} : vector<2x512xf32> to vector<2x128xf32>
    %641 = math.tanh %640 : vector<2x128xf32>
    %642 = arith.mulf %631, %641 : vector<2x128xf32>
    %643 = math.tanh %642 : vector<2x128xf32>
    %644 = arith.mulf %639, %643 : vector<2x128xf32>
    %c440 = arith.constant 440 : index
    %c0_190 = arith.constant 0 : index
    %645 = vector.load %arg2[%c440, %c0_190] : memref<648x512xf32, #tpu.memory_space<vmem>>, vector<128x256xf32>
    %cst_191 = arith.constant dense<0.000000e+00> : vector<2x256xf32>
    %646 = tpu.matmul %644, %645, %cst_191 {dimension_numbers = #tpu.dot_dimension_numbers<[1], [0], [0], [1], [0, 0, 1, 1], [], []>} : vector<2x128xf32>, vector<128x256xf32>, vector<2x256xf32> -> vector<2x256xf32>
    %c568 = arith.constant 568 : index
    %c0_192 = arith.constant 0 : index
    %647 = vector.load %arg2[%c568, %c0_192] : memref<648x512xf32, #tpu.memory_space<vmem>>, vector<1x256xf32>
    %648 = vector.broadcast %647 : vector<1x256xf32> to vector<2x256xf32>
    %649 = arith.addf %646, %648 : vector<2x256xf32>
    %650 = vector.extract_strided_slice %649 {offsets = [0, 0], sizes = [2, 64], strides = [1, 1]} : vector<2x256xf32> to vector<2x64xf32>
    %cst_193 = arith.constant 5.000000e-01 : f32
    %651 = vector.broadcast %cst_193 : f32 to vector<2x64xf32>
    %652 = arith.mulf %651, %650 : vector<2x64xf32>
    %653 = math.tanh %652 : vector<2x64xf32>
    %cst_194 = arith.constant 5.000000e-01 : f32
    %654 = vector.broadcast %cst_194 : f32 to vector<2x64xf32>
    %655 = arith.mulf %654, %653 : vector<2x64xf32>
    %cst_195 = arith.constant 5.000000e-01 : f32
    %656 = vector.broadcast %cst_195 : f32 to vector<2x64xf32>
    %657 = arith.addf %655, %656 : vector<2x64xf32>
    %658 = vector.extract_strided_slice %649 {offsets = [0, 128], sizes = [2, 64], strides = [1, 1]} : vector<2x256xf32> to vector<2x64xf32>
    %cst_196 = arith.constant 5.000000e-01 : f32
    %659 = vector.broadcast %cst_196 : f32 to vector<2x64xf32>
    %660 = arith.mulf %659, %658 : vector<2x64xf32>
    %661 = math.tanh %660 : vector<2x64xf32>
    %cst_197 = arith.constant 5.000000e-01 : f32
    %662 = vector.broadcast %cst_197 : f32 to vector<2x64xf32>
    %663 = arith.mulf %662, %661 : vector<2x64xf32>
    %cst_198 = arith.constant 5.000000e-01 : f32
    %664 = vector.broadcast %cst_198 : f32 to vector<2x64xf32>
    %665 = arith.addf %663, %664 : vector<2x64xf32>
    %666 = vector.extract_strided_slice %649 {offsets = [0, 192], sizes = [2, 64], strides = [1, 1]} : vector<2x256xf32> to vector<2x64xf32>
    %667 = math.tanh %666 : vector<2x64xf32>
    %668 = arith.mulf %657, %667 : vector<2x64xf32>
    %669 = math.tanh %668 : vector<2x64xf32>
    %670 = arith.mulf %665, %669 : vector<2x64xf32>
    %c576 = arith.constant 576 : index
    %c0_199 = arith.constant 0 : index
    %671 = vector.load %arg2[%c576, %c0_199] : memref<648x512xf32, #tpu.memory_space<vmem>>, vector<64x4xf32>
    %cst_200 = arith.constant dense<0.000000e+00> : vector<2x4xf32>
    %672 = tpu.matmul %670, %671, %cst_200 {dimension_numbers = #tpu.dot_dimension_numbers<[1], [0], [0], [1], [0, 0, 1, 1], [], []>} : vector<2x64xf32>, vector<64x4xf32>, vector<2x4xf32> -> vector<2x4xf32>
    %c640 = arith.constant 640 : index
    %c0_201 = arith.constant 0 : index
    %673 = vector.load %arg2[%c640, %c0_201] : memref<648x512xf32, #tpu.memory_space<vmem>>, vector<1x4xf32>
    %674 = vector.broadcast %673 : vector<1x4xf32> to vector<2x4xf32>
    %675 = arith.addf %672, %674 : vector<2x4xf32>
    %676 = tpu.concatenate %675, %610 in 1 : vector<2x4xf32>, vector<2x6xf32> -> vector<2x10xf32>
    %c0_202 = arith.constant 0 : index
    %c0_203 = arith.constant 0 : index
    %677 = vector.load %arg3[%c0_202, %c0_203] : memref<2x10xf32, #tpu.memory_space<vmem>>, vector<2x10xf32>
    tpu.vector_store %arg3[%c0_202, %c0_203], %676 {strides = array<i32>} : memref<2x10xf32, #tpu.memory_space<vmem>>, vector<2x10xf32>,
    return
  }
}

</mosaic_0001>

<bundles_post_ra>
// kernel: rnn_forward.1
= control target key start
LH: loop header
LB: loop body
LE: loop exit
PB: predicated region body
PF: predicated region fallthrough
CT: control target
= control target key end

     0   :  { %8 = vsyncpa [#allocation4], 0  ;;  %s5066_s0 = inlined_call_operand.vmem [shape: f32[16,4], index: 0, kind: input, shape index: {}]   ;;  %s5067_s1 = inlined_call_operand.hbm [shape: f32[2,3], index: 1, kind: input, shape index: {}]   ;;  %s5068_s2 = inlined_call_operand.hbm [shape: f32[648,512], index: 2, kind: input, shape index: {}]   ;;  %s5069_s3 = inlined_call_operand.vmem [shape: f32[2,10], index: 3, kind: output, shape index: {}]  }
   0x1   :  { %9 = vsyncpa [#allocation6], 0  ;;  %s4380_s12 = smov [#allocation3]   ;;  %s4381_s14 = smov [#allocation5]  }
   0x2   :  { %s18_s13 = sshll.u32 %s4380_s12, 4  ;;  %s27_s15 = sshll.u32 %s4381_s14, 4  ;;  %s19_s13 = int_to_ptr.vmem [resolvable:$true] %s18_s13  ;;  %s4410_s15 = int_to_ptr.vmem [resolvable:$true] %s27_s15 }
   0x3   :  { %s4332_s18 = scalar_lea.hbm %s5067_s1, 32 }
   0x4   :  { %p4333_p0 = scmp.ne.s32.totalorder %s5067_s1, %s4332_s18  ;;  %p4336_p1 = scmp.lt.u32.totalorder %s4332_s18, %s5067_s1 }
   0x6   :  { %p4338_p2 = pnand %p4336_p1, %p4333_p0 }
   0x8   :  { %4341 = shalt.err (!%p4338_p2)
}
   0x9   :  { %s4342_s23 = scalar_lea.vmem %s19_s13, 32  ;;  %p4347_p4 = scmp.lt.s32.totalorder %s19_s13, %s19_s13 }
   0xa   :  { %p4343_p3 = scmp.ne.s32.totalorder %s19_s13, %s4342_s23  ;;  %p4348_p5 = scmp.lt.s32.totalorder %s4342_s23, %s4342_s23 }
   0xc   :  { %p4349_p6 = por %p4348_p5, %p4347_p4 }
   0xe   :  { %p4350_p7 = pnand %p4349_p6, %p4343_p3 }
  0x10   :  { %4353 = shalt.err (!%p4350_p7)
}
  0x11   :  { %21 = dma.hbm_to_vmem [thread:$0]  %s5067_s1, 32, %s19_s13, [#allocation4]  }
  0x12   :  { %s4354_s28 = scalar_lea.hbm %s5068_s2, 41472 }
  0x13   :  { %p4355_p8 = scmp.ne.s32.totalorder %s5068_s2, %s4354_s28  ;;  %p4358_p9 = scmp.lt.u32.totalorder %s4354_s28, %s5068_s2 }
  0x15   :  { %p4360_p10 = pnand %p4358_p9, %p4355_p8 }
  0x17   :  { %4363 = shalt.err (!%p4360_p10)
}
  0x18   :  { %s4364_s6 = scalar_lea.vmem %s4410_s15, 41472  ;;  %p4369_p12 = scmp.lt.s32.totalorder %s4410_s15, %s4410_s15 }
  0x19   :  { %p4365_p11 = scmp.ne.s32.totalorder %s4410_s15, %s4364_s6  ;;  %p4370_p13 = scmp.lt.s32.totalorder %s4364_s6, %s4364_s6 }
  0x1b   :  { %p4371_p0 = por %p4370_p13, %p4369_p12 }
  0x1d   :  { %p4372_p1 = pnand %p4371_p0, %p4365_p11 }
  0x1f   :  { %4375 = shalt.err (!%p4372_p1)
}
  0x20   :  { %s4382_s1 = smov 512   ;;  %s4383_s7 = smov 32  }
  0x21   :  { %33 = dma.hbm_to_vmem [thread:$0]  %s5068_s2, 41472, %s4410_s15, [#allocation6], %s4382_s1, %s4382_s1, %s4383_s7  }
  0x22   :  { %4376 = dma.done.wait [#allocation4], 32  }
  0x23   :  { %4377 = vsyncadd [#allocation4], 4294967264 }
  0x24   :  { %4378 = dma.done.wait [#allocation6], 41472  }
  0x25   :  { %4379 = vsyncadd [#allocation6], 4294925824  ;;  %v5072_v0 = vmov 0.0   ;;  %vm76_vm0 = vcmask 1043456   ;;  %vm69_vm1 = vcmask 31744   ;;  %v40_v5 = vld [vmem:[%s5066_s0] sm:$0xff] }
  0x26   :  { %153 = vmatprep.mubr.f32.mxu1 %v5072_v0  ;;  %323 = vmatprep.mubr.f32.mxu0 %v5072_v0  ;;  %v43_v1 = vld [vmem:[#allocation5 + $0x8] sm:$0xf]  ;;  %v42_v3 = vld [vmem:[#allocation5] sm:$0xf]  ;;  %v45_v6 = vld [vmem:[#allocation5 + $0x18] sm:$0xf] }
  0x27   :  { %v244_v2 = vld [vmem:[#allocation5 + $0x28] sm:$0xf]  ;;  %3395 = vmatprep.subr.msk.mxu1 %vm76_vm0, %v43_v1  ;;  %v243_v4 = vld [vmem:[#allocation5 + $0x20] sm:$0xf]  ;;  %v44_v7 = vld [vmem:[#allocation5 + $0x10] sm:$0xf] }
  0x28   :  { %3403 = vmatprep.subr.msk.mxu0 %vm76_vm0, %v244_v2  ;;  %3396 = vmatpush1.msk.msra.mxu1 %vm76_vm0, %v42_v3  ;;  %v246_v8 = vld [vmem:[#allocation5 + $0x38] sm:$0xf]  ;;  %v245_v10 = vld [vmem:[#allocation5 + $0x30] sm:$0xf]  ;;  %v414_v11 = vld [vmem:[#allocation5 + $0x68] sm:$0xff]  ;;  %vm2094_vm2 = vcmask 523264  }
  0x29   :  { %3404 = vmatpush1.msk.msra.mxu0 %vm76_vm0, %v243_v4  ;;  %3397 = vmatmul.mubr.msk.f32.vlgmr.msra.gmra.mrb[0].mxu1 %vm69_vm1, %v40_v5  ;;  %v41_v9 = vld [vmem:[%s5066_s0 + $0x8] sm:$0xff]  ;;  %v418_v12 = vld [vmem:[#allocation5 + $0x88] sm:$0xff]  ;;  %v413_v16 = vld [vmem:[#allocation5 + $0x60] sm:$0xff]  ;;  %s4385_s0 = smov 64   ;;  %vm4387_vm3 = vmmov 0   ;;  %vm3002_vm4 = vcmask 1042432  }
  0x2a   :  { %3399 = vmatprep.subr.msk.mxu1 %vm76_vm0, %v45_v6  ;;  %3405 = vmatmul.mubr.msk.f32.vlgmr.msra.gmra.mrb[0].mxu0 %vm69_vm1, %v40_v5  ;;  %v416_v13 = vld [vmem:[#allocation5 + $0x78] sm:$0xff]  ;;  %v4473_v14 = vpack.c.bf16 %v418_v12, %v414_v11  ;;  %v417_v17 = vld [vmem:[#allocation5 + $0x80] sm:$0xff]  ;;  %v415_v20 = vld [vmem:[#allocation5 + $0x70] sm:$0xff]  ;;  %s4388_s13 = smov 125   ;;  %s4389_s14 = smov 4   ;;  %vm2998_vm5 = vcmask 23552  }
  0x2b   :  { %3400 = vmatpush1.msk.msra.mxu1 %vm76_vm0, %v44_v7  ;;  %159 = vmatprep.mubr.f32.mxu1 %v5072_v0  ;;  %v420_v15 = vld [vmem:[#allocation5 + $0x98] sm:$0xff]  ;;  %v4477_v19 = vpack.c.bf16 %v417_v17, %v413_v16  ;;  %v419_v21 = vld [vmem:[#allocation5 + $0x90] sm:$0xff]  ;;  %v422_v23 = vld [vmem:[#allocation5 + $0xa8] sm:$0xff]  ;;  %vm3387_vm6 = vcmask 74752  }
  0x2c   :  { %329 = vmatprep.mubr.f32.mxu0 %v5072_v0  ;;  %3407 = vmatprep.subr.msk.mxu1 %vm76_vm0, %v246_v8  ;;  %v4475_v18 = vpack.c.bf16 %v420_v15, %v416_v13  ;;  %v4480_v22 = vpack.c.bf16 %v419_v21, %v415_v20  ;;  %v426_v24 = vld [vmem:[#allocation5 + $0xc8] sm:$0xff]  ;;  %v424_v25 = vld [vmem:[#allocation5 + $0xb8] sm:$0xff]  ;;  %v421_v28 = vld [vmem:[#allocation5 + $0xa0] sm:$0xff] }
  0x2d   :  { %3398 = vmatmul.mubr.msk.f32.gmra.mrb[2].mxu1 %vm69_vm1, %v41_v9  ;;  %3483 = vmatprep.subr.bf16.mxu0 %v4473_v14  ;;  %v4485_v26 = vpack.c.bf16 %v426_v24, %v422_v23  ;;  %v428_v27 = vld [vmem:[#allocation5 + $0xd8] sm:$0xff]  ;;  %v425_v29 = vld [vmem:[#allocation5 + $0xc0] sm:$0xff]  ;;  %v423_v32 = vld [vmem:[#allocation5 + $0xb0] sm:$0xff] }
  0x2e   :  { %3406 = vmatmul.mubr.msk.f32.gmra.mrb[2].mxu0 %vm69_vm1, %v41_v9  ;;  %230 = vmatprep.mubr.f32.mxu1 %v5072_v0  ;;  %v4487_v30 = vpack.c.bf16 %v428_v27, %v424_v25  ;;  %v4489_v31 = vpack.c.bf16 %v425_v29, %v421_v28  ;;  %v427_v33 = vld [vmem:[#allocation5 + $0xd0] sm:$0xff]  ;;  %v430_v35 = vld [vmem:[#allocation5 + $0xe8] sm:$0xff]  ;;  %v432_v37 = vld [vmem:[#allocation5 + $0xf8] sm:$0xff] }
  0x2f   :  { %579 = vmatprep.mubr.f32.mxu0 %v5072_v0  ;;  %3485 = vmatpush1.bf16.msra.mxu0 %v4477_v19  ;;  %v4492_v34 = vpack.c.bf16 %v427_v33, %v423_v32  ;;  %v434_v36 = vld [vmem:[#allocation5 + $0x108] sm:$0xff]  ;;  %v436_v39 = vld [vmem:[#allocation5 + $0x118] sm:$0xff]  ;;  %v429_v40 = vld [vmem:[#allocation5 + $0xe0] sm:$0xff] }
  0x30   :  { %3487 = vmatprep.subr.bf16.mxu0 %v4485_v26  ;;  %v4497_v38 = vpack.c.bf16 %v434_v36, %v430_v35  ;;  %v433_v41 = vld [vmem:[#allocation5 + $0x100] sm:$0xff]  ;;  %v4499_v42 = vpack.c.bf16 %v436_v39, %v432_v37  ;;  %v431_v44 = vld [vmem:[#allocation5 + $0xf0] sm:$0xff]  ;;  %v438_v47 = vld [vmem:[#allocation5 + $0x128] sm:$0xff] }
  0x31   :  { %3401 = vmatmul.mubr.msk.f32.vlgmr.msra.gmra.mrb[4].mxu1 %vm69_vm1, %v40_v5  ;;  %v4501_v43 = vpack.c.bf16 %v433_v41, %v429_v40  ;;  %v435_v45 = vld [vmem:[#allocation5 + $0x110] sm:$0xff]  ;;  %v442_v48 = vld [vmem:[#allocation5 + $0x148] sm:$0xff]  ;;  %v440_v49 = vld [vmem:[#allocation5 + $0x138] sm:$0xff] }
  0x32   :  { %3408 = vmatpush1.msk.msra.mxu1 %vm76_vm0, %v245_v10  ;;  %236 = vmatprep.mubr.f32.mxu1 %v5072_v0  ;;  %v4504_v46 = vpack.c.bf16 %v435_v45, %v431_v44  ;;  %v4509_v50 = vpack.c.bf16 %v442_v48, %v438_v47  ;;  %v444_v51 = vld [vmem:[#allocation5 + $0x158] sm:$0xff]  ;;  %v437_v52 = vld [vmem:[#allocation5 + $0x120] sm:$0xff]  ;;  %v439_v56 = vld [vmem:[#allocation5 + $0x130] sm:$0xff] }
  0x33   :  { %3515 = vmatprep.subr.bf16.mxu1 %v4475_v18  ;;  %3489 = vmatpush1.bf16.msra.mxu0 %v4489_v31  ;;  %v441_v53 = vld [vmem:[#allocation5 + $0x140] sm:$0xff]  ;;  %v4511_v54 = vpack.c.bf16 %v444_v51, %v440_v49  ;;  %v443_v57 = vld [vmem:[#allocation5 + $0x150] sm:$0xff]  ;;  %v446_v59 = vld [vmem:[#allocation5 + $0x168] sm:$0xff] }
  0x34   :  { %3491 = vmatprep.subr.bf16.mxu0 %v4497_v38  ;;  %v4513_v55 = vpack.c.bf16 %v441_v53, %v437_v52  ;;  %v4516_v58 = vpack.c.bf16 %v443_v57, %v439_v56  ;;  %v450_v60 = vld [vmem:[#allocation5 + $0x188] sm:$0xff]  ;;  %v448_v61 = vld [vmem:[#allocation5 + $0x178] sm:$0xff]  ;;  %v445_v1 = vld [vmem:[#allocation5 + $0x160] sm:$0xff] }
  0x35   :  { %3402 = vmatmul.mubr.msk.f32.gmra.mrb[6].mxu1 %vm69_vm1, %v41_v9  ;;  %v4521_v62 = vpack.c.bf16 %v450_v60, %v446_v59  ;;  %v452_v63 = vld [vmem:[#allocation5 + $0x198] sm:$0xff]  ;;  %v449_v2 = vld [vmem:[#allocation5 + $0x180] sm:$0xff]  ;;  %v451_v6 = vld [vmem:[#allocation5 + $0x190] sm:$0xff]  ;;  %v49_v60 = vlaneseq }
  0x36   :  { %400 = vmatprep.mubr.f32.mxu1 %v5072_v0  ;;  %v4523_v3 = vpack.c.bf16 %v452_v63, %v448_v61  ;;  %v4525_v4 = vpack.c.bf16 %v449_v2, %v445_v1  ;;  %v454_v8 = vld [vmem:[#allocation5 + $0x1a8] sm:$0xff]  ;;  %v456_v10 = vld [vmem:[#allocation5 + $0x1b8] sm:$0xff]  ;;  %v453_v13 = vld [vmem:[#allocation5 + $0x1a0] sm:$0xff] }
  0x37   :  { %3493 = vmatpush1.bf16.msra.mxu0 %v4501_v43  ;;  %v460_v12 = vld [vmem:[#allocation5 + $0x1d8] sm:$0xff]  ;;  %v457_v15 = vld [vmem:[#allocation5 + $0x1c0] sm:$0xff]  ;;  %v455_v20 = vld [vmem:[#allocation5 + $0x1b0] sm:$0xff]  ;;  %v4571_v61 = vshrl.u32 %v49_v60, 7 }
  0x38   :  { %3495 = vmatprep.subr.bf16.mxu0 %v4509_v50  ;;  %v4535_v16 = vpack.c.bf16 %v460_v12, %v456_v10  ;;  %v4537_v17 = vpack.c.bf16 %v457_v15, %v453_v13  ;;  %v459_v21 = vld [vmem:[#allocation5 + $0x1d0] sm:$0xff]  ;;  %v462_v23 = vld [vmem:[#allocation5 + $0x1e8] sm:$0xff]  ;;  %v464_v27 = vld [vmem:[#allocation5 + $0x1f8] sm:$0xff] }
  0x39   :  { %3409 = vmatmul.mubr.msk.f32.vlgmr.msra.gmra.mrb[8].mxu1 %vm69_vm1, %v40_v5  ;;  %v447_v5 = vld [vmem:[#allocation5 + $0x170] sm:$0xff]  ;;  %v4540_v24 = vpack.c.bf16 %v459_v21, %v455_v20  ;;  %v466_v25 = vld [vmem:[#allocation5 + $0x208] sm:$0xff]  ;;  %v468_v28 = vld [vmem:[#allocation5 + $0x218] sm:$0xff]  ;;  %5084 = vst [vmem:[#allocation9_spill] sm:$0xff] %v4571_v61  ;;  %v4574_v63 = vsub.s32 0, %v4571_v61  ;;  %v4577_v2 = vsub.s32 1, %v4571_v61 }
  0x3a   :  { %406 = vmatprep.mubr.f32.mxu1 %v5072_v0  ;;  %3517 = vmatpush1.bf16.msra.mxu1 %v4480_v22  ;;  %v4528_v7 = vpack.c.bf16 %v451_v6, %v447_v5  ;;  %v4544_v29 = vpack.c.bf16 %v466_v25, %v462_v23  ;;  %v4546_v32 = vpack.c.bf16 %v468_v28, %v464_v27  ;;  %v461_v33 = vld [vmem:[#allocation5 + $0x1e0] sm:$0xff]  ;;  %v463_v36 = vld [vmem:[#allocation5 + $0x1f0] sm:$0xff]  ;;  %v470_v40 = vld [vmem:[#allocation5 + $0x228] sm:$0xff] }
  0x3b   :  { %3519 = vmatprep.subr.bf16.mxu1 %v4487_v30  ;;  %3497 = vmatpush1.bf16.msra.mxu0 %v4513_v55  ;;  %v465_v35 = vld [vmem:[#allocation5 + $0x200] sm:$0xff]  ;;  %v467_v39 = vld [vmem:[#allocation5 + $0x210] sm:$0xff]  ;;  %v474_v41 = vld [vmem:[#allocation5 + $0x248] sm:$0xff]  ;;  %5085 = vst [vmem:[#allocation10_spill] sm:$0xff] %v4574_v63 }
  0x3c   :  { %3499 = vmatprep.subr.bf16.mxu0 %v4521_v62  ;;  %v4549_v37 = vpack.c.bf16 %v465_v35, %v461_v33  ;;  %v4553_v44 = vpack.c.bf16 %v467_v39, %v463_v36  ;;  %v4555_v45 = vpack.c.bf16 %v474_v41, %v470_v40  ;;  %v472_v47 = vld [vmem:[#allocation5 + $0x238] sm:$0xff]  ;;  %v469_v49 = vld [vmem:[#allocation5 + $0x220] sm:$0xff]  ;;  %v471_v53 = vld [vmem:[#allocation5 + $0x230] sm:$0xff]  ;;  %5086 = vst [vmem:[#allocation11_spill] sm:$0xff] %v4577_v2  ;;  %v5070_v35 = vsub.s32 2, %v4571_v61 }
  0x3d   :  { %3410 = vmatmul.mubr.msk.f32.gmra.mrb[10].mxu1 %vm69_vm1, %v41_v9  ;;  %v458_v9 = vld [vmem:[#allocation5 + $0x1c8] sm:$0xff]  ;;  %v476_v48 = vld [vmem:[#allocation5 + $0x258] sm:$0xff]  ;;  %v473_v52 = vld [vmem:[#allocation5 + $0x240] sm:$0xff]  ;;  %v5071_v36 = vsub.s32 3, %v4571_v61 }
  0x3e   :  { %650 = vmatprep.mubr.f32.mxu1 %v5072_v0  ;;  %3521 = vmatpush1.bf16.msra.mxu1 %v4492_v34  ;;  %v4533_v11 = vpack.c.bf16 %v458_v9, %v454_v8  ;;  %v4557_v51 = vpack.c.bf16 %v476_v48, %v472_v47  ;;  %v475_v56 = vld [vmem:[#allocation5 + $0x250] sm:$0xff]  ;;  %v4560_v57 = vpack.c.bf16 %v473_v52, %v469_v49 }
  0x3f   :  { %3523 = vmatprep.subr.bf16.mxu1 %v4499_v42  ;;  %3501 = vmatpush1.bf16.msra.mxu0 %v4525_v4  ;;  %v4564_v59 = vpack.c.bf16 %v475_v56, %v471_v53  ;;  %v47_v1 = vld [vmem:[#allocation5 + $0x40] ss:$8 sm:$0xf] }
  0x40   :  { %3503 = vmatprep.subr.bf16.mxu0 %v4533_v11  ;;  %v52_v6 = vrot.slane %v47_v1, %v4574_v63  ;;  %v56_v10 = vrot.slane %v47_v1, %v4577_v2 }
  0x42   :  { %3525 = vmatpush1.bf16.msra.mxu1 %v4504_v46 }
  0x43   :  { %3527 = vmatprep.subr.bf16.mxu1 %v4511_v54  ;;  %3505 = vmatpush1.bf16.msra.mxu0 %v4537_v17 }
  0x44   :  { %3507 = vmatprep.subr.bf16.mxu0 %v4544_v29 }
  0x46   :  { %3529 = vmatpush1.bf16.msra.mxu1 %v4516_v58 }
  0x47   :  { %3531 = vmatprep.subr.bf16.mxu1 %v4523_v3  ;;  %3509 = vmatpush1.bf16.msra.mxu0 %v4549_v37 }
  0x48   :  { %3511 = vmatprep.subr.bf16.mxu0 %v4555_v45 }
  0x4a   :  { %3533 = vmatpush1.bf16.msra.mxu1 %v4528_v7 }
  0x4b   :  { %3535 = vmatprep.subr.bf16.mxu1 %v4535_v16  ;;  %3513 = vmatpush1.bf16.msra.mxu0 %v4560_v57 }
  0x4c   :  { %3547 = vmatprep.subr.bf16.mxu0 %v4473_v14 }
  0x4e   :  { %3537 = vmatpush1.bf16.msra.mxu1 %v4540_v24 }
  0x4f   :  { %3539 = vmatprep.subr.bf16.mxu1 %v4546_v32 }
  0x52   :  { %3541 = vmatpush1.bf16.msra.mxu1 %v4553_v44 }
  0x53   :  { %3543 = vmatprep.subr.bf16.mxu1 %v4557_v51 }
  0x56   :  { %3545 = vmatpush1.bf16.msra.mxu1 %v4564_v59 }
  0x57   :  { %3579 = vmatprep.subr.bf16.mxu1 %v4475_v18 }
  0xfc   :  { %v155_v5 = vpop.f32.mrb[0].mxu1 }
  0xfd   :  { %v157_v8 = vpop.f32.mrb[1].mxu1  ;;  %v325_v9 = vpop.f32.mrb[0].mxu0  ;;  %v156_v25 = vadd.f32 %v155_v5, %v52_v6 }
  0xfe   :  { %v327_v12 = vpop.f32.mrb[1].mxu0  ;;  %v1068_v13 = vrot.slane %v325_v9, 6  ;;  %v1251_v15 = vrot.slane %v325_v9, 2  ;;  %v158_v39 = vadd.f32 %v157_v8, %v56_v10 }
  0xff   :  { %v1069_v20 = vrot.slane %v327_v12, 6  ;;  %v1252_v21 = vrot.slane %v327_v12, 2 }
 0x100   :  { %v161_v23 = vpop.f32.mrb[2].mxu1 }
 0x101   :  { %v162_v27 = vadd.f32 %v161_v23, %v52_v6  ;;  %v331_v28 = vpop.f32.mrb[2].mxu0  ;;  %v163_v33 = vpop.f32.mrb[3].mxu1 }
 0x102   :  { %v480_v40 = vrot.slane %v331_v28, 6  ;;  %v503_v41 = vrot.slane %v331_v28, 2  ;;  %v164_v47 = vadd.f32 %v163_v33, %v56_v10  ;;  %v333_v48 = vpop.f32.mrb[3].mxu0 }
 0x103   :  { %v4583_v49 = vadd.f32 %v1251_v15, %v162_v27  ;;  %v504_v52 = vrot.slane %v333_v48, 2  ;;  %v695_v53 = vrot.slane %v333_v48, 6  ;;  %v4585_v56 = vadd.f32 %v1068_v13, %v162_v27 }
 0x104   :  { %v4587_v60 = vadd.f32 %v480_v40, %v156_v25  ;;  %v4589_v5 = vadd.f32 %v503_v41, %v156_v25  ;;  %v4591_v6 = vadd.f32 %v1252_v21, %v164_v47  ;;  %v232_v9 = vpop.f32.mrb[4].mxu1  ;;  %v4593_v12 = vadd.f32 %v1069_v20, %v164_v47 }
 0x105   :  { %5087 = vst [vmem:[#allocation12_spill] sm:$0xff] %v4583_v49  ;;  %v4595_v8 = vadd.f32 %v504_v52, %v158_v39  ;;  %v4597_v23 = vadd.f32 %v695_v53, %v158_v39  ;;  %v234_v10 = vpop.f32.mrb[5].mxu1  ;;  %v60_v15 = vrot.slane %v47_v1, %v5070_v35  ;;  %v64_v13 = vrot.slane %v47_v1, %v5071_v36 }
 0x106   :  { %5088 = vst [vmem:[#allocation13_spill] sm:$0xff] %v4591_v6  ;;  %v489_v21 = vmul.f32 0.5, %v4587_v60 }
 0x107   :  { %v235_v2 = vadd.f32 %v234_v10, %v64_v13 }
 0x108   :  { %v238_v27 = vpop.f32.mrb[6].mxu1  ;;  %4172 = vtanh.f32 %v489_v21 }
 0x109   :  { %v239_v28 = vadd.f32 %v238_v27, %v60_v15  ;;  %v240_v25 = vpop.f32.mrb[7].mxu1  ;;  %v233_v27 = vadd.f32 %v232_v9, %v60_v15 }
 0x10a   :  { %v241_v33 = vadd.f32 %v240_v25, %v64_v13 }
 0x10c   :  { %v402_v40 = vpop.f32.mrb[8].mxu1 }
 0x10d   :  { %v1070_v20 = vrot.slane %v402_v40, 6  ;;  %v1253_v41 = vrot.slane %v402_v40, 2  ;;  %v404_v47 = vpop.f32.mrb[9].mxu1 }
 0x10e   :  { %v1071_v39 = vrot.slane %v404_v47, 6  ;;  %v1254_v48 = vrot.slane %v404_v47, 2 }
 0x10f   :  { %v4604_v52 = vadd.f32 %v1253_v41, %v239_v28  ;;  %v4606_v53 = vadd.f32 %v1070_v20, %v239_v28 }
 0x110   :  { %v4608_v35 = vadd.f32 %v1254_v48, %v241_v33  ;;  %v408_v1 = vpop.f32.mrb[10].mxu1  ;;  %v4610_v36 = vadd.f32 %v1071_v39, %v241_v33 }
 0x111   :  { %5089 = vst [vmem:[#allocation14_spill] sm:$0xff] %v4604_v52  ;;  %v481_v0 = vrot.slane %v408_v1, 6  ;;  %v505_v61 = vrot.slane %v408_v1, 2  ;;  %v410_v25 = vpop.f32.mrb[11].mxu1 }
 0x112   :  { %5090 = vst [vmem:[#allocation15_spill] sm:$0xff] %v4608_v35  ;;  %v482_v63 = vrot.slane %v410_v25, 6  ;;  %v506_v40 = vrot.slane %v410_v25, 2  ;;  %v4173_v20 = vpop.eup %4172 }
 0x113   :  { %v4612_v6 = vadd.f32 %v481_v0, %v233_v27  ;;  %v4614_v21 = vadd.f32 %v505_v61, %v233_v27  ;;  %v491_v9 = vmul.f32 0.5, %v4173_v20 }
 0x114   :  { %v4616_v41 = vadd.f32 %v482_v63, %v235_v2  ;;  %v4618_v28 = vadd.f32 %v506_v40, %v235_v2  ;;  %v5091_v2 = vmov 0.0  }
 0x115   :  { %v493_v33 = vmul.f32 0.5, %v4612_v6  ;;  %v492_v15 = vadd.f32 0.5, %v491_v9 }
 0x116   :  { %4174 = vtanh.f32 %v4616_v41 }
 0x117   :  { %4176 = vtanh.f32 %v493_v33 }
 0x120   :  { %v4175_v47 = vpop.eup %4174 }
 0x121   :  { %v4622_v10 = vmul.f32 %v4175_v47, %v492_v15  ;;  %v4177_v0 = vpop.eup %4176 }
 0x122   :  { %v495_v61 = vmul.f32 0.5, %v4177_v0 }
 0x123   :  { %4178 = vtanh.f32 %v4622_v10 }
 0x124   :  { %v496_v13 = vadd.f32 0.5, %v495_v61 }
 0x12d   :  { %v4179_v63 = vpop.eup %4178 }
 0x12e   :  { %v500_v39 = vmul.f32 %v4179_v63, %v496_v13 }
 0x130   :  { %501 = vst [vmem:[#allocation2] sm:$0x3] %v500_v39  ;;  %580 = vmatmul.mubr.f32.vlgmr.msra.gmra.mrb[4].mxu0 %v500_v39  ;;  %651 = vmatmul.mubr.f32.vlgmr.msra.gmra.mrb[12].mxu1 %v500_v39 }
 0x131   :  { %3549 = vmatpush1.bf16.msra.mxu0 %v4477_v19  ;;  %3581 = vmatpush1.bf16.msra.mxu1 %v4480_v22 }
 0x132   :  { %3551 = vmatprep.subr.bf16.mxu0 %v4485_v26  ;;  %3583 = vmatprep.subr.bf16.mxu1 %v4487_v30 }
 0x133   :  { %765 = vmatprep.mubr.f32.mxu0 %v5091_v2  ;;  %836 = vmatprep.mubr.f32.mxu1 %v5091_v2 }
 0x135   :  { %3553 = vmatpush1.bf16.msra.mxu0 %v4489_v31  ;;  %3585 = vmatpush1.bf16.msra.mxu1 %v4492_v34 }
 0x136   :  { %3555 = vmatprep.subr.bf16.mxu0 %v4497_v38  ;;  %3587 = vmatprep.subr.bf16.mxu1 %v4499_v42 }
 0x139   :  { %3557 = vmatpush1.bf16.msra.mxu0 %v4501_v43  ;;  %3589 = vmatpush1.bf16.msra.mxu1 %v4504_v46 }
 0x13a   :  { %3559 = vmatprep.subr.bf16.mxu0 %v4509_v50  ;;  %3591 = vmatprep.subr.bf16.mxu1 %v4511_v54 }
 0x13d   :  { %3561 = vmatpush1.bf16.msra.mxu0 %v4513_v55  ;;  %3593 = vmatpush1.bf16.msra.mxu1 %v4516_v58 }
 0x13e   :  { %3563 = vmatprep.subr.bf16.mxu0 %v4521_v62  ;;  %3595 = vmatprep.subr.bf16.mxu1 %v4523_v3 }
 0x141   :  { %3565 = vmatpush1.bf16.msra.mxu0 %v4525_v4  ;;  %3597 = vmatpush1.bf16.msra.mxu1 %v4528_v7 }
 0x142   :  { %3567 = vmatprep.subr.bf16.mxu0 %v4533_v11  ;;  %3599 = vmatprep.subr.bf16.mxu1 %v4535_v16 }
 0x145   :  { %3569 = vmatpush1.bf16.msra.mxu0 %v4537_v17  ;;  %3601 = vmatpush1.bf16.msra.mxu1 %v4540_v24 }
 0x146   :  { %3571 = vmatprep.subr.bf16.mxu0 %v4544_v29  ;;  %3603 = vmatprep.subr.bf16.mxu1 %v4546_v32 }
 0x149   :  { %3573 = vmatpush1.bf16.msra.mxu0 %v4549_v37  ;;  %3605 = vmatpush1.bf16.msra.mxu1 %v4553_v44 }
 0x14a   :  { %3575 = vmatprep.subr.bf16.mxu0 %v4555_v45  ;;  %3607 = vmatprep.subr.bf16.mxu1 %v4557_v51 }
 0x14d   :  { %3577 = vmatpush1.bf16.msra.mxu0 %v4560_v57  ;;  %3609 = vmatpush1.bf16.msra.mxu1 %v4564_v59 }
 0x14e   :  { %3611 = vmatprep.subr.bf16.mxu0 %v4473_v14  ;;  %3643 = vmatprep.subr.bf16.mxu1 %v4475_v18 }
 0x203   :  { %v581_v48 = vpop.f32.mrb[4].mxu0  ;;  %v652_v1 = vpop.f32.mrb[12].mxu1 }
 0x204   :  { %v661_v27 = vrot.slane %v581_v48, 6  ;;  %v583_v25 = vpop.f32.mrb[5].mxu0  ;;  %v654_v40 = vpop.f32.mrb[13].mxu1  ;;  %v663_v13 = vrot.slane %v652_v1, 6 }
 0x205   :  { %v662_v33 = vrot.slane %v583_v25, 6  ;;  %v664_v9 = vrot.slane %v654_v40, 6 }
 0x206   :  { %v669_v20 = vadd.f32 %v661_v27, %v4589_v5  ;;  %v671_v63 = vadd.f32 %v663_v13, %v4614_v21 }
 0x207   :  { %v670_v15 = vadd.f32 %v662_v33, %v4595_v8  ;;  %v672_v61 = vadd.f32 %v664_v9, %v4618_v28  ;;  %v687_v33 = vrot.slane %v4622_v10, 6 }
 0x208   :  { %v673_v47 = vmul.f32 0.5, %v669_v20  ;;  %v681_v39 = vmul.f32 0.5, %v671_v63 }
 0x209   :  { %v677_v0 = vmul.f32 0.5, %v670_v15 }
 0x20a   :  { %4180 = vtanh.f32 %v673_v47 }
 0x20b   :  { %4182 = vtanh.f32 %v677_v0 }
 0x20c   :  { %4184 = vtanh.f32 %v672_v61 }
 0x20d   :  { %4186 = vtanh.f32 %v681_v39 }
 0x214   :  { %v4181_v48 = vpop.eup %4180 }
 0x215   :  { %v675_v52 = vmul.f32 0.5, %v4181_v48  ;;  %v4183_v35 = vpop.eup %4182 }
 0x216   :  { %v679_v27 = vmul.f32 0.5, %v4183_v35  ;;  %v4185_v40 = vpop.eup %4184 }
 0x217   :  { %v676_v25 = vadd.f32 0.5, %v675_v52  ;;  %v4187_v1 = vpop.eup %4186 }
 0x218   :  { %v680_v49 = vadd.f32 0.5, %v679_v27  ;;  %v683_v9 = vmul.f32 0.5, %v4187_v1 }
 0x219   :  { %v690_v20 = vmul.f32 %v4185_v40, %v676_v25 }
 0x21a   :  { %v689_v15 = vmul.f32 %v687_v33, %v680_v49  ;;  %v684_v0 = vadd.f32 0.5, %v683_v9 }
 0x21c   :  { %v4664_v47 = vadd.f32 %v690_v20, %v689_v15 }
 0x21e   :  { %4188 = vtanh.f32 %v4664_v47 }
 0x228   :  { %v4189_v61 = vpop.eup %4188 }
 0x229   :  { %v693_v13 = vmul.f32 %v4189_v61, %v684_v0 }
 0x22b   :  { %694 = vst [vmem:[#allocation2] sm:$0xc] %v693_v13  ;;  %v699_v63 = vrot.slane %v693_v13, 2 }
 0x22d   :  { %766 = vmatmul.mubr.f32.vlgmr.msra.gmra.mrb[6].mxu0 %v699_v63  ;;  %837 = vmatmul.mubr.f32.vlgmr.msra.gmra.mrb[14].mxu1 %v699_v63 }
 0x22e   :  { %3613 = vmatpush1.bf16.msra.mxu0 %v4477_v19  ;;  %3645 = vmatpush1.bf16.msra.mxu1 %v4480_v22 }
 0x22f   :  { %3615 = vmatprep.subr.bf16.mxu0 %v4485_v26  ;;  %3647 = vmatprep.subr.bf16.mxu1 %v4487_v30 }
 0x230   :  { %948 = vmatprep.mubr.f32.mxu0 %v5091_v2  ;;  %1019 = vmatprep.mubr.f32.mxu1 %v5091_v2 }
 0x232   :  { %3617 = vmatpush1.bf16.msra.mxu0 %v4489_v31  ;;  %3649 = vmatpush1.bf16.msra.mxu1 %v4492_v34 }
 0x233   :  { %3619 = vmatprep.subr.bf16.mxu0 %v4497_v38  ;;  %3651 = vmatprep.subr.bf16.mxu1 %v4499_v42 }
 0x236   :  { %3621 = vmatpush1.bf16.msra.mxu0 %v4501_v43  ;;  %3653 = vmatpush1.bf16.msra.mxu1 %v4504_v46 }
 0x237   :  { %3623 = vmatprep.subr.bf16.mxu0 %v4509_v50  ;;  %3655 = vmatprep.subr.bf16.mxu1 %v4511_v54 }
 0x23a   :  { %3625 = vmatpush1.bf16.msra.mxu0 %v4513_v55  ;;  %3657 = vmatpush1.bf16.msra.mxu1 %v4516_v58 }
 0x23b   :  { %3627 = vmatprep.subr.bf16.mxu0 %v4521_v62  ;;  %3659 = vmatprep.subr.bf16.mxu1 %v4523_v3 }
 0x23e   :  { %3629 = vmatpush1.bf16.msra.mxu0 %v4525_v4  ;;  %3661 = vmatpush1.bf16.msra.mxu1 %v4528_v7 }
 0x23f   :  { %3631 = vmatprep.subr.bf16.mxu0 %v4533_v11  ;;  %3663 = vmatprep.subr.bf16.mxu1 %v4535_v16 }
 0x242   :  { %3633 = vmatpush1.bf16.msra.mxu0 %v4537_v17  ;;  %3665 = vmatpush1.bf16.msra.mxu1 %v4540_v24 }
 0x243   :  { %3635 = vmatprep.subr.bf16.mxu0 %v4544_v29  ;;  %3667 = vmatprep.subr.bf16.mxu1 %v4546_v32 }
 0x246   :  { %3637 = vmatpush1.bf16.msra.mxu0 %v4549_v37  ;;  %3669 = vmatpush1.bf16.msra.mxu1 %v4553_v44 }
 0x247   :  { %3639 = vmatprep.subr.bf16.mxu0 %v4555_v45  ;;  %3671 = vmatprep.subr.bf16.mxu1 %v4557_v51 }
 0x24a   :  { %3641 = vmatpush1.bf16.msra.mxu0 %v4560_v57  ;;  %3673 = vmatpush1.bf16.msra.mxu1 %v4564_v59 }
 0x24b   :  { %3675 = vmatprep.subr.bf16.mxu0 %v4473_v14  ;;  %3707 = vmatprep.subr.bf16.mxu1 %v4475_v18 }
 0x300   :  { %v767_v35 = vpop.f32.mrb[6].mxu0  ;;  %v838_v49 = vpop.f32.mrb[14].mxu1 }
 0x301   :  { %v847_v52 = vrot.slane %v767_v35, 4  ;;  %v769_v10 = vpop.f32.mrb[7].mxu0  ;;  %v840_v39 = vpop.f32.mrb[15].mxu1  ;;  %v849_v1 = vrot.slane %v838_v49, 4 }
 0x302   :  { %v848_v48 = vrot.slane %v769_v10, 4  ;;  %v850_v27 = vrot.slane %v840_v39, 4 }
 0x303   :  { %v855_v25 = vadd.f32 %v847_v52, %v4587_v60  ;;  %v857_v9 = vadd.f32 %v849_v1, %v4612_v6 }
 0x304   :  { %v856_v40 = vadd.f32 %v848_v48, %v4597_v23  ;;  %v858_v15 = vadd.f32 %v850_v27, %v4616_v41  ;;  %v873_v23 = vrot.slane %v4664_v47, 6 }
 0x305   :  { %v859_v33 = vmul.f32 0.5, %v855_v25  ;;  %v867_v0 = vmul.f32 0.5, %v857_v9 }
 0x306   :  { %v863_v20 = vmul.f32 0.5, %v856_v40 }
 0x307   :  { %4190 = vtanh.f32 %v859_v33 }
 0x308   :  { %4192 = vtanh.f32 %v863_v20 }
 0x309   :  { %4194 = vtanh.f32 %v858_v15 }
 0x30a   :  { %4196 = vtanh.f32 %v867_v0 }
 0x311   :  { %v4191_v61 = vpop.eup %4190 }
 0x312   :  { %v861_v13 = vmul.f32 0.5, %v4191_v61  ;;  %v4193_v63 = vpop.eup %4192 }
 0x313   :  { %v865_v60 = vmul.f32 0.5, %v4193_v63  ;;  %v4195_v52 = vpop.eup %4194 }
 0x314   :  { %v862_v35 = vadd.f32 0.5, %v861_v13  ;;  %v4197_v41 = vpop.eup %4196 }
 0x315   :  { %v866_v10 = vadd.f32 0.5, %v865_v60  ;;  %v869_v49 = vmul.f32 0.5, %v4197_v41 }
 0x316   :  { %v876_v39 = vmul.f32 %v4195_v52, %v862_v35 }
 0x317   :  { %v875_v48 = vmul.f32 %v873_v23, %v866_v10  ;;  %v870_v6 = vadd.f32 0.5, %v869_v49 }
 0x319   :  { %v4706_v25 = vadd.f32 %v876_v39, %v875_v48 }
 0x31b   :  { %4198 = vtanh.f32 %v4706_v25 }
 0x325   :  { %v4199_v27 = vpop.eup %4198 }
 0x326   :  { %v879_v40 = vmul.f32 %v4199_v27, %v870_v6 }
 0x328   :  { %880 = vst [vmem:[#allocation2] sm:$0x30] %v879_v40  ;;  %v882_v33 = vrot.slane %v879_v40, 4 }
 0x32a   :  { %949 = vmatmul.mubr.f32.vlgmr.msra.gmra.mrb[8].mxu0 %v882_v33  ;;  %1020 = vmatmul.mubr.f32.vlgmr.msra.gmra.mrb[16].mxu1 %v882_v33 }
 0x32b   :  { %3677 = vmatpush1.bf16.msra.mxu0 %v4477_v19  ;;  %3709 = vmatpush1.bf16.msra.mxu1 %v4480_v22 }
 0x32c   :  { %3679 = vmatprep.subr.bf16.mxu0 %v4485_v26  ;;  %3711 = vmatprep.subr.bf16.mxu1 %v4487_v30 }
 0x32d   :  { %1147 = vmatprep.mubr.f32.mxu0 %v5091_v2  ;;  %1218 = vmatprep.mubr.f32.mxu1 %v5091_v2 }
 0x32f   :  { %3681 = vmatpush1.bf16.msra.mxu0 %v4489_v31  ;;  %3713 = vmatpush1.bf16.msra.mxu1 %v4492_v34 }
 0x330   :  { %3683 = vmatprep.subr.bf16.mxu0 %v4497_v38  ;;  %3715 = vmatprep.subr.bf16.mxu1 %v4499_v42 }
 0x333   :  { %3685 = vmatpush1.bf16.msra.mxu0 %v4501_v43  ;;  %3717 = vmatpush1.bf16.msra.mxu1 %v4504_v46 }
 0x334   :  { %3687 = vmatprep.subr.bf16.mxu0 %v4509_v50  ;;  %3719 = vmatprep.subr.bf16.mxu1 %v4511_v54 }
 0x337   :  { %3689 = vmatpush1.bf16.msra.mxu0 %v4513_v55  ;;  %3721 = vmatpush1.bf16.msra.mxu1 %v4516_v58 }
 0x338   :  { %3691 = vmatprep.subr.bf16.mxu0 %v4521_v62  ;;  %3723 = vmatprep.subr.bf16.mxu1 %v4523_v3 }
 0x33b   :  { %3693 = vmatpush1.bf16.msra.mxu0 %v4525_v4  ;;  %3725 = vmatpush1.bf16.msra.mxu1 %v4528_v7 }
 0x33c   :  { %3695 = vmatprep.subr.bf16.mxu0 %v4533_v11  ;;  %3727 = vmatprep.subr.bf16.mxu1 %v4535_v16 }
 0x33f   :  { %3697 = vmatpush1.bf16.msra.mxu0 %v4537_v17  ;;  %3729 = vmatpush1.bf16.msra.mxu1 %v4540_v24 }
 0x340   :  { %3699 = vmatprep.subr.bf16.mxu0 %v4544_v29  ;;  %3731 = vmatprep.subr.bf16.mxu1 %v4546_v32 }
 0x343   :  { %3701 = vmatpush1.bf16.msra.mxu0 %v4549_v37  ;;  %3733 = vmatpush1.bf16.msra.mxu1 %v4553_v44 }
 0x344   :  { %3703 = vmatprep.subr.bf16.mxu0 %v4555_v45  ;;  %3735 = vmatprep.subr.bf16.mxu1 %v4557_v51 }
 0x347   :  { %3705 = vmatpush1.bf16.msra.mxu0 %v4560_v57  ;;  %3737 = vmatpush1.bf16.msra.mxu1 %v4564_v59 }
 0x348   :  { %3739 = vmatprep.subr.bf16.mxu0 %v4473_v14  ;;  %3771 = vmatprep.subr.bf16.mxu1 %v4475_v18 }
 0x3fd   :  { %v950_v47 = vpop.f32.mrb[8].mxu0  ;;  %v1021_v20 = vpop.f32.mrb[16].mxu1 }
 0x3fe   :  { %v1030_v15 = vrot.slane %v950_v47, 2  ;;  %v952_v1 = vpop.f32.mrb[9].mxu0  ;;  %v1023_v9 = vpop.f32.mrb[17].mxu1  ;;  %v1032_v10 = vrot.slane %v1021_v20, 2 }
 0x3ff   :  { %v1031_v0 = vrot.slane %v952_v1, 2  ;;  %v1033_v13 = vrot.slane %v1023_v9, 2 }
 0x400   :  { %v1038_v61 = vadd.f32 %v1030_v15, %v4589_v5  ;;  %v1040_v23 = vadd.f32 %v1032_v10, %v4614_v21 }
 0x401   :  { %v1039_v63 = vadd.f32 %v1031_v0, %v4595_v8  ;;  %v1041_v52 = vadd.f32 %v1033_v13, %v4618_v28  ;;  %v1056_v8 = vrot.slane %v4706_v25, 6 }
 0x402   :  { %v1042_v35 = vmul.f32 0.5, %v1038_v61  ;;  %v1050_v39 = vmul.f32 0.5, %v1040_v23 }
 0x403   :  { %v1046_v60 = vmul.f32 0.5, %v1039_v63 }
 0x404   :  { %4200 = vtanh.f32 %v1042_v35 }
 0x405   :  { %4202 = vtanh.f32 %v1046_v60 }
 0x406   :  { %4204 = vtanh.f32 %v1041_v52 }
 0x407   :  { %4206 = vtanh.f32 %v1050_v39 }
 0x40e   :  { %v4201_v48 = vpop.eup %4200 }
 0x40f   :  { %v1044_v41 = vmul.f32 0.5, %v4201_v48  ;;  %v4203_v49 = vpop.eup %4202 }
 0x410   :  { %v1048_v5 = vmul.f32 0.5, %v4203_v49  ;;  %v4205_v27 = vpop.eup %4204 }
 0x411   :  { %v1045_v6 = vadd.f32 0.5, %v1044_v41  ;;  %v4207_v28 = vpop.eup %4206 }
 0x412   :  { %v1049_v40 = vadd.f32 0.5, %v1048_v5  ;;  %v1052_v20 = vmul.f32 0.5, %v4207_v28 }
 0x413   :  { %v1059_v33 = vmul.f32 %v4205_v27, %v1045_v6 }
 0x414   :  { %v1058_v47 = vmul.f32 %v1056_v8, %v1049_v40  ;;  %v1053_v21 = vadd.f32 0.5, %v1052_v20 }
 0x416   :  { %v4748_v15 = vadd.f32 %v1059_v33, %v1058_v47 }
 0x418   :  { %4208 = vtanh.f32 %v4748_v15  ;;  %v1243_v33 = vrot.slane %v4748_v15, 6 }
 0x422   :  { %v4209_v1 = vpop.eup %4208 }
 0x423   :  { %v1062_v9 = vmul.f32 %v4209_v1, %v1053_v21 }
 0x425   :  { %1063 = vst [vmem:[#allocation2] sm:$0xc0] %v1062_v9  ;;  %v1081_v0 = vrot.slane %v1062_v9, 6 }
 0x427   :  { %1148 = vmatmul.mubr.f32.vlgmr.msra.gmra.mrb[10].mxu0 %v1081_v0  ;;  %1219 = vmatmul.mubr.f32.vlgmr.msra.gmra.mrb[18].mxu1 %v1081_v0 }
 0x428   :  { %3741 = vmatpush1.bf16.msra.mxu0 %v4477_v19  ;;  %3773 = vmatpush1.bf16.msra.mxu1 %v4480_v22 }
 0x429   :  { %3743 = vmatprep.subr.bf16.mxu0 %v4485_v26  ;;  %3775 = vmatprep.subr.bf16.mxu1 %v4487_v30 }
 0x42a   :  { %1327 = vmatprep.mubr.f32.mxu0 %v5091_v2  ;;  %1398 = vmatprep.mubr.f32.mxu1 %v5091_v2 }
 0x42c   :  { %3745 = vmatpush1.bf16.msra.mxu0 %v4489_v31  ;;  %3777 = vmatpush1.bf16.msra.mxu1 %v4492_v34 }
 0x42d   :  { %3747 = vmatprep.subr.bf16.mxu0 %v4497_v38  ;;  %3779 = vmatprep.subr.bf16.mxu1 %v4499_v42 }
 0x430   :  { %3749 = vmatpush1.bf16.msra.mxu0 %v4501_v43  ;;  %3781 = vmatpush1.bf16.msra.mxu1 %v4504_v46 }
 0x431   :  { %3751 = vmatprep.subr.bf16.mxu0 %v4509_v50  ;;  %3783 = vmatprep.subr.bf16.mxu1 %v4511_v54 }
 0x434   :  { %3753 = vmatpush1.bf16.msra.mxu0 %v4513_v55  ;;  %3785 = vmatpush1.bf16.msra.mxu1 %v4516_v58 }
 0x435   :  { %3755 = vmatprep.subr.bf16.mxu0 %v4521_v62  ;;  %3787 = vmatprep.subr.bf16.mxu1 %v4523_v3 }
 0x438   :  { %3757 = vmatpush1.bf16.msra.mxu0 %v4525_v4  ;;  %3789 = vmatpush1.bf16.msra.mxu1 %v4528_v7 }
 0x439   :  { %3759 = vmatprep.subr.bf16.mxu0 %v4533_v11  ;;  %3791 = vmatprep.subr.bf16.mxu1 %v4535_v16 }
 0x43c   :  { %3761 = vmatpush1.bf16.msra.mxu0 %v4537_v17  ;;  %3793 = vmatpush1.bf16.msra.mxu1 %v4540_v24 }
 0x43d   :  { %3763 = vmatprep.subr.bf16.mxu0 %v4544_v29  ;;  %3795 = vmatprep.subr.bf16.mxu1 %v4546_v32 }
 0x440   :  { %3765 = vmatpush1.bf16.msra.mxu0 %v4549_v37  ;;  %3797 = vmatpush1.bf16.msra.mxu1 %v4553_v44 }
 0x441   :  { %3767 = vmatprep.subr.bf16.mxu0 %v4555_v45  ;;  %3799 = vmatprep.subr.bf16.mxu1 %v4557_v51 }
 0x444   :  { %3769 = vmatpush1.bf16.msra.mxu0 %v4560_v57  ;;  %3801 = vmatpush1.bf16.msra.mxu1 %v4564_v59 }
 0x445   :  { %3803 = vmatprep.subr.bf16.mxu0 %v4473_v14  ;;  %3835 = vmatprep.subr.bf16.mxu1 %v4475_v18 }
 0x4fa   :  { %v1149_v25 = vpop.f32.mrb[10].mxu0  ;;  %v1220_v61 = vpop.f32.mrb[18].mxu1 }
 0x4fb   :  { %v1225_v13 = vadd.f32 %v1149_v25, %v4585_v56  ;;  %v1151_v63 = vpop.f32.mrb[11].mxu0  ;;  %v1222_v35 = vpop.f32.mrb[19].mxu1  ;;  %v1227_v39 = vadd.f32 %v1220_v61, %v4606_v53 }
 0x4fc   :  { %v1226_v60 = vadd.f32 %v1151_v63, %v4593_v12  ;;  %v1228_v23 = vadd.f32 %v1222_v35, %v4610_v36 }
 0x4fd   :  { %v1229_v52 = vmul.f32 0.5, %v1225_v13  ;;  %v1237_v48 = vmul.f32 0.5, %v1227_v39  ;;  %v5093_v39 = vld [vmem:[#allocation13_spill] sm:$0xff] }
 0x4fe   :  { %v1233_v10 = vmul.f32 0.5, %v1226_v60 }
 0x4ff   :  { %4210 = vtanh.f32 %v1229_v52  ;;  %v5092_v52 = vld [vmem:[#allocation12_spill] sm:$0xff] }
 0x500   :  { %4212 = vtanh.f32 %v1233_v10 }
 0x501   :  { %4214 = vtanh.f32 %v1228_v23 }
 0x502   :  { %4216 = vtanh.f32 %v1237_v48 }
 0x509   :  { %v4211_v41 = vpop.eup %4210 }
 0x50a   :  { %v1231_v49 = vmul.f32 0.5, %v4211_v41  ;;  %v4213_v6 = vpop.eup %4212 }
 0x50b   :  { %v1235_v27 = vmul.f32 0.5, %v4213_v6  ;;  %v4215_v40 = vpop.eup %4214  ;;  %v5094_v6 = vld [vmem:[#allocation15_spill] sm:$0xff] }
 0x50c   :  { %v1232_v5 = vadd.f32 0.5, %v1231_v49  ;;  %v4217_v21 = vpop.eup %4216 }
 0x50d   :  { %v1236_v8 = vadd.f32 0.5, %v1235_v27  ;;  %v1239_v1 = vmul.f32 0.5, %v4217_v21 }
 0x50e   :  { %v1246_v47 = vmul.f32 %v4215_v40, %v1232_v5 }
 0x50f   :  { %v1245_v28 = vmul.f32 %v1243_v33, %v1236_v8  ;;  %v1240_v9 = vadd.f32 0.5, %v1239_v1 }
 0x511   :  { %v4790_v20 = vadd.f32 %v1246_v47, %v1245_v28 }
 0x513   :  { %4218 = vtanh.f32 %v4790_v20 }
 0x51d   :  { %v4219_v0 = vpop.eup %4218 }
 0x51e   :  { %v1249_v25 = vmul.f32 %v4219_v0, %v1240_v9  ;;  %v1435_v0 = vrot.slane %v4790_v20, 6 }
 0x520   :  { %1250 = vst [vmem:[#allocation2 + $0x8] sm:$0x3] %v1249_v25  ;;  %1328 = vmatmul.mubr.f32.vlgmr.msra.gmra.mrb[12].mxu0 %v1249_v25  ;;  %1399 = vmatmul.mubr.f32.vlgmr.msra.gmra.mrb[20].mxu1 %v1249_v25 }
 0x521   :  { %3805 = vmatpush1.bf16.msra.mxu0 %v4477_v19  ;;  %3837 = vmatpush1.bf16.msra.mxu1 %v4480_v22 }
 0x522   :  { %3807 = vmatprep.subr.bf16.mxu0 %v4485_v26  ;;  %3839 = vmatprep.subr.bf16.mxu1 %v4487_v30 }
 0x523   :  { %1510 = vmatprep.mubr.f32.mxu0 %v5091_v2  ;;  %1581 = vmatprep.mubr.f32.mxu1 %v5091_v2 }
 0x525   :  { %3809 = vmatpush1.bf16.msra.mxu0 %v4489_v31  ;;  %3841 = vmatpush1.bf16.msra.mxu1 %v4492_v34 }
 0x526   :  { %3811 = vmatprep.subr.bf16.mxu0 %v4497_v38  ;;  %3843 = vmatprep.subr.bf16.mxu1 %v4499_v42 }
 0x529   :  { %3813 = vmatpush1.bf16.msra.mxu0 %v4501_v43  ;;  %3845 = vmatpush1.bf16.msra.mxu1 %v4504_v46 }
 0x52a   :  { %3815 = vmatprep.subr.bf16.mxu0 %v4509_v50  ;;  %3847 = vmatprep.subr.bf16.mxu1 %v4511_v54 }
 0x52d   :  { %3817 = vmatpush1.bf16.msra.mxu0 %v4513_v55  ;;  %3849 = vmatpush1.bf16.msra.mxu1 %v4516_v58 }
 0x52e   :  { %3819 = vmatprep.subr.bf16.mxu0 %v4521_v62  ;;  %3851 = vmatprep.subr.bf16.mxu1 %v4523_v3 }
 0x531   :  { %3821 = vmatpush1.bf16.msra.mxu0 %v4525_v4  ;;  %3853 = vmatpush1.bf16.msra.mxu1 %v4528_v7 }
 0x532   :  { %3823 = vmatprep.subr.bf16.mxu0 %v4533_v11  ;;  %3855 = vmatprep.subr.bf16.mxu1 %v4535_v16 }
 0x535   :  { %3825 = vmatpush1.bf16.msra.mxu0 %v4537_v17  ;;  %3857 = vmatpush1.bf16.msra.mxu1 %v4540_v24 }
 0x536   :  { %3827 = vmatprep.subr.bf16.mxu0 %v4544_v29  ;;  %3859 = vmatprep.subr.bf16.mxu1 %v4546_v32 }
 0x539   :  { %3829 = vmatpush1.bf16.msra.mxu0 %v4549_v37  ;;  %3861 = vmatpush1.bf16.msra.mxu1 %v4553_v44 }
 0x53a   :  { %3831 = vmatprep.subr.bf16.mxu0 %v4555_v45  ;;  %3863 = vmatprep.subr.bf16.mxu1 %v4557_v51 }
 0x53d   :  { %3833 = vmatpush1.bf16.msra.mxu0 %v4560_v57  ;;  %3865 = vmatpush1.bf16.msra.mxu1 %v4564_v59 }
 0x53e   :  { %3867 = vmatprep.subr.bf16.mxu0 %v4473_v14  ;;  %3899 = vmatprep.subr.bf16.mxu1 %v4475_v18  ;;  %v5095_v14 = vld [vmem:[#allocation14_spill] sm:$0xff] }
 0x5f3   :  { %v1329_v15 = vpop.f32.mrb[12].mxu0  ;;  %v1400_v61 = vpop.f32.mrb[20].mxu1 }
 0x5f4   :  { %v1409_v13 = vrot.slane %v1329_v15, 6  ;;  %v1331_v63 = vpop.f32.mrb[13].mxu0  ;;  %v1402_v35 = vpop.f32.mrb[21].mxu1  ;;  %v1411_v27 = vrot.slane %v1400_v61, 6 }
 0x5f5   :  { %v1410_v60 = vrot.slane %v1331_v63, 6  ;;  %v1412_v23 = vrot.slane %v1402_v35, 6 }
 0x5f6   :  { %v1417_v10 = vadd.f32 %v1409_v13, %v5092_v52  ;;  %v1419_v18 = vadd.f32 %v1411_v27, %v5095_v14  ;;  %v1820_v27 = vld [vmem:[#allocation5 + $0x2a8] sm:$0xff] }
 0x5f7   :  { %v1418_v48 = vadd.f32 %v1410_v60, %v5093_v39  ;;  %v1420_v5 = vadd.f32 %v1412_v23, %v5094_v6 }
 0x5f8   :  { %v1421_v41 = vmul.f32 0.5, %v1417_v10  ;;  %v1429_v40 = vmul.f32 0.5, %v1419_v18 }
 0x5f9   :  { %v1425_v49 = vmul.f32 0.5, %v1418_v48  ;;  %v1815_v48 = vld [vmem:[#allocation5 + $0x280] sm:$0xff] }
 0x5fa   :  { %4220 = vtanh.f32 %v1421_v41 }
 0x5fb   :  { %4222 = vtanh.f32 %v1425_v49  ;;  %v1813_v49 = vld [vmem:[#allocation5 + $0x270] sm:$0xff] }
 0x5fc   :  { %4224 = vtanh.f32 %v1420_v5  ;;  %v1817_v5 = vld [vmem:[#allocation5 + $0x290] sm:$0xff] }
 0x5fd   :  { %4226 = vtanh.f32 %v1429_v40  ;;  %v1824_v40 = vld [vmem:[#allocation5 + $0x2c8] sm:$0xff] }
 0x604   :  { %v4221_v8 = vpop.eup %4220 }
 0x605   :  { %v1423_v33 = vmul.f32 0.5, %v4221_v8  ;;  %v4223_v47 = vpop.eup %4222  ;;  %v1822_v8 = vld [vmem:[#allocation5 + $0x2b8] sm:$0xff] }
 0x606   :  { %v1427_v21 = vmul.f32 0.5, %v4223_v47  ;;  %v4225_v1 = vpop.eup %4224 }
 0x607   :  { %v1424_v28 = vadd.f32 0.5, %v1423_v33  ;;  %v4227_v61 = vpop.eup %4226  ;;  %v1826_v33 = vld [vmem:[#allocation5 + $0x2d8] sm:$0xff] }
 0x608   :  { %v1428_v9 = vadd.f32 0.5, %v1427_v21  ;;  %v1431_v63 = vmul.f32 0.5, %v4227_v61  ;;  %v3964_v21 = vpack.c.bf16 %v1817_v5, %v1813_v49  ;;  %v1825_v61 = vld [vmem:[#allocation5 + $0x2d0] sm:$0xff]  ;;  %v1851_v5 = vld [vmem:[#allocation5 + $0x3a0] sm:$0xff] }
 0x609   :  { %v1438_v25 = vmul.f32 %v4225_v1, %v1424_v28  ;;  %v1819_v1 = vld [vmem:[#allocation5 + $0x2a0] sm:$0xff] }
 0x60a   :  { %v1437_v15 = vmul.f32 %v1435_v0, %v1428_v9  ;;  %v1432_v35 = vadd.f32 0.5, %v1431_v63  ;;  %v1823_v9 = vld [vmem:[#allocation5 + $0x2c0] sm:$0xff]  ;;  %v1828_v63 = vld [vmem:[#allocation5 + $0x2e8] sm:$0xff] }
 0x60c   :  { %v4832_v13 = vadd.f32 %v1438_v25, %v1437_v15  ;;  %v3934_v25 = vpack.c.bf16 %v1824_v40, %v1820_v27  ;;  %v3966_v15 = vpack.c.bf16 %v1826_v33, %v1822_v8  ;;  %v1855_v27 = vld [vmem:[#allocation5 + $0x3c0] sm:$0xff]  ;;  %v1853_v8 = vld [vmem:[#allocation5 + $0x3b0] sm:$0xff] }
 0x60d   :  { %v1857_v33 = vld [vmem:[#allocation5 + $0x3d0] sm:$0xff] }
 0x60e   :  { %4228 = vtanh.f32 %v4832_v13 }
 0x618   :  { %v4229_v60 = vpop.eup %4228 }
 0x619   :  { %v1441_v10 = vmul.f32 %v4229_v60, %v1432_v35  ;;  %v1832_v35 = vld [vmem:[#allocation5 + $0x308] sm:$0xff]  ;;  %v1830_v60 = vld [vmem:[#allocation5 + $0x2f8] sm:$0xff] }
 0x61b   :  { %1442 = vst [vmem:[#allocation2 + $0x8] sm:$0xc] %v1441_v10  ;;  %v1444_v23 = vrot.slane %v1441_v10, 2  ;;  %v1834_v10 = vld [vmem:[#allocation5 + $0x318] sm:$0xff] }
 0x61d   :  { %1511 = vmatmul.mubr.f32.vlgmr.msra.gmra.mrb[14].mxu0 %v1444_v23  ;;  %1582 = vmatmul.mubr.f32.vlgmr.msra.gmra.mrb[22].mxu1 %v1444_v23  ;;  %v3936_v23 = vpack.c.bf16 %v1823_v9, %v1819_v1  ;;  %v1866_v1 = vld [vmem:[#allocation5 + $0x418] sm:$0xff]  ;;  %v3952_v9 = vpack.c.bf16 %v1855_v27, %v1851_v5 }
 0x61e   :  { %3869 = vmatpush1.bf16.msra.mxu0 %v4477_v19  ;;  %3901 = vmatpush1.bf16.msra.mxu1 %v4480_v22  ;;  %v1812_v19 = vld [vmem:[#allocation5 + $0x268] sm:$0xff] }
 0x61f   :  { %3871 = vmatprep.subr.bf16.mxu0 %v4485_v26  ;;  %3903 = vmatprep.subr.bf16.mxu1 %v4487_v30  ;;  %v1816_v22 = vld [vmem:[#allocation5 + $0x288] sm:$0xff]  ;;  %v1814_v26 = vld [vmem:[#allocation5 + $0x278] sm:$0xff] }
 0x620   :  { %1693 = vmatprep.mubr.f32.mxu0 %v5091_v2  ;;  %1764 = vmatprep.mubr.f32.mxu1 %v5091_v2  ;;  %v3930_v30 = vpack.c.bf16 %v1816_v22, %v1812_v19  ;;  %v1827_v22 = vld [vmem:[#allocation5 + $0x2e0] sm:$0xff] }
 0x622   :  { %3873 = vmatpush1.bf16.msra.mxu0 %v4489_v31  ;;  %3905 = vmatpush1.bf16.msra.mxu1 %v4492_v34  ;;  %v1818_v31 = vld [vmem:[#allocation5 + $0x298] sm:$0xff] }
 0x623   :  { %3875 = vmatprep.subr.bf16.mxu0 %v4497_v38  ;;  %3907 = vmatprep.subr.bf16.mxu1 %v4499_v42  ;;  %v3962_v34 = vpack.c.bf16 %v1818_v31, %v1814_v26  ;;  %v1831_v26 = vld [vmem:[#allocation5 + $0x300] sm:$0xff]  ;;  %v3970_v31 = vpack.c.bf16 %v1834_v10, %v1830_v60  ;;  %v1868_v60 = vld [vmem:[#allocation5 + $0x428] sm:$0xff] }
 0x624   :  { %v1872_v10 = vld [vmem:[#allocation5 + $0x448] sm:$0xff] }
 0x626   :  { %3877 = vmatpush1.bf16.msra.mxu0 %v4501_v43  ;;  %3909 = vmatpush1.bf16.msra.mxu1 %v4504_v46 }
 0x627   :  { %3879 = vmatprep.subr.bf16.mxu0 %v4509_v50  ;;  %3911 = vmatprep.subr.bf16.mxu1 %v4511_v54 }
 0x62a   :  { %3881 = vmatpush1.bf16.msra.mxu0 %v4513_v55  ;;  %3913 = vmatpush1.bf16.msra.mxu1 %v4516_v58 }
 0x62b   :  { %3883 = vmatprep.subr.bf16.mxu0 %v4521_v62  ;;  %3915 = vmatprep.subr.bf16.mxu1 %v4523_v3 }
 0x62e   :  { %3885 = vmatpush1.bf16.msra.mxu0 %v4525_v4  ;;  %3917 = vmatpush1.bf16.msra.mxu1 %v4528_v7 }
 0x62f   :  { %3887 = vmatprep.subr.bf16.mxu0 %v4533_v11  ;;  %3919 = vmatprep.subr.bf16.mxu1 %v4535_v16 }
 0x632   :  { %3889 = vmatpush1.bf16.msra.mxu0 %v4537_v17  ;;  %3921 = vmatpush1.bf16.msra.mxu1 %v4540_v24 }
 0x633   :  { %3891 = vmatprep.subr.bf16.mxu0 %v4544_v29  ;;  %3923 = vmatprep.subr.bf16.mxu1 %v4546_v32 }
 0x636   :  { %3893 = vmatpush1.bf16.msra.mxu0 %v4549_v37  ;;  %3925 = vmatpush1.bf16.msra.mxu1 %v4553_v44 }
 0x637   :  { %3895 = vmatprep.subr.bf16.mxu0 %v4555_v45  ;;  %3927 = vmatprep.subr.bf16.mxu1 %v4557_v51 }
 0x63a   :  { %3897 = vmatpush1.bf16.msra.mxu0 %v4560_v57  ;;  %3929 = vmatpush1.bf16.msra.mxu1 %v4564_v59  ;;  %v1618_v57 = vrot.slane %v4832_v13, 6  ;;  %v1821_v13 = vld [vmem:[#allocation5 + $0x2b0] sm:$0xff] }
 0x63b   :  { %3931 = vmatprep.subr.bf16.mxu0 %v3930_v30  ;;  %3963 = vmatprep.subr.bf16.mxu1 %v3962_v34  ;;  %v3968_v19 = vpack.c.bf16 %v1825_v61, %v1821_v13  ;;  %v3938_v30 = vpack.c.bf16 %v1832_v35, %v1828_v63  ;;  %v1829_v34 = vld [vmem:[#allocation5 + $0x2f0] sm:$0xff] }
 0x63c   :  { %v1861_v63 = vld [vmem:[#allocation5 + $0x3f0] sm:$0xff] }
 0x63d   :  { %v1865_v35 = vld [vmem:[#allocation5 + $0x410] sm:$0xff] }
 0x6f0   :  { %v1512_v38 = vpop.f32.mrb[14].mxu0  ;;  %v1583_v42 = vpop.f32.mrb[22].mxu1 }
 0x6f1   :  { %v1592_v43 = vrot.slane %v1512_v38, 4  ;;  %v1514_v46 = vpop.f32.mrb[15].mxu0  ;;  %v1585_v50 = vpop.f32.mrb[23].mxu1  ;;  %v1594_v11 = vrot.slane %v1583_v42, 4  ;;  %v1833_v38 = vld [vmem:[#allocation5 + $0x310] sm:$0xff]  ;;  %v1836_v42 = vld [vmem:[#allocation5 + $0x328] sm:$0xff] }
 0x6f2   :  { %v1593_v54 = vrot.slane %v1514_v46, 4  ;;  %v1595_v58 = vrot.slane %v1585_v50, 4  ;;  %v1838_v46 = vld [vmem:[#allocation5 + $0x338] sm:$0xff] }
 0x6f3   :  { %v1600_v55 = vadd.f32 %v1592_v43, %v4585_v56  ;;  %v1602_v16 = vadd.f32 %v1594_v11, %v4606_v53  ;;  %v1811_v53 = vld [vmem:[#allocation5 + $0x260] sm:$0xff]  ;;  %v1840_v43 = vld [vmem:[#allocation5 + $0x348] sm:$0xff]  ;;  %v1842_v50 = vld [vmem:[#allocation5 + $0x358] sm:$0xff] }
 0x6f4   :  { %v1601_v62 = vadd.f32 %v1593_v54, %v4593_v12  ;;  %v1603_v7 = vadd.f32 %v1595_v58, %v4610_v36  ;;  %v3932_v28 = vpack.c.bf16 %v1815_v48, %v1811_v53  ;;  %v3940_v54 = vpack.c.bf16 %v1831_v26, %v1827_v22  ;;  %v1835_v58 = vld [vmem:[#allocation5 + $0x320] sm:$0xff]  ;;  %v1841_v11 = vld [vmem:[#allocation5 + $0x350] sm:$0xff]  ;;  %v1854_v53 = vld [vmem:[#allocation5 + $0x3b8] sm:$0xff] }
 0x6f5   :  { %v1604_v3 = vmul.f32 0.5, %v1600_v55  ;;  %v1612_v17 = vmul.f32 0.5, %v1602_v16  ;;  %v3972_v55 = vpack.c.bf16 %v1833_v38, %v1829_v34  ;;  %v1844_v16 = vld [vmem:[#allocation5 + $0x368] sm:$0xff]  ;;  %v1858_v48 = vld [vmem:[#allocation5 + $0x3d8] sm:$0xff]  ;;  %v3988_v26 = vpack.c.bf16 %v1865_v35, %v1861_v63  ;;  %v1871_v38 = vld [vmem:[#allocation5 + $0x440] sm:$0xff] }
 0x6f6   :  { %v1608_v4 = vmul.f32 0.5, %v1601_v62  ;;  %v1839_v62 = vld [vmem:[#allocation5 + $0x340] sm:$0xff]  ;;  %v3982_v40 = vpack.c.bf16 %v1858_v48, %v1854_v53 }
 0x6f7   :  { %4230 = vtanh.f32 %v1604_v3  ;;  %v3942_v3 = vpack.c.bf16 %v1840_v43, %v1836_v42  ;;  %v1869_v42 = vld [vmem:[#allocation5 + $0x430] sm:$0xff] }
 0x6f8   :  { %4232 = vtanh.f32 %v1608_v4  ;;  %v3974_v4 = vpack.c.bf16 %v1842_v50, %v1838_v46  ;;  %v1873_v43 = vld [vmem:[#allocation5 + $0x450] sm:$0xff] }
 0x6f9   :  { %4234 = vtanh.f32 %v1603_v7  ;;  %v1837_v7 = vld [vmem:[#allocation5 + $0x330] sm:$0xff]  ;;  %v3992_v50 = vpack.c.bf16 %v1873_v43, %v1869_v42  ;;  %v2034_v42 = vld [vmem:[#allocation5 + $0x4a8] sm:$0xff] }
 0x6fa   :  { %4236 = vtanh.f32 %v1612_v17  ;;  %v1848_v17 = vld [vmem:[#allocation5 + $0x388] sm:$0xff] }
 0x701   :  { %v4231_v24 = vpop.eup %4230 }
 0x702   :  { %v1606_v29 = vmul.f32 0.5, %v4231_v24  ;;  %v4233_v32 = vpop.eup %4232  ;;  %v1846_v24 = vld [vmem:[#allocation5 + $0x378] sm:$0xff] }
 0x703   :  { %v1610_v44 = vmul.f32 0.5, %v4233_v32  ;;  %v4235_v45 = vpop.eup %4234  ;;  %v3944_v32 = vpack.c.bf16 %v1839_v62, %v1835_v58 }
 0x704   :  { %v1607_v37 = vadd.f32 0.5, %v1606_v29  ;;  %v4237_v36 = vpop.eup %4236  ;;  %v1850_v29 = vld [vmem:[#allocation5 + $0x398] sm:$0xff] }
 0x705   :  { %v1611_v51 = vadd.f32 0.5, %v1610_v44  ;;  %v1614_v20 = vmul.f32 0.5, %v4237_v36  ;;  %v1843_v44 = vld [vmem:[#allocation5 + $0x360] sm:$0xff]  ;;  %v1852_v36 = vld [vmem:[#allocation5 + $0x3a8] sm:$0xff] }
 0x706   :  { %v1621_v59 = vmul.f32 %v4235_v45, %v1607_v37  ;;  %v3976_v37 = vpack.c.bf16 %v1841_v11, %v1837_v7  ;;  %v1847_v45 = vld [vmem:[#allocation5 + $0x380] sm:$0xff] }
 0x707   :  { %v1620_v56 = vmul.f32 %v1618_v57, %v1611_v51  ;;  %v1615_v41 = vadd.f32 0.5, %v1614_v20  ;;  %v3946_v51 = vpack.c.bf16 %v1848_v17, %v1844_v16  ;;  %v3978_v57 = vpack.c.bf16 %v1850_v29, %v1846_v24  ;;  %v1856_v20 = vld [vmem:[#allocation5 + $0x3c8] sm:$0xff] }
 0x709   :  { %v4872_v12 = vadd.f32 %v1621_v59, %v1620_v56  ;;  %v1845_v59 = vld [vmem:[#allocation5 + $0x370] sm:$0xff] }
 0x70a   :  { %v1849_v56 = vld [vmem:[#allocation5 + $0x390] sm:$0xff] }
 0x70b   :  { %4238 = vtanh.f32 %v4872_v12  ;;  %v3980_v49 = vpack.c.bf16 %v1849_v56, %v1845_v59 }
 0x715   :  { %v4239_v18 = vpop.eup %4238 }
 0x716   :  { %v1624_v47 = vmul.f32 %v4239_v18, %v1615_v41  ;;  %v3948_v41 = vpack.c.bf16 %v1847_v45, %v1843_v44  ;;  %v3950_v18 = vpack.c.bf16 %v1856_v20, %v1852_v36 }
 0x718   :  { %1625 = vst [vmem:[#allocation2 + $0x8] sm:$0x30] %v1624_v47  ;;  %v1627_v0 = vrot.slane %v1624_v47, 4  ;;  %v1860_v47 = vld [vmem:[#allocation5 + $0x3e8] sm:$0xff] }
 0x71a   :  { %1694 = vmatmul.mubr.f32.vlgmr.msra.gmra.mrb[16].mxu0 %v1627_v0  ;;  %1765 = vmatmul.mubr.f32.vlgmr.msra.gmra.mrb[24].mxu1 %v1627_v0  ;;  %v3984_v0 = vpack.c.bf16 %v1857_v33, %v1853_v8 }
 0x71b   :  { %3933 = vmatpush1.bf16.msra.mxu0 %v3932_v28  ;;  %3965 = vmatpush1.bf16.msra.mxu1 %v3964_v21  ;;  %v1864_v28 = vld [vmem:[#allocation5 + $0x408] sm:$0xff]  ;;  %v1862_v21 = vld [vmem:[#allocation5 + $0x3f8] sm:$0xff] }
 0x71c   :  { %3935 = vmatprep.subr.bf16.mxu0 %v3934_v25  ;;  %3967 = vmatprep.subr.bf16.mxu1 %v3966_v15  ;;  %v1859_v25 = vld [vmem:[#allocation5 + $0x3e0] sm:$0xff]  ;;  %v3954_v13 = vpack.c.bf16 %v1864_v28, %v1860_v47  ;;  %v3986_v61 = vpack.c.bf16 %v1866_v1, %v1862_v21  ;;  %v5096_v1 = vld [vmem:[#allocation10_spill] sm:$0xff] }
 0x71d   :  { %1939 = vmatprep.mubr.f32.mxu0 %v5091_v2  ;;  %2016 = vmatprep.mubr.f32.mxu1 %v5091_v2  ;;  %v1863_v15 = vld [vmem:[#allocation5 + $0x400] sm:$0xff] }
 0x71e   :  { %v3956_v22 = vpack.c.bf16 %v1863_v15, %v1859_v25 }
 0x71f   :  { %3937 = vmatpush1.bf16.msra.mxu0 %v3936_v23  ;;  %3969 = vmatpush1.bf16.msra.mxu1 %v3968_v19  ;;  %v1870_v23 = vld [vmem:[#allocation5 + $0x438] sm:$0xff] }
 0x720   :  { %3939 = vmatprep.subr.bf16.mxu0 %v3938_v30  ;;  %3971 = vmatprep.subr.bf16.mxu1 %v3970_v31  ;;  %v1874_v19 = vld [vmem:[#allocation5 + $0x458] sm:$0xff]  ;;  %v1867_v30 = vld [vmem:[#allocation5 + $0x420] sm:$0xff]  ;;  %v3958_v31 = vpack.c.bf16 %v1872_v10, %v1868_v60 }
 0x721   :  { %v3990_v34 = vpack.c.bf16 %v1874_v19, %v1870_v23  ;;  %v3960_v46 = vpack.c.bf16 %v1871_v38, %v1867_v30  ;;  %v2032_v38 = vld [vmem:[#allocation5 + $0x488] sm:$0xff] }
 0x723   :  { %3941 = vmatpush1.bf16.msra.mxu0 %v3940_v54  ;;  %3973 = vmatpush1.bf16.msra.mxu1 %v3972_v55  ;;  %v1809_v54 = vld [vmem:[#allocation2] sm:$0xff] }
 0x724   :  { %3943 = vmatprep.subr.bf16.mxu0 %v3942_v3  ;;  %3975 = vmatprep.subr.bf16.mxu1 %v3974_v4 }
 0x727   :  { %3945 = vmatpush1.bf16.msra.mxu0 %v3944_v32  ;;  %3977 = vmatpush1.bf16.msra.mxu1 %v3976_v37 }
 0x728   :  { %3947 = vmatprep.subr.bf16.mxu0 %v3946_v51  ;;  %3979 = vmatprep.subr.bf16.mxu1 %v3978_v57 }
 0x72b   :  { %3949 = vmatpush1.bf16.msra.mxu0 %v3948_v41  ;;  %3981 = vmatpush1.bf16.msra.mxu1 %v3980_v49 }
 0x72c   :  { %3951 = vmatprep.subr.bf16.mxu0 %v3950_v18  ;;  %3983 = vmatprep.subr.bf16.mxu1 %v3982_v40 }
 0x72f   :  { %3953 = vmatpush1.bf16.msra.mxu0 %v3952_v9  ;;  %3985 = vmatpush1.bf16.msra.mxu1 %v3984_v0  ;;  %v5097_v0 = vld [vmem:[#allocation11_spill] sm:$0xff] }
 0x730   :  { %3955 = vmatprep.subr.bf16.mxu0 %v3954_v13  ;;  %3987 = vmatprep.subr.bf16.mxu1 %v3986_v61 }
 0x733   :  { %3957 = vmatpush1.bf16.msra.mxu0 %v3956_v22  ;;  %3989 = vmatpush1.bf16.msra.mxu1 %v3988_v26 }
 0x734   :  { %3959 = vmatprep.subr.bf16.mxu0 %v3958_v31  ;;  %3991 = vmatprep.subr.bf16.mxu1 %v3990_v34 }
 0x737   :  { %3961 = vmatpush1.bf16.msra.mxu0 %v3960_v46  ;;  %3993 = vmatpush1.bf16.msra.mxu1 %v3992_v50 }
 0x73a   :  { %1940 = vmatmul.mubr.f32.vlgmr.msra.gmra.mrb[18].mxu0 %v1809_v54  ;;  %2017 = vmatmul.mubr.f32.vlgmr.msra.gmra.mrb[26].mxu1 %v1809_v54  ;;  %v2031_v54 = vld [vmem:[#allocation5 + $0x480] sm:$0xff] }
 0x73b   :  { %1945 = vmatprep.mubr.f32.mxu0 %v5091_v2  ;;  %2022 = vmatprep.mubr.f32.mxu1 %v5091_v2 }
 0x7ed   :  { %v1695_v55 = vpop.f32.mrb[16].mxu0  ;;  %v1766_v58 = vpop.f32.mrb[24].mxu1 }
 0x7ee   :  { %v1775_v62 = vrot.slane %v1695_v55, 2  ;;  %v1697_v3 = vpop.f32.mrb[17].mxu0  ;;  %v1768_v4 = vpop.f32.mrb[25].mxu1  ;;  %v1777_v37 = vrot.slane %v1766_v58, 2  ;;  %v2033_v55 = vld [vmem:[#allocation5 + $0x4a0] sm:$0xff] }
 0x7ef   :  { %v1776_v7 = vrot.slane %v1697_v3, 2  ;;  %v1778_v16 = vrot.slane %v1768_v4, 2 }
 0x7f0   :  { %v1783_v11 = vadd.f32 %v1775_v62, %v5092_v52  ;;  %v1785_v44 = vadd.f32 %v1777_v37, %v5095_v14 }
 0x7f1   :  { %v1784_v17 = vadd.f32 %v1776_v7, %v5093_v39  ;;  %v1786_v32 = vadd.f32 %v1778_v16, %v5094_v6  ;;  %v1801_v39 = vrot.slane %v4872_v12, 6  ;;  %v2030_v12 = vld [vmem:[#allocation5 + $0x460] ss:$8 sm:$0x3]  ;;  %v4899_v7 = vpack.c.bf16 %v2034_v42, %v2032_v38 }
 0x7f2   :  { %v1787_v24 = vmul.f32 0.5, %v1783_v11  ;;  %v1795_v45 = vmul.f32 0.5, %v1785_v44  ;;  %v4887_v9 = vrot.slane %v2030_v12, %v5096_v1  ;;  %v2063_v25 = vrot.slane %v2030_v12, %v5097_v0  ;;  %v2035_v44 = vld [vmem:[#allocation5 + $0x4c0] sm:$0xff] }
 0x7f3   :  { %v1791_v29 = vmul.f32 0.5, %v1784_v17  ;;  %v4901_v11 = vpack.c.bf16 %v2033_v55, %v2031_v54  ;;  %v2036_v17 = vld [vmem:[#allocation5 + $0x4c8] sm:$0xff]  ;;  %3995 = vmatprep.subr.bf16.mxu0 %v4899_v7  ;;  %4011 = vmatprep.subr.bf16.mxu1 %v4899_v7 }
 0x7f4   :  { %4240 = vtanh.f32 %v1787_v24  ;;  %v2038_v24 = vld [vmem:[#allocation5 + $0x4e8] sm:$0xff] }
 0x7f5   :  { %4242 = vtanh.f32 %v1791_v29  ;;  %v4913_v37 = vpack.c.bf16 %v2038_v24, %v2036_v17  ;;  %3997 = vmatpush1.bf16.msra.mxu0 %v4901_v11  ;;  %4013 = vmatpush1.bf16.msra.mxu1 %v4901_v11 }
 0x7f6   :  { %4244 = vtanh.f32 %v1786_v32 }
 0x7f7   :  { %4246 = vtanh.f32 %v1795_v45  ;;  %v2037_v45 = vld [vmem:[#allocation5 + $0x4e0] sm:$0xff]  ;;  %3999 = vmatprep.subr.bf16.mxu0 %v4913_v37  ;;  %4015 = vmatprep.subr.bf16.mxu1 %v4913_v37 }
 0x7fe   :  { %v4241_v51 = vpop.eup %4240 }
 0x7ff   :  { %v1789_v57 = vmul.f32 0.5, %v4241_v51  ;;  %v4243_v59 = vpop.eup %4242 }
 0x800   :  { %v1793_v52 = vmul.f32 0.5, %v4243_v59  ;;  %v4245_v36 = vpop.eup %4244  ;;  %v2040_v59 = vld [vmem:[#allocation5 + $0x508] sm:$0xff] }
 0x801   :  { %v1790_v56 = vadd.f32 0.5, %v1789_v57  ;;  %v4247_v6 = vpop.eup %4246  ;;  %v4919_v57 = vpack.c.bf16 %v2037_v45, %v2035_v44 }
 0x802   :  { %v1794_v20 = vadd.f32 0.5, %v1793_v52  ;;  %v1797_v27 = vmul.f32 0.5, %v4247_v6  ;;  %v2043_v6 = vld [vmem:[#allocation5 + $0x540] sm:$0xff] }
 0x803   :  { %v1804_v53 = vmul.f32 %v4245_v36, %v1790_v56  ;;  %v2042_v56 = vld [vmem:[#allocation5 + $0x528] sm:$0xff]  ;;  %v2039_v36 = vld [vmem:[#allocation5 + $0x500] sm:$0xff]  ;;  %4001 = vmatpush1.bf16.msra.mxu0 %v4919_v57  ;;  %4017 = vmatpush1.bf16.msra.mxu1 %v4919_v57 }
 0x804   :  { %v1803_v48 = vmul.f32 %v1801_v39, %v1794_v20  ;;  %v1798_v40 = vadd.f32 0.5, %v1797_v27  ;;  %v4924_v52 = vpack.c.bf16 %v2042_v56, %v2040_v59  ;;  %v2041_v20 = vld [vmem:[#allocation5 + $0x520] sm:$0xff] }
 0x805   :  { %v4927_v39 = vpack.c.bf16 %v2041_v20, %v2039_v36 }
 0x806   :  { %v1805_v41 = vadd.f32 %v1804_v53, %v1803_v48  ;;  %4003 = vmatprep.subr.bf16.mxu0 %v4924_v52  ;;  %4019 = vmatprep.subr.bf16.mxu1 %v4924_v52  ;;  %v2044_v53 = vld [vmem:[#allocation5 + $0x548] sm:$0xff] }
 0x807   :  { %v2046_v48 = vld [vmem:[#allocation5 + $0x568] sm:$0xff]  ;;  %4005 = vmatpush1.bf16.msra.mxu0 %v4927_v39  ;;  %4021 = vmatpush1.bf16.msra.mxu1 %v4927_v39 }
 0x808   :  { %4248 = vtanh.f32 %v1805_v41  ;;  %v4932_v41 = vpack.c.bf16 %v2046_v48, %v2044_v53 }
 0x80a   :  { %4007 = vmatprep.subr.bf16.mxu0 %v4932_v41  ;;  %4023 = vmatprep.subr.bf16.mxu1 %v4932_v41 }
 0x80d   :  { %v1941_v49 = vpop.f32.mrb[18].mxu0  ;;  %v2018_v5 = vpop.f32.mrb[26].mxu1 }
 0x80e   :  { %v1943_v14 = vpop.f32.mrb[19].mxu0  ;;  %v2020_v18 = vpop.f32.mrb[27].mxu1  ;;  %v2049_v28 = vrot.slane %v2018_v5, 2  ;;  %v2084_v21 = vrot.slane %v2018_v5, 6 }
 0x80f   :  { %v2050_v15 = vrot.slane %v2020_v18, 2  ;;  %v2085_v13 = vrot.slane %v2020_v18, 6 }
 0x812   :  { %v4249_v8 = vpop.eup %4248 }
 0x813   :  { %v1807_v33 = vmul.f32 %v4249_v8, %v1798_v40 }
 0x815   :  { %1808 = vst [vmem:[#allocation2 + $0x8] sm:$0xc0] %v1807_v33 }
 0x81c   :  { %v1810_v47 = vld [vmem:[#allocation2 + $0x8] sm:$0xff] }
 0x81d   :  { %1946 = vmatmul.mubr.f32.gmra.mrb[20].mxu0 %v1810_v47  ;;  %2023 = vmatmul.mubr.f32.gmra.mrb[28].mxu1 %v1810_v47 }
 0x81e   :  { %2161 = vmatprep.mubr.f32.mxu0 %v5091_v2  ;;  %2275 = vmatprep.mubr.f32.mxu1 %v5091_v2 }
 0x8f0   :  { %v1947_v61 = vpop.f32.mrb[20].mxu0  ;;  %v2024_v63 = vpop.f32.mrb[28].mxu1 }
 0x8f1   :  { %v4890_v35 = vadd.f32 %v2049_v28, %v1947_v61  ;;  %v2088_v60 = vadd.f32 %v2084_v21, %v1947_v61  ;;  %v2427_v10 = vrot.slane %v2024_v63, 2  ;;  %v2546_v23 = vrot.slane %v2024_v63, 6  ;;  %v1949_v19 = vpop.f32.mrb[21].mxu0  ;;  %v2026_v22 = vpop.f32.mrb[29].mxu1 }
 0x8f2   :  { %v2054_v26 = vadd.f32 %v2050_v15, %v1949_v19  ;;  %v2089_v30 = vadd.f32 %v2085_v13, %v1949_v19  ;;  %v2428_v31 = vrot.slane %v2026_v22, 2  ;;  %v2547_v34 = vrot.slane %v2026_v22, 6 }
 0x8f3   :  { %v4893_v43 = vadd.f32 %v2088_v60, %v4887_v9  ;;  %v2431_v46 = vadd.f32 %v2427_v10, %v1941_v49  ;;  %v2550_v50 = vadd.f32 %v2546_v23, %v1941_v49  ;;  %v2045_v49 = vld [vmem:[#allocation5 + $0x560] sm:$0xff] }
 0x8f4   :  { %v4895_v58 = vadd.f32 %v2063_v25, %v2054_v26  ;;  %v4897_v62 = vadd.f32 %v2089_v30, %v2063_v25  ;;  %v2432_v3 = vadd.f32 %v2428_v31, %v1943_v14  ;;  %v2551_v4 = vadd.f32 %v2547_v34, %v1943_v14 }
 0x8f5   :  { %v4904_v16 = vadd.f32 %v2431_v46, %v4887_v9  ;;  %v4910_v32 = vadd.f32 %v2550_v50, %v4887_v9  ;;  %v4935_v27 = vpack.c.bf16 %v2045_v49, %v2043_v6  ;;  %v4947_v14 = vadd.f32 %v4887_v9, %v4890_v35 }
 0x8f6   :  { %4250 = vtanh.f32 %v4895_v58  ;;  %v4907_v29 = vadd.f32 %v2432_v3, %v2063_v25  ;;  %v4916_v51 = vadd.f32 %v2551_v4, %v2063_v25  ;;  %v2072_v40 = vmul.f32 0.5, %v4895_v58 }
 0x8f7   :  { %4009 = vmatpush1.bf16.msra.mxu0 %v4935_v27  ;;  %4025 = vmatpush1.bf16.msra.mxu1 %v4935_v27  ;;  %v2068_v18 = vmul.f32 0.5, %v4947_v14 }
 0x8f8   :  { %4027 = vmatprep.subr.bf16.mxu0 %v4899_v7  ;;  %4043 = vmatprep.subr.bf16.mxu1 %v4899_v7 }
 0x8f9   :  { %4252 = vtanh.f32 %v2068_v18 }
 0x8fa   :  { %4254 = vtanh.f32 %v2072_v40 }
 0x900   :  { %v4251_v5 = vpop.eup %4250 }
 0x901   :  { %2078 = vrot.lane.b32.xlu0 %v4251_v5, %s4385_s0 }
 0x903   :  { %v4253_v8 = vpop.eup %4252 }
 0x904   :  { %v2070_v33 = vmul.f32 0.5, %v4253_v8  ;;  %v4255_v25 = vpop.eup %4254 }
 0x905   :  { %v2074_v15 = vmul.f32 0.5, %v4255_v25 }
 0x906   :  { %v2071_v47 = vadd.f32 0.5, %v2070_v33 }
 0x907   :  { %v2075_v13 = vadd.f32 0.5, %v2074_v15 }
 0x973   :  { %v2079_v12 = vpop.permute.xlu0 %2078 }
 0x974   :  { %v2081_v28 = vmul.f32 %v2079_v12, %v2071_v47 }
 0x976   :  { %4256 = vtanh.f32 %v2081_v28  ;;  %v2186_v21 = vrot.slane %v2081_v28, 2 }
 0x978   :  { %2187 = vrot.lane.b32.xlu1 %v2186_v21, %s4385_s0 }
 0x980   :  { %v4257_v9 = vpop.eup %4256 }
 0x981   :  { %v2083_v61 = vmul.f32 %v4257_v9, %v2075_v13 }
 0x983   :  { %v2093_v63 = vrot.slane %v2083_v61, 6 }
 0x985   :  { %3411 = vmatmul.mubr.msk.f32.vlgmr.msra.gmra.mrb[22].mxu0 %vm2094_vm2, %v2093_v63 }
 0x986   :  { %4029 = vmatpush1.bf16.msra.mxu0 %v4901_v11  ;;  %2387 = vmatprep.mubr.f32.mxu0 %v5091_v2 }
 0x987   :  { %4031 = vmatprep.subr.bf16.mxu0 %v4913_v37 }
 0x98a   :  { %4033 = vmatpush1.bf16.msra.mxu0 %v4919_v57 }
 0x98b   :  { %4035 = vmatprep.subr.bf16.mxu0 %v4924_v52 }
 0x98e   :  { %4037 = vmatpush1.bf16.msra.mxu0 %v4927_v39 }
 0x98f   :  { %4039 = vmatprep.subr.bf16.mxu0 %v4932_v41 }
 0x992   :  { %4041 = vmatpush1.bf16.msra.mxu0 %v4935_v27 }
 0x993   :  { %4059 = vmatprep.subr.bf16.mxu0 %v4899_v7 }
 0x9ea   :  { %v2188_v50 = vpop.permute.xlu1 %2187 }
 0xa58   :  { %v2163_v35 = vpop.f32.mrb[22].mxu0 }
 0xa59   :  { %v2165_v60 = vpop.f32.mrb[23].mxu0  ;;  %v2170_v22 = vrot.slane %v2163_v35, 4 }
 0xa5a   :  { %v2171_v10 = vrot.slane %v2165_v60, 4 }
 0xa5b   :  { %v2174_v26 = vadd.f32 %v2170_v22, %v4893_v43 }
 0xa5c   :  { %v2175_v23 = vadd.f32 %v2171_v10, %v4897_v62 }
 0xa5d   :  { %v2176_v30 = vmul.f32 0.5, %v2174_v26 }
 0xa5e   :  { %4258 = vtanh.f32 %v2175_v23  ;;  %v2180_v17 = vmul.f32 0.5, %v2175_v23 }
 0xa5f   :  { %4260 = vtanh.f32 %v2176_v30 }
 0xa68   :  { %v4259_v19 = vpop.eup %4258 }
 0xa69   :  { %2192 = vrot.lane.b32.xlu0 %v4259_v19, %s4385_s0  ;;  %v4261_v31 = vpop.eup %4260 }
 0xa6a   :  { %v2178_v34 = vmul.f32 0.5, %v4261_v31 }
 0xa6c   :  { %v2179_v38 = vadd.f32 0.5, %v2178_v34 }
 0xa6e   :  { %v2190_v54 = vmul.f32 %v2188_v50, %v2179_v38 }
 0xadb   :  { %v2193_v42 = vpop.permute.xlu0 %2192 }
 0xadc   :  { %v2195_v46 = vmul.f32 %v2193_v42, %v2179_v38 }
 0xade   :  { %2197 = vrot.lane.b32.xlu1 %v2195_v46, %s4385_s0 }
 0xb50   :  { %v2198_v55 = vpop.permute.xlu1 %2197 }
 0xb51   :  { %v2200_v3 = vadd.f32 %v2198_v55, %v2190_v54 }
 0xb53   :  { %4262 = vtanh.f32 %v2200_v3  ;;  %v2300_v21 = vrot.slane %v2200_v3, 2 }
 0xb54   :  { %4264 = vtanh.f32 %v2180_v17 }
 0xb5d   :  { %v4263_v4 = vpop.eup %4262 }
 0xb5e   :  { %2203 = vrot.lane.b32.xlu0 %v4263_v4, %s4385_s0  ;;  %v4265_v24 = vpop.eup %4264 }
 0xb5f   :  { %v2182_v44 = vmul.f32 0.5, %v4265_v24 }
 0xb61   :  { %v2183_v45 = vadd.f32 0.5, %v2182_v44 }
 0xbd0   :  { %v2204_v59 = vpop.permute.xlu0 %2203 }
 0xbd1   :  { %v2206_v56 = vmul.f32 %v2204_v59, %v2183_v45 }
 0xbd3   :  { %v2208_v36 = vrot.slane %v2206_v56, 4 }
 0xbd5   :  { %3412 = vmatmul.mubr.msk.f32.vlgmr.msra.gmra.mrb[30].mxu1 %vm2094_vm2, %v2208_v36 }
 0xbd6   :  { %4045 = vmatpush1.bf16.msra.mxu1 %v4901_v11  ;;  %2502 = vmatprep.mubr.f32.mxu1 %v5091_v2 }
 0xbd7   :  { %4047 = vmatprep.subr.bf16.mxu1 %v4913_v37 }
 0xbda   :  { %4049 = vmatpush1.bf16.msra.mxu1 %v4919_v57 }
 0xbdb   :  { %4051 = vmatprep.subr.bf16.mxu1 %v4924_v52 }
 0xbde   :  { %4053 = vmatpush1.bf16.msra.mxu1 %v4927_v39 }
 0xbdf   :  { %4055 = vmatprep.subr.bf16.mxu1 %v4932_v41 }
 0xbe2   :  { %4057 = vmatpush1.bf16.msra.mxu1 %v4935_v27 }
 0xbe3   :  { %4075 = vmatprep.subr.bf16.mxu1 %v4899_v7 }
 0xca8   :  { %v2277_v20 = vpop.f32.mrb[30].mxu1 }
 0xca9   :  { %v2279_v53 = vpop.f32.mrb[31].mxu1  ;;  %v2284_v5 = vrot.slane %v2277_v20, 6 }
 0xcaa   :  { %v2285_v48 = vrot.slane %v2279_v53, 6 }
 0xcab   :  { %v2288_v18 = vadd.f32 %v2284_v5, %v4947_v14 }
 0xcac   :  { %v2289_v6 = vadd.f32 %v2285_v48, %v4895_v58 }
 0xcad   :  { %v2290_v40 = vmul.f32 0.5, %v2288_v18 }
 0xcae   :  { %4266 = vtanh.f32 %v2289_v6  ;;  %v2294_v9 = vmul.f32 0.5, %v2289_v6 }
 0xcaf   :  { %4268 = vtanh.f32 %v2290_v40 }
 0xcb8   :  { %v4267_v49 = vpop.eup %4266 }
 0xcb9   :  { %2304 = vrot.lane.b32.xlu1 %v4267_v49, %s4385_s0  ;;  %v4269_v8 = vpop.eup %4268 }
 0xcba   :  { %v2292_v33 = vmul.f32 0.5, %v4269_v8 }
 0xcbc   :  { %v2293_v47 = vadd.f32 0.5, %v2292_v33 }
 0xcbe   :  { %v2302_v25 = vmul.f32 %v2300_v21, %v2293_v47 }
 0xd2b   :  { %v2305_v12 = vpop.permute.xlu1 %2304 }
 0xd2c   :  { %v2307_v28 = vmul.f32 %v2305_v12, %v2293_v47 }
 0xd2e   :  { %2309 = vrot.lane.b32.xlu0 %v2307_v28, %s4385_s0 }
 0xda0   :  { %v2310_v15 = vpop.permute.xlu0 %2309 }
 0xda1   :  { %v2312_v58 = vadd.f32 %v2310_v15, %v2302_v25 }
 0xda3   :  { %4270 = vtanh.f32 %v2312_v58 }
 0xda4   :  { %4272 = vtanh.f32 %v2294_v9 }
 0xdad   :  { %v4271_v13 = vpop.eup %4270 }
 0xdae   :  { %2315 = vrot.lane.b32.xlu1 %v4271_v13, %s4385_s0  ;;  %v4273_v14 = vpop.eup %4272 }
 0xdaf   :  { %v2296_v61 = vmul.f32 0.5, %v4273_v14 }
 0xdb1   :  { %v2297_v63 = vadd.f32 0.5, %v2296_v61 }
 0xe20   :  { %v2316_v35 = vpop.permute.xlu1 %2315 }
 0xe21   :  { %v2318_v60 = vmul.f32 %v2316_v35, %v2297_v63 }
 0xe23   :  { %v2320_v10 = vrot.slane %v2318_v60, 2 }
 0xe25   :  { %3413 = vmatmul.mubr.msk.f32.vlgmr.msra.gmra.mrb[24].mxu0 %vm2094_vm2, %v2320_v10 }
 0xe26   :  { %4061 = vmatpush1.bf16.msra.mxu0 %v4901_v11  ;;  %2622 = vmatprep.mubr.f32.mxu0 %v5091_v2 }
 0xe27   :  { %4063 = vmatprep.subr.bf16.mxu0 %v4913_v37 }
 0xe2a   :  { %4065 = vmatpush1.bf16.msra.mxu0 %v4919_v57 }
 0xe2b   :  { %4067 = vmatprep.subr.bf16.mxu0 %v4924_v52 }
 0xe2e   :  { %4069 = vmatpush1.bf16.msra.mxu0 %v4927_v39 }
 0xe2f   :  { %4071 = vmatprep.subr.bf16.mxu0 %v4932_v41 }
 0xe32   :  { %4073 = vmatpush1.bf16.msra.mxu0 %v4935_v27 }
 0xe33   :  { %4091 = vmatprep.subr.bf16.mxu0 %v4899_v7  ;;  %v2406_v7 = vrot.slane %v2312_v58, 2 }
 0xef8   :  { %v2389_v23 = vpop.f32.mrb[24].mxu0 }
 0xef9   :  { %v2391_v19 = vpop.f32.mrb[25].mxu0  ;;  %v2394_v30 = vadd.f32 %v2389_v23, %v4893_v43 }
 0xefa   :  { %v2395_v22 = vadd.f32 %v2391_v19, %v4897_v62 }
 0xefb   :  { %v2396_v31 = vmul.f32 0.5, %v2394_v30 }
 0xefc   :  { %4274 = vtanh.f32 %v2395_v22  ;;  %v2400_v4 = vmul.f32 0.5, %v2395_v22 }
 0xefd   :  { %4276 = vtanh.f32 %v2396_v31 }
 0xf06   :  { %v4275_v26 = vpop.eup %4274 }
 0xf07   :  { %2410 = vrot.lane.b32.xlu0 %v4275_v26, %s4385_s0  ;;  %v4277_v34 = vpop.eup %4276 }
 0xf08   :  { %v2398_v38 = vmul.f32 0.5, %v4277_v34 }
 0xf0a   :  { %v2399_v42 = vadd.f32 0.5, %v2398_v38 }
 0xf0c   :  { %v2408_v54 = vmul.f32 %v2406_v7, %v2399_v42 }
 0xf79   :  { %v2411_v46 = vpop.permute.xlu0 %2410 }
 0xf7a   :  { %v2413_v50 = vmul.f32 %v2411_v46, %v2399_v42 }
 0xf7c   :  { %2415 = vrot.lane.b32.xlu1 %v2413_v50, %s4385_s0 }
 0xfee   :  { %v2416_v55 = vpop.permute.xlu1 %2415 }
 0xfef   :  { %v2418_v3 = vadd.f32 %v2416_v55, %v2408_v54 }
 0xff1   :  { %4278 = vtanh.f32 %v2418_v3  ;;  %v2527_v47 = vrot.slane %v2418_v3, 2 }
 0xff2   :  { %4280 = vtanh.f32 %v2400_v4 }
 0xffb   :  { %v4279_v62 = vpop.eup %4278 }
 0xffc   :  { %2421 = vrot.lane.b32.xlu0 %v4279_v62, %s4385_s0  ;;  %v4281_v43 = vpop.eup %4280 }
 0xffd   :  { %v2402_v17 = vmul.f32 0.5, %v4281_v43 }
 0xfff   :  { %v2403_v24 = vadd.f32 0.5, %v2402_v17 }
0x106e   :  { %v2422_v44 = vpop.permute.xlu0 %2421 }
0x106f   :  { %v2424_v45 = vmul.f32 %v2422_v44, %v2403_v24 }
0x1071   :  { %3414 = vmatmul.mubr.msk.f32.vlgmr.msra.gmra.mrb[32].mxu1 %vm2094_vm2, %v2424_v45 }
0x1072   :  { %4077 = vmatpush1.bf16.msra.mxu1 %v4901_v11  ;;  %2734 = vmatprep.mubr.f32.mxu1 %v5091_v2 }
0x1073   :  { %4079 = vmatprep.subr.bf16.mxu1 %v4913_v37 }
0x1076   :  { %4081 = vmatpush1.bf16.msra.mxu1 %v4919_v57 }
0x1077   :  { %4083 = vmatprep.subr.bf16.mxu1 %v4924_v52 }
0x107a   :  { %4085 = vmatpush1.bf16.msra.mxu1 %v4927_v39 }
0x107b   :  { %4087 = vmatprep.subr.bf16.mxu1 %v4932_v41 }
0x107e   :  { %4089 = vmatpush1.bf16.msra.mxu1 %v4935_v27 }
0x1144   :  { %v2504_v59 = vpop.f32.mrb[32].mxu1 }
0x1145   :  { %v2506_v56 = vpop.f32.mrb[33].mxu1  ;;  %v2511_v48 = vrot.slane %v2504_v59, 2 }
0x1146   :  { %v2512_v36 = vrot.slane %v2506_v56, 2 }
0x1147   :  { %v2515_v6 = vadd.f32 %v2511_v48, %v4904_v16 }
0x1148   :  { %v2516_v20 = vadd.f32 %v2512_v36, %v4907_v29 }
0x1149   :  { %v2517_v49 = vmul.f32 0.5, %v2515_v6 }
0x114a   :  { %4282 = vtanh.f32 %v2516_v20  ;;  %v2521_v15 = vmul.f32 0.5, %v2516_v20 }
0x114b   :  { %4284 = vtanh.f32 %v2517_v49 }
0x1154   :  { %v4283_v53 = vpop.eup %4282 }
0x1155   :  { %2531 = vrot.lane.b32.xlu1 %v4283_v53, %s4385_s0  ;;  %v4285_v5 = vpop.eup %4284 }
0x1156   :  { %v2519_v18 = vmul.f32 0.5, %v4285_v5 }
0x1158   :  { %v2520_v40 = vadd.f32 0.5, %v2519_v18 }
0x115a   :  { %v2529_v12 = vmul.f32 %v2527_v47, %v2520_v40 }
0x11c7   :  { %v2532_v8 = vpop.permute.xlu1 %2531 }
0x11c8   :  { %v2534_v33 = vmul.f32 %v2532_v8, %v2520_v40 }
0x11ca   :  { %2536 = vrot.lane.b32.xlu0 %v2534_v33, %s4385_s0 }
0x123c   :  { %v2537_v28 = vpop.permute.xlu0 %2536 }
0x123d   :  { %v2539_v21 = vadd.f32 %v2537_v28, %v2529_v12 }
0x123f   :  { %4286 = vtanh.f32 %v2539_v21 }
0x1240   :  { %4288 = vtanh.f32 %v2521_v15 }
0x1249   :  { %v4287_v25 = vpop.eup %4286 }
0x124a   :  { %2542 = vrot.lane.b32.xlu1 %v4287_v25, %s4385_s0  ;;  %v4289_v58 = vpop.eup %4288 }
0x124b   :  { %v2523_v13 = vmul.f32 0.5, %v4289_v58 }
0x124d   :  { %v2524_v9 = vadd.f32 0.5, %v2523_v13 }
0x12bc   :  { %v2543_v14 = vpop.permute.xlu1 %2542 }
0x12bd   :  { %v2545_v61 = vmul.f32 %v2543_v14, %v2524_v9 }
0x12bf   :  { %v2555_v63 = vrot.slane %v2545_v61, 6 }
0x12c1   :  { %3415 = vmatmul.mubr.msk.f32.vlgmr.msra.gmra.mrb[26].mxu0 %vm2094_vm2, %v2555_v63 }
0x12c2   :  { %4093 = vmatpush1.bf16.msra.mxu0 %v4901_v11  ;;  %2846 = vmatprep.mubr.f32.mxu0 %v5091_v2 }
0x12c3   :  { %4095 = vmatprep.subr.bf16.mxu0 %v4913_v37 }
0x12c6   :  { %4097 = vmatpush1.bf16.msra.mxu0 %v4919_v57 }
0x12c7   :  { %4099 = vmatprep.subr.bf16.mxu0 %v4924_v52 }
0x12ca   :  { %4101 = vmatpush1.bf16.msra.mxu0 %v4927_v39 }
0x12cb   :  { %4103 = vmatprep.subr.bf16.mxu0 %v4932_v41 }
0x12ce   :  { %4105 = vmatpush1.bf16.msra.mxu0 %v4935_v27  ;;  %v2647_v27 = vrot.slane %v2539_v21, 2 }
0x1394   :  { %v2624_v35 = vpop.f32.mrb[26].mxu0 }
0x1395   :  { %v2626_v60 = vpop.f32.mrb[27].mxu0  ;;  %v2631_v37 = vrot.slane %v2624_v35, 4 }
0x1396   :  { %v2632_v10 = vrot.slane %v2626_v60, 4 }
0x1397   :  { %v2635_v57 = vadd.f32 %v2631_v37, %v4910_v32  ;;  %v4386_v37 = vmov 0.0|0.0  }
0x1398   :  { %v2636_v23 = vadd.f32 %v2632_v10, %v4916_v51  ;;  %v2884_v10 = vld [vmem:[#allocation5 + $0x580] sm:$0xff]  ;;  %4106 = vmatprep.subr.bf16.mxu1 %v4386_v37 }
0x1399   :  { %v2637_v19 = vmul.f32 0.5, %v2635_v57  ;;  %v2887_v57 = vld [vmem:[#allocation5 + $0x5e0] sm:$0xff] }
0x139a   :  { %4290 = vtanh.f32 %v2636_v23  ;;  %v2641_v42 = vmul.f32 0.5, %v2636_v23  ;;  %v2885_v23 = vld [vmem:[#allocation5 + $0x5a0] sm:$0xff] }
0x139b   :  { %4292 = vtanh.f32 %v2637_v19 }
0x13a4   :  { %v4291_v11 = vpop.eup %4290 }
0x13a5   :  { %2651 = vrot.lane.b32.xlu0 %v4291_v11, %s4385_s0  ;;  %v4293_v52 = vpop.eup %4292  ;;  %v2886_v11 = vld [vmem:[#allocation5 + $0x5c0] sm:$0xff] }
0x13a6   :  { %v2639_v39 = vmul.f32 0.5, %v4293_v52  ;;  %v4110_v19 = vpack.c.bf16 %v2887_v57, %v2886_v11  ;;  %v2889_v52 = vld [vmem:[#allocation5 + $0x620] sm:$0xff]  ;;  %v3187_v11 = vld [vmem:[#allocation5 + $0x808] sm:$0xff] }
0x13a7   :  { %v3184_v57 = vld [vmem:[#allocation5 + $0x7e0] sm:$0xff] }
0x13a8   :  { %v2640_v22 = vadd.f32 0.5, %v2639_v39 }
0x13aa   :  { %v2649_v30 = vmul.f32 %v2647_v27, %v2640_v22 }
0x1417   :  { %v2652_v41 = vpop.permute.xlu0 %2651 }
0x1418   :  { %v2654_v26 = vmul.f32 %v2652_v41, %v2640_v22  ;;  %v2890_v22 = vld [vmem:[#allocation5 + $0x640] sm:$0xff] }
0x1419   :  { %v2891_v41 = vld [vmem:[#allocation5 + $0x660] sm:$0xff] }
0x141a   :  { %2656 = vrot.lane.b32.xlu1 %v2654_v26, %s4385_s0  ;;  %v4116_v26 = vpack.c.bf16 %v2891_v41, %v2890_v22  ;;  %v3188_v41 = vld [vmem:[#allocation5 + $0x820] sm:$0xff] }
0x148c   :  { %v2657_v31 = vpop.permute.xlu1 %2656 }
0x148d   :  { %v2659_v34 = vadd.f32 %v2657_v31, %v2649_v30 }
0x148f   :  { %4294 = vtanh.f32 %v2659_v34  ;;  %v2759_v6 = vrot.slane %v2659_v34, 2 }
0x1490   :  { %4296 = vtanh.f32 %v2641_v42 }
0x1499   :  { %v4295_v38 = vpop.eup %4294 }
0x149a   :  { %2662 = vrot.lane.b32.xlu0 %v4295_v38, %s4385_s0  ;;  %v4297_v46 = vpop.eup %4296 }
0x149b   :  { %v2643_v50 = vmul.f32 0.5, %v4297_v46 }
0x149d   :  { %v2644_v7 = vadd.f32 0.5, %v2643_v50 }
0x150c   :  { %v2663_v54 = vpop.permute.xlu0 %2662 }
0x150d   :  { %v2665_v55 = vmul.f32 %v2663_v54, %v2644_v7 }
0x150f   :  { %v2667_v3 = vrot.slane %v2665_v55, 4 }
0x1511   :  { %3416 = vmatmul.mubr.msk.f32.vlgmr.msra.gmra.mrb[34].mxu1 %vm2094_vm2, %v2667_v3  ;;  %v2892_v3 = vld [vmem:[#allocation5 + $0x680] ss:$0 sm:$0xff] }
0x1512   :  { %3460 = vmatprep.mubr.msk.f32.mxu1 %vm4387_vm3, %v5091_v2 }
0x15e4   :  { %v2736_v62 = vpop.f32.mrb[34].mxu1 }
0x15e5   :  { %v2738_v4 = vpop.f32.mrb[35].mxu1  ;;  %v2743_v44 = vrot.slane %v2736_v62, 6 }
0x15e6   :  { %v2744_v43 = vrot.slane %v2738_v4, 6 }
0x15e7   :  { %v2747_v45 = vadd.f32 %v2743_v44, %v4904_v16  ;;  %v2977_v44 = vld [vmem:[#allocation5 + $0x6a8] sm:$0x7] }
0x15e8   :  { %v2748_v17 = vadd.f32 %v2744_v43, %v4907_v29  ;;  %3419 = vmatprep.subr.msk.mxu0 %vm3002_vm4, %v2977_v44 }
0x15e9   :  { %v2749_v59 = vmul.f32 0.5, %v2747_v45  ;;  %v2976_v45 = vld [vmem:[#allocation5 + $0x6a0] sm:$0x7] }
0x15ea   :  { %4298 = vtanh.f32 %v2748_v17  ;;  %v2753_v40 = vmul.f32 0.5, %v2748_v17 }
0x15eb   :  { %4300 = vtanh.f32 %v2749_v59  ;;  %v2979_v59 = vld [vmem:[#allocation5 + $0x6b8] sm:$0x7] }
0x15f4   :  { %v4299_v24 = vpop.eup %4298 }
0x15f5   :  { %2763 = vrot.lane.b32.xlu1 %v4299_v24, %s4385_s0  ;;  %v4301_v56 = vpop.eup %4300 }
0x15f6   :  { %v2751_v36 = vmul.f32 0.5, %v4301_v56  ;;  %v2978_v56 = vld [vmem:[#allocation5 + $0x6b0] sm:$0x7] }
0x15f8   :  { %v2752_v20 = vadd.f32 0.5, %v2751_v36 }
0x15fa   :  { %v2761_v49 = vmul.f32 %v2759_v6, %v2752_v20 }
0x1667   :  { %v2764_v53 = vpop.permute.xlu1 %2763 }
0x1668   :  { %v2766_v48 = vmul.f32 %v2764_v53, %v2752_v20  ;;  %v2966_v20 = vld [vmem:[#allocation3] sm:$0x3] }
0x166a   :  { %2768 = vrot.lane.b32.xlu0 %v2766_v48, %s4385_s0 }
0x16dc   :  { %v2769_v5 = vpop.permute.xlu0 %2768 }
0x16dd   :  { %v2771_v29 = vadd.f32 %v2769_v5, %v2761_v49  ;;  %v3169_v49 = vld [vmem:[#allocation5 + $0x6e8] sm:$0xff] }
0x16de   :  { %v3171_v5 = vld [vmem:[#allocation5 + $0x708] sm:$0xff] }
0x16df   :  { %4302 = vtanh.f32 %v2771_v29  ;;  %v2865_v27 = vrot.slane %v2771_v29, 2  ;;  %v4118_v29 = vpack.c.bf16 %v3171_v5, %v3169_v49 }
0x16e0   :  { %4304 = vtanh.f32 %v2753_v40  ;;  %v3170_v40 = vld [vmem:[#allocation5 + $0x700] sm:$0xff] }
0x16e9   :  { %v4303_v18 = vpop.eup %4302 }
0x16ea   :  { %2774 = vrot.lane.b32.xlu1 %v4303_v18, %s4385_s0  ;;  %v4305_v16 = vpop.eup %4304  ;;  %v3168_v18 = vld [vmem:[#allocation5 + $0x6e0] sm:$0xff] }
0x16eb   :  { %v2755_v8 = vmul.f32 0.5, %v4305_v16  ;;  %v4120_v16 = vpack.c.bf16 %v3170_v40, %v3168_v18 }
0x16ed   :  { %v2756_v33 = vadd.f32 0.5, %v2755_v8  ;;  %v3173_v8 = vld [vmem:[#allocation5 + $0x728] sm:$0xff] }
0x175c   :  { %v2775_v47 = vpop.permute.xlu1 %2774 }
0x175d   :  { %v2777_v12 = vmul.f32 %v2775_v47, %v2756_v33  ;;  %v3175_v33 = vld [vmem:[#allocation5 + $0x748] sm:$0xff] }
0x175e   :  { %v4122_v47 = vpack.c.bf16 %v3175_v33, %v3173_v8 }
0x175f   :  { %v2779_v28 = vrot.slane %v2777_v12, 2  ;;  %v3172_v12 = vld [vmem:[#allocation5 + $0x720] sm:$0xff] }
0x1761   :  { %3417 = vmatmul.mubr.msk.f32.vlgmr.msra.gmra.mrb[28].mxu0 %vm2094_vm2, %v2779_v28  ;;  %v3174_v28 = vld [vmem:[#allocation5 + $0x740] sm:$0xff] }
0x1762   :  { %3079 = vmatprep.mubr.f32.mxu0 %v5091_v2  ;;  %3420 = vmatpush1.msk.msra.mxu0 %vm3002_vm4, %v2976_v45 }
0x1763   :  { %4119 = vmatprep.subr.bf16.mxu0 %v4118_v29 }
0x1834   :  { %v2848_v21 = vpop.f32.mrb[28].mxu0 }
0x1835   :  { %v2850_v25 = vpop.f32.mrb[29].mxu0  ;;  %v2853_v13 = vadd.f32 %v2848_v21, %v4910_v32  ;;  %v2888_v32 = vld [vmem:[#allocation5 + $0x600] sm:$0xff]  ;;  %v4124_v21 = vpack.c.bf16 %v3174_v28, %v3172_v12 }
0x1836   :  { %v2854_v15 = vadd.f32 %v2850_v25, %v4916_v51  ;;  %v4107_v51 = vpack.c.bf16 %v2885_v23, %v2884_v10  ;;  %v4113_v39 = vpack.c.bf16 %v2889_v52, %v2888_v32  ;;  %v3177_v25 = vld [vmem:[#allocation5 + $0x768] sm:$0xff] }
0x1837   :  { %v2855_v9 = vmul.f32 0.5, %v2853_v13  ;;  %v3178_v13 = vld [vmem:[#allocation5 + $0x780] sm:$0xff]  ;;  %v3185_v23 = vld [vmem:[#allocation5 + $0x7e8] sm:$0xff] }
0x1838   :  { %4306 = vtanh.f32 %v2854_v15  ;;  %4108 = vmatpush3.bf16.msra.mxu1 %v4107_v51  ;;  %v2859_v42 = vmul.f32 0.5, %v2854_v15  ;;  %v3179_v15 = vld [vmem:[#allocation5 + $0x788] sm:$0xff]  ;;  %v4134_v51 = vpack.c.bf16 %v3187_v11, %v3185_v23  ;;  %v3305_v11 = vld [vmem:[#allocation5 + $0x9a0] sm:$0xff] }
0x1839   :  { %4308 = vtanh.f32 %v2855_v9  ;;  %4109 = vmatprep.subr.bf16.mxu1 %v4386_v37  ;;  %v3189_v52 = vld [vmem:[#allocation5 + $0x828] sm:$0xff] }
0x183c   :  { %4111 = vmatpush3.bf16.msra.mxu1 %v4110_v19  ;;  %v3186_v19 = vld [vmem:[#allocation5 + $0x800] sm:$0xff] }
0x183d   :  { %4112 = vmatprep.subr.bf16.mxu1 %v4386_v37  ;;  %v4136_v32 = vpack.c.bf16 %v3186_v19, %v3184_v57  ;;  %v3307_v57 = vld [vmem:[#allocation5 + $0x9e0] sm:$0xff] }
0x1840   :  { %4114 = vmatpush3.bf16.msra.mxu1 %v4113_v39  ;;  %v3191_v39 = vld [vmem:[#allocation5 + $0x848] sm:$0xff] }
0x1841   :  { %4115 = vmatprep.subr.bf16.mxu1 %v4386_v37  ;;  %v4138_v22 = vpack.c.bf16 %v3191_v39, %v3189_v52 }
0x1842   :  { %v4307_v58 = vpop.eup %4306 }
0x1843   :  { %2869 = vrot.lane.b32.xlu0 %v4307_v58, %s4385_s0  ;;  %v4309_v14 = vpop.eup %4308  ;;  %v4126_v58 = vpack.c.bf16 %v3179_v15, %v3177_v25  ;;  %v3201_v15 = vld [vmem:[#allocation5 + $0x8e0] ss:$8 sm:$0x3] }
0x1844   :  { %v2857_v61 = vmul.f32 0.5, %v4309_v14  ;;  %4117 = vmatpush3.bf16.msra.mxu1 %v4116_v26  ;;  %v3181_v14 = vld [vmem:[#allocation5 + $0x7a8] sm:$0xff]  ;;  %v3190_v26 = vld [vmem:[#allocation5 + $0x840] sm:$0xff]  ;;  %v3206_v52 = vrot.slane %v3201_v15, %v5096_v1 }
0x1845   :  { %3422 = vmatprep.subr.msk.mxu1 %vm3002_vm4, %v2979_v59  ;;  %v5098_v59 = vld [vmem:[#allocation9_spill] sm:$0xff] }
0x1846   :  { %v2858_v63 = vadd.f32 0.5, %v2857_v61  ;;  %v3183_v61 = vld [vmem:[#allocation5 + $0x7c8] sm:$0xff] }
0x1848   :  { %v2867_v30 = vmul.f32 %v2865_v27, %v2858_v63  ;;  %v3193_v27 = vld [vmem:[#allocation5 + $0x868] sm:$0xff] }
0x18b5   :  { %v2870_v35 = vpop.permute.xlu0 %2869 }
0x18b6   :  { %v2872_v60 = vmul.f32 %v2870_v35, %v2858_v63  ;;  %v4130_v63 = vpack.c.bf16 %v3183_v61, %v3181_v14  ;;  %v3180_v35 = vld [vmem:[#allocation5 + $0x7a0] sm:$0xff] }
0x18b8   :  { %2874 = vrot.lane.b32.xlu1 %v2872_v60, %s4385_s0  ;;  %v3182_v60 = vld [vmem:[#allocation5 + $0x7c0] sm:$0xff] }
0x18b9   :  { %v4132_v10 = vpack.c.bf16 %v3182_v60, %v3180_v35  ;;  %v3302_v35 = vld [vmem:[#allocation5 + $0x940] sm:$0xff] }
0x18ba   :  { %v3303_v60 = vld [vmem:[#allocation5 + $0x960] sm:$0xff] }
0x18bb   :  { %v4154_v23 = vpack.c.bf16 %v3303_v60, %v3302_v35 }
0x192a   :  { %v2875_v31 = vpop.permute.xlu1 %2874 }
0x192b   :  { %v2877_v34 = vadd.f32 %v2875_v31, %v2867_v30  ;;  %v4140_v30 = vpack.c.bf16 %v3190_v26, %v3188_v41  ;;  %v3195_v31 = vld [vmem:[#allocation5 + $0x888] sm:$0xff] }
0x192d   :  { %4310 = vtanh.f32 %v2877_v34  ;;  %v3192_v34 = vld [vmem:[#allocation5 + $0x860] sm:$0xff] }
0x192e   :  { %4312 = vtanh.f32 %v2859_v42  ;;  %v4142_v42 = vpack.c.bf16 %v3195_v31, %v3193_v27 }
0x1937   :  { %v4311_v38 = vpop.eup %4310 }
0x1938   :  { %2880 = vrot.lane.b32.xlu0 %v4311_v38, %s4385_s0  ;;  %v4313_v46 = vpop.eup %4312  ;;  %v3194_v38 = vld [vmem:[#allocation5 + $0x880] sm:$0xff] }
0x1939   :  { %v2861_v50 = vmul.f32 0.5, %v4313_v46  ;;  %v3197_v46 = vld [vmem:[#allocation5 + $0x8a8] sm:$0xff] }
0x193b   :  { %v2862_v7 = vadd.f32 0.5, %v2861_v50  ;;  %v3199_v50 = vld [vmem:[#allocation5 + $0x8c8] sm:$0xff] }
0x19aa   :  { %v2881_v54 = vpop.permute.xlu0 %2880 }
0x19ab   :  { %v2883_v55 = vmul.f32 %v2881_v54, %v2862_v7  ;;  %v4144_v7 = vpack.c.bf16 %v3194_v38, %v3192_v34  ;;  %v4146_v54 = vpack.c.bf16 %v3199_v50, %v3197_v46 }
0x19ad   :  { %3461 = vmatmul.mubr.msk.f32.vlgmr.msra.gmra.mrb[36].mxu1 %vm2094_vm2, %v2883_v55  ;;  %v3196_v55 = vld [vmem:[#allocation5 + $0x8a0] sm:$0xff] }
0x19ae   :  { %3149 = vmatprep.mubr.f32.mxu1 %v5091_v2  ;;  %3423 = vmatpush1.msk.msra.mxu1 %vm3002_vm4, %v2978_v56  ;;  %v5099_v56 = vsub.s32 3, %v5098_v59 }
0x19af   :  { %4150 = vmatprep.subr.bf16.mxu1 %v4386_v37 }
0x1a80   :  { %v2962_v62 = vpop.f32.mrb[36].mxu1 }
0x1a81   :  { %v2963_v4 = vadd.f32 %v2962_v62, %v2892_v3  ;;  %v3462_v43 = vpop.f32.mrb[37].mxu1  ;;  %v3198_v3 = vld [vmem:[#allocation5 + $0x8c0] sm:$0xff] }
0x1a82   :  { %v4148_v62 = vpack.c.bf16 %v3198_v3, %v3196_v55 }
0x1a83   :  { %v2967_v17 = vmul.f32 0.5, %v2963_v4 }
0x1a85   :  { %v2968_v24 = vmul.f32 1.442695, %v2967_v17 }
0x1a87   :  { %4314 = vpow2.f32 %v2968_v24 }
0x1a91   :  { %v4315_v36 = vpop.eup %4314 }
0x1a92   :  { %2971 = vrot.lane.b32.xlu1 %v4315_v36, %s4388_s13 }
0x1a96   :  { %3383 = vrot.lane.b32.xlu1 %v2963_v4, %s4389_s14 }
0x1b04   :  { %v2972_v53 = vpop.permute.xlu1 %2971 }
0x1b05   :  { %v2974_v48 = vmul.f32 %v2972_v53, %v2966_v20  ;;  %v5100_v53 = vsub.s32 2, %v5098_v59 }
0x1b07   :  { %v2975_v6 = vadd.f32 %v2974_v48, %v2963_v4  ;;  %v2981_v4 = vld [vmem:[#allocation5 + $0x6c0] ss:$8 sm:$0xf] }
0x1b08   :  { %v2986_v43 = vrot.slane %v2981_v4, %v5096_v1  ;;  %v2994_v36 = vrot.slane %v2981_v4, %v5099_v56  ;;  %v2990_v48 = vrot.slane %v2981_v4, %v5100_v53  ;;  %v3384_v3 = vpop.permute.xlu1 %3383 }
0x1b09   :  { %3421 = vmatmul.mubr.msk.f32.vlgmr.msra.gmra.mrb[30].mxu0 %vm2998_vm5, %v2975_v6  ;;  %3424 = vmatmul.mubr.msk.f32.vlgmr.msra.gmra.mrb[38].mxu1 %vm2998_vm5, %v2975_v6 }
0x1b0a   :  { %3277 = vmatprep.mubr.f32.mxu0 %v5091_v2  ;;  %3479 = vmatprep.mubr.msk.f32.mxu1 %vm4387_vm3, %v5091_v2  ;;  %v3176_v2 = vld [vmem:[#allocation5 + $0x760] sm:$0xff] }
0x1b0b   :  { %4121 = vmatpush1.bf16.msra.mxu0 %v4120_v16  ;;  %v4128_v9 = vpack.c.bf16 %v3178_v13, %v3176_v2  ;;  %v3300_v13 = vld [vmem:[#allocation5 + $0x900] sm:$0xff] }
0x1b0c   :  { %4123 = vmatprep.subr.bf16.mxu0 %v4122_v47 }
0x1b0f   :  { %4125 = vmatpush1.bf16.msra.mxu0 %v4124_v21 }
0x1b10   :  { %4127 = vmatprep.subr.bf16.mxu0 %v4126_v58  ;;  %v3210_v58 = vrot.slane %v3201_v15, %v5097_v0  ;;  %v3306_v0 = vld [vmem:[#allocation5 + $0x9c0] sm:$0xff] }
0x1b11   :  { %v4160_v19 = vpack.c.bf16 %v3307_v57, %v3306_v0 }
0x1b13   :  { %4129 = vmatpush1.bf16.msra.mxu0 %v4128_v9  ;;  %v3301_v9 = vld [vmem:[#allocation5 + $0x920] sm:$0xff] }
0x1b14   :  { %4131 = vmatprep.subr.bf16.mxu0 %v4130_v63  ;;  %v4151_v61 = vpack.c.bf16 %v3301_v9, %v3300_v13 }
0x1b16   :  { %4152 = vmatpush3.bf16.msra.mxu1 %v4151_v61 }
0x1b17   :  { %4133 = vmatpush1.bf16.msra.mxu0 %v4132_v10  ;;  %4153 = vmatprep.subr.bf16.mxu1 %v4386_v37  ;;  %v3304_v10 = vld [vmem:[#allocation5 + $0x980] sm:$0xff] }
0x1b18   :  { %4135 = vmatprep.subr.bf16.mxu0 %v4134_v51  ;;  %v4157_v51 = vpack.c.bf16 %v3305_v11, %v3304_v10 }
0x1b1a   :  { %4155 = vmatpush3.bf16.msra.mxu1 %v4154_v23 }
0x1b1b   :  { %4137 = vmatpush1.bf16.msra.mxu0 %v4136_v32  ;;  %4156 = vmatprep.subr.bf16.mxu1 %v4386_v37 }
0x1b1c   :  { %4139 = vmatprep.subr.bf16.mxu0 %v4138_v22 }
0x1b1e   :  { %4158 = vmatpush3.bf16.msra.mxu1 %v4157_v51 }
0x1b1f   :  { %4141 = vmatpush1.bf16.msra.mxu0 %v4140_v30  ;;  %4159 = vmatprep.subr.bf16.mxu1 %v4386_v37 }
0x1b20   :  { %4143 = vmatprep.subr.bf16.mxu0 %v4142_v42 }
0x1b22   :  { %4161 = vmatpush3.bf16.msra.mxu1 %v4160_v19 }
0x1b23   :  { %4145 = vmatpush1.bf16.msra.mxu0 %v4144_v7  ;;  %v3308_v7 = vld [vmem:[#allocation5 + $0xa00] ss:$0 sm:$0xff] }
0x1b24   :  { %4147 = vmatprep.subr.bf16.mxu0 %v4146_v54 }
0x1b27   :  { %4149 = vmatpush1.bf16.msra.mxu0 %v4148_v62 }
0x1bdc   :  { %v3081_v17 = vpop.f32.mrb[30].mxu0  ;;  %v3151_v24 = vpop.f32.mrb[38].mxu1 }
0x1bdd   :  { %v3082_v44 = vadd.f32 %v3081_v17, %v2986_v43  ;;  %v3083_v45 = vpop.f32.mrb[31].mxu0  ;;  %v3153_v20 = vpop.f32.mrb[39].mxu1  ;;  %v3152_v5 = vadd.f32 %v3151_v24, %v2990_v48 }
0x1bde   :  { %v3154_v49 = vadd.f32 %v3153_v20, %v2994_v36 }
0x1bdf   :  { %v3156_v6 = vmul.f32 0.5, %v3082_v44  ;;  %v3160_v29 = vmul.f32 0.5, %v3152_v5 }
0x1be1   :  { %4316 = vtanh.f32 %v3156_v6 }
0x1be2   :  { %4318 = vtanh.f32 %v3154_v49 }
0x1be3   :  { %4320 = vtanh.f32 %v3160_v29 }
0x1beb   :  { %v4317_v18 = vpop.eup %4316 }
0x1bec   :  { %v3158_v40 = vmul.f32 0.5, %v4317_v18  ;;  %v4319_v8 = vpop.eup %4318 }
0x1bed   :  { %v4321_v47 = vpop.eup %4320 }
0x1bee   :  { %v3159_v16 = vadd.f32 0.5, %v3158_v40  ;;  %v3162_v12 = vmul.f32 0.5, %v4321_v47 }
0x1bf0   :  { %v3165_v33 = vmul.f32 %v4319_v8, %v3159_v16  ;;  %v3163_v28 = vadd.f32 0.5, %v3162_v12 }
0x1bf2   :  { %4322 = vtanh.f32 %v3165_v33 }
0x1bfc   :  { %v4323_v21 = vpop.eup %4322 }
0x1bfd   :  { %v3167_v25 = vmul.f32 %v4323_v21, %v3163_v28 }
0x1bff   :  { %3278 = vmatmul.mubr.f32.vlgmr.msra.gmra.mrb[32].mxu0 %v3167_v25 }
0x1cd2   :  { %v3279_v2 = vpop.f32.mrb[32].mxu0 }
0x1cd3   :  { %v3281_v14 = vpop.f32.mrb[33].mxu0  ;;  %v3280_v39 = vadd.f32 %v3279_v2, %v3206_v52 }
0x1cd4   :  { %v3282_v63 = vadd.f32 %v3281_v14, %v3210_v58 }
0x1cd5   :  { %v3284_v22 = vmul.f32 0.5, %v3280_v39 }
0x1cd6   :  { %4324 = vtanh.f32 %v3282_v63  ;;  %v3288_v41 = vmul.f32 0.5, %v3282_v63 }
0x1cd7   :  { %4326 = vtanh.f32 %v3284_v22 }
0x1cd8   :  { %4328 = vtanh.f32 %v3288_v41 }
0x1ce0   :  { %v4325_v32 = vpop.eup %4324 }
0x1ce1   :  { %3294 = vrot.lane.b32.xlu0 %v4325_v32, %s4385_s0  ;;  %v4327_v26 = vpop.eup %4326 }
0x1ce2   :  { %v3286_v27 = vmul.f32 0.5, %v4327_v26  ;;  %v4329_v38 = vpop.eup %4328 }
0x1ce3   :  { %v3290_v42 = vmul.f32 0.5, %v4329_v38 }
0x1ce4   :  { %v3287_v30 = vadd.f32 0.5, %v3286_v27 }
0x1ce5   :  { %v3291_v37 = vadd.f32 0.5, %v3290_v42 }
0x1d53   :  { %v3295_v31 = vpop.permute.xlu0 %3294 }
0x1d54   :  { %v3297_v34 = vmul.f32 %v3295_v31, %v3287_v30 }
0x1d56   :  { %4330 = vtanh.f32 %v3297_v34 }
0x1d60   :  { %v4331_v46 = vpop.eup %4330 }
0x1d61   :  { %v3299_v50 = vmul.f32 %v4331_v46, %v3291_v37 }
0x1d63   :  { %3480 = vmatmul.mubr.msk.f32.vlgmr.msra.gmra.mrb[40].mxu1 %vm2094_vm2, %v3299_v50 }
0x1e36   :  { %v3378_v1 = vpop.f32.mrb[40].mxu1 }
0x1e37   :  { %v3379_v54 = vadd.f32 %v3378_v1, %v3308_v7  ;;  %v3481_v55 = vpop.f32.mrb[41].mxu1 }
0x1e39   :  { %v3386_v62 = vsel %vm69_vm1, %v3379_v54, %v3384_v3 }
0x1e3a   :  { %3388 = vst.msk [vmem:[%s5069_s3] sm:$0x3] %vm3387_vm6, %v3386_v62 }
0x1e3b   :  { %3393 = vsyncpa [#allocation4], 1 }
0x1e3c   :  { %3394 = vsyncpa [#allocation6], 1 }

</bundles_post_ra>
